<compile_context>
chip_gen: v6e
topology: v6e:2x2x1
jax: 0.10.0
libtpu: 0.0.40
codegen_flags: <defaults>
</compile_context>

<pallas_src>
import functools

import jax
import jax.numpy as jnp
import numpy as np
from jax import lax
from jax.experimental import pallas as pl
from jax.experimental.pallas import tpu as pltpu

_NEG_INF = -1e30


def _layer_norm(v, gamma, beta, eps=1e-5):
    mu = jnp.mean(v, axis=-1, keepdims=True)
    var = jnp.mean((v - mu) ** 2, axis=-1, keepdims=True)
    return (v - mu) * lax.rsqrt(var + eps) * gamma + beta


def _decoder_block_kernel(
    x_ref,
    wqkv_ref, bqkv_ref, wo_ref, bo_ref,
    g1_ref, b1n_ref, g2_ref, b2n_ref,
    w1_ref, bm1_ref, w2_ref, bm2_ref,
    out_ref, attn_ref,
    k_scr, v_scr, s_buf, m_scr, l_scr, ctx_acc, ctx_all,
    *, n_heads, with_residuals,
):
    H = n_heads
    TQ = out_ref.shape[1]              # query rows in this tile
    E = out_ref.shape[2]
    T = attn_ref.shape[3]              # full sequence length (key axis)
    Dh = E // H
    nkv = T // TQ                      # number of KV blocks (static)
    i = pl.program_id(1)               # q-tile index

    # ---- LayerNorm-1 + fused QKV projection for this q-tile (one MXU pass) ----
    x_q = x_ref[0]                                                     # (TQ, E) f32
    h_q = _layer_norm(x_q, g1_ref[...], b1n_ref[...])
    h_q_bf = h_q.astype(jnp.bfloat16)

    qkv = jnp.dot(h_q_bf, wqkv_ref[...],
                  preferred_element_type=jnp.float32) + bqkv_ref[...]  # (TQ, 3E)
    q_all = qkv[:, :E].astype(jnp.bfloat16)            # 1/sqrt(Dh) folded into Wq/bq
    # Causality: q-tile i only attends to KV rows < (i+1)*TQ; those rows are
    # produced by grid steps <= i (q axis is "arbitrary" -> sequential per batch
    # element), so this incremental per-tile write is sufficient.
    k_scr[i] = qkv[:, E:2 * E].astype(jnp.bfloat16)
    v_scr[i] = qkv[:, 2 * E:].astype(jnp.bfloat16)

    # Causal-mask pieces (head/block-invariant parts hoisted).
    row_g = i * TQ + lax.broadcasted_iota(jnp.int32, (TQ, 1), 0)
    col_l = lax.broadcasted_iota(jnp.int32, (1, TQ), 1)
    zero_attn_blk = jnp.zeros((TQ, TQ), attn_ref.dtype)

    for hh in range(H):
        hs, he = hh * Dh, (hh + 1) * Dh
        q_h = q_all[:, hs:he]                                          # (TQ, Dh) bf16

        # pass 1: scores for active KV blocks (j <= i) + running row max.
        m_scr[...] = jnp.full(m_scr.shape, _NEG_INF, m_scr.dtype)
        for j in range(nkv):
            @pl.when(j <= i)
            def _(j=j):
                k_blk = k_scr[j, :, hs:he]                             # (TQ, Dh) bf16
                s = lax.dot_general(q_h, k_blk, (((1,), (1,)), ((), ())),
                                    preferred_element_type=jnp.float32)
                s = jnp.where(j * TQ + col_l <= row_g, s, _NEG_INF)
                s_buf[:, j * TQ:(j + 1) * TQ] = s
                m_scr[...] = jnp.maximum(m_scr[...], s.max(axis=-1, keepdims=True))

        # pass 2: exp / row-sum / context over active blocks only.
        l_scr[...] = jnp.zeros_like(l_scr)
        ctx_acc[...] = jnp.zeros_like(ctx_acc)
        for j in range(nkv):
            @pl.when(j <= i)
            def _(j=j):
                e = jnp.exp(s_buf[:, j * TQ:(j + 1) * TQ] - m_scr[...])
                s_buf[:, j * TQ:(j + 1) * TQ] = e
                l_scr[...] += jnp.sum(e, axis=-1, keepdims=True)
                ctx_acc[...] += jnp.dot(e.astype(jnp.bfloat16), v_scr[j, :, hs:he],
                                        preferred_element_type=jnp.float32)

        denom = l_scr[...]
        r = pl.reciprocal(denom, approx=True)          # EUP slot
        r = r * (2.0 - denom * r)                      # one Newton step -> ~f32 accuracy
        ctx_all[:, hs:he] = (ctx_acc[...] * r).astype(jnp.bfloat16)

        # pass 3: normalized probabilities; zero-fill the causally-masked tail.
        for j in range(nkv):
            @pl.when(j <= i)
            def _(j=j):
                attn_ref[0, hh, :, j * TQ:(j + 1) * TQ] = (
                    s_buf[:, j * TQ:(j + 1) * TQ] * r).astype(attn_ref.dtype)

            @pl.when(j > i)
            def _(j=j):
                attn_ref[0, hh, :, j * TQ:(j + 1) * TQ] = zero_attn_blk

    # ---- output projection: ONE (TQ,E)@(E,E) matmul over concatenated heads ----
    att = jnp.dot(ctx_all[...], wo_ref[...],
                  preferred_element_type=jnp.float32) + bo_ref[...]
    # TODO(synk): dropout1 / dropout2 are identity here (eval-mode semantics).

    def mlp(z):
        m1 = jnp.dot(z.astype(jnp.bfloat16), w1_ref[...],
                     preferred_element_type=jnp.float32) + bm1_ref[...]
        # TODO(synk): PyTorch nn.GELU defaults to exact erf; tanh approximation used here.
        m1 = jax.nn.gelu(m1)
        return jnp.dot(m1.astype(jnp.bfloat16), w2_ref[...],
                       preferred_element_type=jnp.float32) + bm2_ref[...]

    if with_residuals:
        # PyTorch forward adds the attention output to the LayerNorm-1 output and
        # the MLP output to the LayerNorm-2 output (matches the module spec).
        x1 = h_q + att
        h2 = _layer_norm(x1, g2_ref[...], b2n_ref[...])
        out_ref[0] = (h2 + mlp(h2)).astype(out_ref.dtype)
    else:
        h2 = _layer_norm(att, g2_ref[...], b2n_ref[...])
        out_ref[0] = mlp(h2).astype(out_ref.dtype)


def _prepare_weights(params, n_heads, compute_dtype=jnp.bfloat16):
    """Host-side: fuse Wq|Wk|Wv into one (E,3E) weight, bf16 cast, fold 1/sqrt(Dh)."""
    E = params["wq"].shape[0]
    Dh = E // n_heads
    scale = 1.0 / (Dh ** 0.5)
    w_qkv = jnp.concatenate(
        [params["wq"] * scale, params["wk"], params["wv"]], axis=1).astype(compute_dtype)
    b_qkv = jnp.concatenate(
        [params["bq"] * scale, params["bk"], params["bv"]], axis=1).astype(jnp.float32)
    return [
        w_qkv, b_qkv,
        params["wo"].astype(compute_dtype), params["bo"].astype(jnp.float32),
        params["ln1_g"].astype(jnp.float32), params["ln1_b"].astype(jnp.float32),
        params["ln2_g"].astype(jnp.float32), params["ln2_b"].astype(jnp.float32),
        params["w1"].astype(compute_dtype), params["b1"].astype(jnp.float32),
        params["w2"].astype(compute_dtype), params["b2"].astype(jnp.float32),
    ]


def _default_vmem_limit_bytes():
    """Per-generation VMEM budget: physical capacity minus headroom (v7x=64MiB)."""
    cap = 128 * 1024 * 1024
    try:
        cap = int(getattr(pltpu.get_tpu_info(), "vmem_capacity_bytes", cap))
    except Exception:  # hardware query unavailable (e.g. interpret mode)
        cap = 64 * 1024 * 1024
    return max(32 * 1024 * 1024, min(cap - 16 * 1024 * 1024, 112 * 1024 * 1024))


def _pick_q_tile(T, E, H, Hm, attn_itemsize, weight_bytes, vmem_limit):
    """Largest q tile whose estimated resident set fits comfortably in VMEM."""
    Dh = E // H
    budget = int(vmem_limit * 0.6)
    candidates = [c for c in (1024, 512, 256, 128) if c <= T and T % c == 0]
    for cand in candidates:
        est = (
            2 * cand * E * 4                    # x tile (double-buffered)
            + 2 * cand * E * 4                  # out tile (double-buffered)
            + 2 * H * cand * T * attn_itemsize  # attn tile (double-buffered)
            + 4 * T * E                         # K/V scratch (bf16)
            + cand * T * 4                      # score/prob scratch
            + cand * E * 2 + cand * Dh * 4      # ctx buffers
            + 2 * cand * max(Hm, E) * 4         # MLP intermediates (rough)
            + 2 * weight_bytes                  # conservative: double-buffered weights
        )
        if est <= budget:
            return cand
    if candidates:
        return candidates[-1]
    return T


_PIPELINE_MODE_ERRORS = (TypeError, ValueError, NotImplementedError,
                         getattr(pltpu, "LoweringException", NotImplementedError))


def transformer_decoder_block(x, params, *, n_heads, with_residuals=False,
                              q_tile=None, attn_dtype=jnp.bfloat16,
                              vmem_limit_bytes=None):
    """x: (B, T, E) float32. Returns (out (B,T,E), attn_weights (B,H,T,T))."""
    B, T, E = x.shape
    assert E % n_heads == 0, "embed_size must be divisible by n_heads"
    Hm = params["w1"].shape[1]

    tensors = _prepare_weights(params, n_heads)
    weight_bytes = sum(int(np.prod(t.shape)) * t.dtype.itemsize for t in tensors)

    if vmem_limit_bytes is None:
        vmem_limit_bytes = _default_vmem_limit_bytes()
    attn_itemsize = jnp.dtype(attn_dtype).itemsize
    if q_tile is None:
        q_tile = _pick_q_tile(T, E, n_heads, Hm, attn_itemsize, weight_bytes,
                              vmem_limit_bytes)
    assert T % q_tile == 0, "q_tile must divide the sequence length"
    assert q_tile == T or q_tile % 8 == 0, "q_tile must be a multiple of 8 (sublane)"
    num_q_tiles = T // q_tile
    # NOTE: for production shapes prefer E, Hm, Dh and T as multiples of 128 so
    # MXU passes and stores are not masked/padded.

    kernel = functools.partial(_decoder_block_kernel, n_heads=n_heads,
                               with_residuals=with_residuals)

    def run(single_buffer_weights):
        weight_kwargs = {}
        if single_buffer_weights:
            # Weights/biases/LN params are grid-invariant -> one VMEM buffer suffices.
            weight_kwargs = dict(pipeline_mode=pl.Buffered(1))

        def const_spec(arr):
            nd = arr.ndim
            return pl.BlockSpec(arr.shape, lambda b, q, _nd=nd: (0,) * _nd,
                                **weight_kwargs)

        grid_spec = pltpu.PrefetchScalarGridSpec(
            num_scalar_prefetch=0,
            grid=(B, num_q_tiles),
            in_specs=[pl.BlockSpec((1, q_tile, E), lambda b, q: (b, q, 0))]
            + [const_spec(w) for w in tensors],
            out_specs=(
                pl.BlockSpec((1, q_tile, E), lambda b, q: (b, q, 0)),
                # Full key axis as the lane dim -> lane-dense attn stores for T >= 128.
                pl.BlockSpec((1, n_heads, q_tile, T), lambda b, q: (b, 0, q, 0)),
            ),
            scratch_shapes=[
                pltpu.VMEM((num_q_tiles, q_tile, E), jnp.bfloat16),  # K rows (built per tile)
                pltpu.VMEM((num_q_tiles, q_tile, E), jnp.bfloat16),  # V rows
                pltpu.VMEM((q_tile, T), jnp.float32),                # scores / probs scratch
                pltpu.VMEM((q_tile, 1), jnp.float32),                # row max
                pltpu.VMEM((q_tile, 1), jnp.float32),                # row sum
                pltpu.VMEM((q_tile, E // n_heads), jnp.float32),     # per-head ctx accumulator
                pltpu.VMEM((q_tile, E), jnp.bfloat16),               # concatenated head ctx
            ],
        )
        return pl.pallas_call(
            kernel,
            out_shape=(
                jax.ShapeDtypeStruct((B, T, E), x.dtype),
                jax.ShapeDtypeStruct((B, n_heads, T, T), attn_dtype),
            ),
            grid_spec=grid_spec,
            compiler_params=pltpu.CompilerParams(
                # batch axis is megacore-parallel; q-tile axis must stay "arbitrary"
                # because it reuses K/V scratch written by earlier q-tiles.
                dimension_semantics=("parallel", "arbitrary"),
                vmem_limit_bytes=int(vmem_limit_bytes),
            ),
        )(x, *tensors)

    try:
        return run(single_buffer_weights=True)
    except _PIPELINE_MODE_ERRORS:
        # pipeline_mode=pl.Buffered(1) not supported by this Pallas version:
        # fall back to default double-buffered weight specs.
        return run(single_buffer_weights=False)


# ----------------------------- pure-JAX reference -----------------------------
def decoder_block_reference(x, params, *, n_heads, with_residuals=False):
    B, T, E = x.shape
    Dh = E // n_heads

    def ln(v, g, b, eps=1e-5):
        mu = jnp.mean(v, axis=-1, keepdims=True)
        var = jnp.mean((v - mu) ** 2, axis=-1, keepdims=True)
        return (v - mu) / jnp.sqrt(var + eps) * g + b

    h = ln(x, params["ln1_g"][0], params["ln1_b"][0])
    q = h @ params["wq"] + params["bq"][0]
    k = h @ params["wk"] + params["bk"][0]
    v = h @ params["wv"] + params["bv"][0]

    def heads(z):
        return z.reshape(B, T, n_heads, Dh).transpose(0, 2, 1, 3)

    qh, kh, vh = heads(q), heads(k), heads(v)
    s = jnp.einsum("bhqd,bhkd->bhqk", qh, kh) / (Dh ** 0.5)
    mask = jnp.tril(jnp.ones((T, T), bool))
    s = jnp.where(mask, s, -jnp.inf)
    p = jax.nn.softmax(s, axis=-1)
    ctx = jnp.einsum("bhqk,bhkd->bhqd", p, vh).transpose(0, 2, 1, 3).reshape(B, T, E)
    att = ctx @ params["wo"] + params["bo"][0]

    def mlp(z):
        return jax.nn.gelu(z @ params["w1"] + params["b1"][0]) @ params["w2"] + params["b2"][0]

    if with_residuals:
        x1 = h + att
        h2 = ln(x1, params["ln2_g"][0], params["ln2_b"][0])
        out = h2 + mlp(h2)
    else:
        h2 = ln(att, params["ln2_g"][0], params["ln2_b"][0])
        out = mlp(h2)
    return out, p


def init_params(key, embed_size, mlp_hidden_size):
    E, Hm = embed_size, mlp_hidden_size
    ks = jax.random.split(key, 16)
    s = 0.02
    n = jax.random.normal
    return {
        "wq": s * n(ks[0], (E, E), jnp.float32),  "bq": s * n(ks[1], (1, E), jnp.float32),
        "wk": s * n(ks[2], (E, E), jnp.float32),  "bk": s * n(ks[3], (1, E), jnp.float32),
        "wv": s * n(ks[4], (E, E), jnp.float32),  "bv": s * n(ks[5], (1, E), jnp.float32),
        "wo": s * n(ks[6], (E, E), jnp.float32),  "bo": s * n(ks[7], (1, E), jnp.float32),
        "ln1_g": 1.0 + 0.1 * n(ks[8], (1, E), jnp.float32),
        "ln1_b": 0.1 * n(ks[9], (1, E), jnp.float32),
        "ln2_g": 1.0 + 0.1 * n(ks[10], (1, E), jnp.float32),
        "ln2_b": 0.1 * n(ks[11], (1, E), jnp.float32),
        "w1": s * n(ks[12], (E, Hm), jnp.float32), "b1": s * n(ks[13], (1, Hm), jnp.float32),
        "w2": s * n(ks[14], (Hm, E), jnp.float32), "b2": s * n(ks[15], (1, E), jnp.float32),
    }


if __name__ == "__main__":
    B, T, E = 2, 16, 32
    n_heads = 4
    mlp_hidden = 64
    q_tile = 8   # 2 q-row tiles -> exercises the causal-skip / incremental K/V path

    key = jax.random.PRNGKey(0)
    kx, kp = jax.random.split(key)
    x = jax.random.normal(kx, (B, T, E), jnp.float32)
    params = init_params(kp, E, mlp_hidden)

    for with_residuals in (False, True):
        out, attn = transformer_decoder_block(
            x, params, n_heads=n_heads, with_residuals=with_residuals, q_tile=q_tile)
        jax.block_until_ready((out, attn))

        assert out.shape == (B, T, E)
        assert attn.shape == (B, n_heads, T, T)
        assert attn.dtype == jnp.bfloat16

        ref_out, ref_attn = decoder_block_reference(
            x, params, n_heads=n_heads, with_residuals=with_residuals)

        attn_f32 = np.asarray(attn.astype(jnp.float32))
        # bf16 matmuls / bf16 prob storage vs f32 reference -> loose tolerances.
        np.testing.assert_allclose(attn_f32, np.asarray(ref_attn), atol=1e-2, rtol=0)
        np.testing.assert_allclose(np.asarray(out), np.asarray(ref_out),
                                   atol=2e-2, rtol=2e-2)
        # softmax rows sum to ~1 (bf16 storage error included)
        np.testing.assert_allclose(attn_f32.sum(axis=-1), 1.0, atol=1e-2)

    print("KERNEL_OK")
</pallas_src>

<mosaic_0001>
module attributes {stable_mosaic.version = 11 : i64} {
  func.func @_decoder_block_kernel(%arg0: i32, %arg1: i32, %arg2: memref<1x8x32xf32, #tpu.memory_space<vmem>>, %arg3: memref<32x96xbf16, #tpu.memory_space<vmem>>, %arg4: memref<1x96xf32, #tpu.memory_space<vmem>>, %arg5: memref<32x32xbf16, #tpu.memory_space<vmem>>, %arg6: memref<1x32xf32, #tpu.memory_space<vmem>>, %arg7: memref<1x32xf32, #tpu.memory_space<vmem>>, %arg8: memref<1x32xf32, #tpu.memory_space<vmem>>, %arg9: memref<1x32xf32, #tpu.memory_space<vmem>>, %arg10: memref<1x32xf32, #tpu.memory_space<vmem>>, %arg11: memref<32x64xbf16, #tpu.memory_space<vmem>>, %arg12: memref<1x64xf32, #tpu.memory_space<vmem>>, %arg13: memref<64x32xbf16, #tpu.memory_space<vmem>>, %arg14: memref<1x32xf32, #tpu.memory_space<vmem>>, %arg15: memref<1x8x32xf32, #tpu.memory_space<vmem>>, %arg16: memref<1x4x8x16xbf16, #tpu.memory_space<vmem>>, %arg17: memref<2x8x32xbf16, #tpu.memory_space<vmem>>, %arg18: memref<2x8x32xbf16, #tpu.memory_space<vmem>>, %arg19: memref<8x16xf32, #tpu.memory_space<vmem>>, %arg20: memref<8x1xf32, #tpu.memory_space<vmem>>, %arg21: memref<8x1xf32, #tpu.memory_space<vmem>>, %arg22: memref<8x8xf32, #tpu.memory_space<vmem>>, %arg23: memref<8x32xbf16, #tpu.memory_space<vmem>>) attributes {dimension_semantics = [#tpu.dimension_semantics<parallel>, #tpu.dimension_semantics<arbitrary>], iteration_bounds = array<i64: 2, 2>, scalar_prefetch = 0 : i64, scratch_operands = 7 : i64, tpu.core_type = #tpu.core_type<tc>, window_params = [{transform_indices = @transform_0, window_bounds = array<i64: 1, 8, 32>}, {pipeline_mode = #tpu.pipeline_mode<synchronous>, transform_indices = @transform_1, window_bounds = array<i64: 32, 96>}, {pipeline_mode = #tpu.pipeline_mode<synchronous>, transform_indices = @transform_2, window_bounds = array<i64: 1, 96>}, {pipeline_mode = #tpu.pipeline_mode<synchronous>, transform_indices = @transform_3, window_bounds = array<i64: 32, 32>}, {pipeline_mode = #tpu.pipeline_mode<synchronous>, transform_indices = @transform_4, window_bounds = array<i64: 1, 32>}, {pipeline_mode = #tpu.pipeline_mode<synchronous>, transform_indices = @transform_5, window_bounds = array<i64: 1, 32>}, {pipeline_mode = #tpu.pipeline_mode<synchronous>, transform_indices = @transform_6, window_bounds = array<i64: 1, 32>}, {pipeline_mode = #tpu.pipeline_mode<synchronous>, transform_indices = @transform_7, window_bounds = array<i64: 1, 32>}, {pipeline_mode = #tpu.pipeline_mode<synchronous>, transform_indices = @transform_8, window_bounds = array<i64: 1, 32>}, {pipeline_mode = #tpu.pipeline_mode<synchronous>, transform_indices = @transform_9, window_bounds = array<i64: 32, 64>}, {pipeline_mode = #tpu.pipeline_mode<synchronous>, transform_indices = @transform_10, window_bounds = array<i64: 1, 64>}, {pipeline_mode = #tpu.pipeline_mode<synchronous>, transform_indices = @transform_11, window_bounds = array<i64: 64, 32>}, {pipeline_mode = #tpu.pipeline_mode<synchronous>, transform_indices = @transform_12, window_bounds = array<i64: 1, 32>}, {transform_indices = @transform_13, window_bounds = array<i64: 1, 8, 32>}, {transform_indices = @transform_14, window_bounds = array<i64: 1, 4, 8, 16>}]} {
    %c0 = arith.constant 0 : index
    %c0_0 = arith.constant 0 : index
    %c0_1 = arith.constant 0 : index
    %0 = vector.load %arg2[%c0, %c0_0, %c0_1] : memref<1x8x32xf32, #tpu.memory_space<vmem>>, vector<1x8x32xf32>
    %1 = vector.shape_cast %0 : vector<1x8x32xf32> to vector<8x32xf32>
    %c0_2 = arith.constant 0 : index
    %c0_3 = arith.constant 0 : index
    %2 = vector.load %arg7[%c0_2, %c0_3] : memref<1x32xf32, #tpu.memory_space<vmem>>, vector<1x32xf32>
    %c0_4 = arith.constant 0 : index
    %c0_5 = arith.constant 0 : index
    %3 = vector.load %arg8[%c0_4, %c0_5] : memref<1x32xf32, #tpu.memory_space<vmem>>, vector<1x32xf32>
    %cst = arith.constant dense<0.000000e+00> : vector<8xf32>
    %4 = vector.multi_reduction <add>, %1, %cst [1] : vector<8x32xf32> to vector<8xf32>
    %5 = vector.shape_cast %4 : vector<8xf32> to vector<8x1xf32>
    %cst_6 = arith.constant 3.200000e+01 : f32
    %6 = vector.broadcast %cst_6 : f32 to vector<8x1xf32>
    %7 = arith.divf %5, %6 : vector<8x1xf32>
    %8 = vector.broadcast %7 : vector<8x1xf32> to vector<8x32xf32>
    %9 = arith.subf %1, %8 : vector<8x32xf32>
    %10 = arith.mulf %9, %9 : vector<8x32xf32>
    %cst_7 = arith.constant dense<0.000000e+00> : vector<8xf32>
    %11 = vector.multi_reduction <add>, %10, %cst_7 [1] : vector<8x32xf32> to vector<8xf32>
    %12 = vector.shape_cast %11 : vector<8xf32> to vector<8x1xf32>
    %cst_8 = arith.constant 3.200000e+01 : f32
    %13 = vector.broadcast %cst_8 : f32 to vector<8x1xf32>
    %14 = arith.divf %12, %13 : vector<8x1xf32>
    %15 = vector.broadcast %7 : vector<8x1xf32> to vector<8x32xf32>
    %16 = arith.subf %1, %15 : vector<8x32xf32>
    %cst_9 = arith.constant 9.99999974E-6 : f32
    %17 = vector.broadcast %cst_9 : f32 to vector<8x1xf32>
    %18 = arith.addf %14, %17 : vector<8x1xf32>
    %19 = math.rsqrt %18 : vector<8x1xf32>
    %20 = vector.broadcast %19 : vector<8x1xf32> to vector<8x32xf32>
    %21 = arith.mulf %16, %20 : vector<8x32xf32>
    %22 = vector.broadcast %2 : vector<1x32xf32> to vector<8x32xf32>
    %23 = arith.mulf %21, %22 : vector<8x32xf32>
    %24 = vector.broadcast %3 : vector<1x32xf32> to vector<8x32xf32>
    %25 = arith.addf %23, %24 : vector<8x32xf32>
    %26 = arith.truncf %25 : vector<8x32xf32> to vector<8x32xbf16>
    %c0_10 = arith.constant 0 : index
    %c0_11 = arith.constant 0 : index
    %27 = vector.load %arg3[%c0_10, %c0_11] : memref<32x96xbf16, #tpu.memory_space<vmem>>, vector<32x96xbf16>
    %cst_12 = arith.constant dense<0.000000e+00> : vector<8x96xf32>
    %28 = tpu.matmul %26, %27, %cst_12 {dimension_numbers = #tpu.dot_dimension_numbers<[1], [0], [0], [1], [0, 0, 1, 1], [], []>} : vector<8x32xbf16>, vector<32x96xbf16>, vector<8x96xf32> -> vector<8x96xf32>
    %c0_13 = arith.constant 0 : index
    %c0_14 = arith.constant 0 : index
    %29 = vector.load %arg4[%c0_13, %c0_14] : memref<1x96xf32, #tpu.memory_space<vmem>>, vector<1x96xf32>
    %30 = vector.broadcast %29 : vector<1x96xf32> to vector<8x96xf32>
    %31 = arith.addf %28, %30 : vector<8x96xf32>
    %32 = vector.extract_strided_slice %31 {offsets = [0, 0], sizes = [8, 32], strides = [1, 1]} : vector<8x96xf32> to vector<8x32xf32>
    %33 = arith.truncf %32 : vector<8x32xf32> to vector<8x32xbf16>
    %34 = vector.extract_strided_slice %31 {offsets = [0, 32], sizes = [8, 32], strides = [1, 1]} : vector<8x96xf32> to vector<8x32xf32>
    %35 = arith.truncf %34 : vector<8x32xf32> to vector<8x32xbf16>
    %36 = arith.index_cast %arg1 : i32 to index
    %c0_15 = arith.constant 0 : index
    %c0_16 = arith.constant 0 : index
    %37 = vector.load %arg17[%36, %c0_15, %c0_16] : memref<2x8x32xbf16, #tpu.memory_space<vmem>>, vector<1x8x32xbf16>
    %38 = vector.shape_cast %37 : vector<1x8x32xbf16> to vector<8x32xbf16>
    %39 = vector.shape_cast %35 : vector<8x32xbf16> to vector<1x8x32xbf16>
    tpu.vector_store %arg17[%36, %c0_15, %c0_16], %39 {strides = array<i32>} : memref<2x8x32xbf16, #tpu.memory_space<vmem>>, vector<1x8x32xbf16>,
    %40 = vector.extract_strided_slice %31 {offsets = [0, 64], sizes = [8, 32], strides = [1, 1]} : vector<8x96xf32> to vector<8x32xf32>
    %41 = arith.truncf %40 : vector<8x32xf32> to vector<8x32xbf16>
    %42 = arith.index_cast %arg1 : i32 to index
    %c0_17 = arith.constant 0 : index
    %c0_18 = arith.constant 0 : index
    %43 = vector.load %arg18[%42, %c0_17, %c0_18] : memref<2x8x32xbf16, #tpu.memory_space<vmem>>, vector<1x8x32xbf16>
    %44 = vector.shape_cast %43 : vector<1x8x32xbf16> to vector<8x32xbf16>
    %45 = vector.shape_cast %41 : vector<8x32xbf16> to vector<1x8x32xbf16>
    tpu.vector_store %arg18[%42, %c0_17, %c0_18], %45 {strides = array<i32>} : memref<2x8x32xbf16, #tpu.memory_space<vmem>>, vector<1x8x32xbf16>,
    %c8_i32 = arith.constant 8 : i32
    %46 = arith.muli %arg1, %c8_i32 : i32
    %47 = tpu.iota {dimensions = array<i32: 0>} : vector<8x1xi32>
    %48 = vector.broadcast %46 : i32 to vector<8x1xi32>
    %49 = arith.addi %48, %47 : vector<8x1xi32>
    %50 = tpu.iota {dimensions = array<i32: 1>} : vector<1x8xi32>
    %cst_19 = arith.constant 0.000000e+00 : bf16
    %51 = vector.broadcast %cst_19 : bf16 to vector<8x8xbf16>
    %52 = vector.extract_strided_slice %33 {offsets = [0, 0], sizes = [8, 8], strides = [1, 1]} : vector<8x32xbf16> to vector<8x8xbf16>
    %cst_20 = arith.constant -1.000000e+30 : f32
    %53 = vector.broadcast %cst_20 : f32 to vector<8x1xf32>
    %c0_21 = arith.constant 0 : index
    %c0_22 = arith.constant 0 : index
    %54 = vector.load %arg20[%c0_21, %c0_22] : memref<8x1xf32, #tpu.memory_space<vmem>>, vector<8x1xf32>
    tpu.vector_store %arg20[%c0_21, %c0_22], %53 {strides = array<i32>} : memref<8x1xf32, #tpu.memory_space<vmem>>, vector<8x1xf32>,
    %c0_i32 = arith.constant 0 : i32
    %55 = arith.cmpi sge, %arg1, %c0_i32 : i32
    %56 = arith.extui %55 : i1 to i32
    %c0_i32_23 = arith.constant 0 : i32
    %57 = arith.cmpi ne, %56, %c0_i32_23 : i32
    scf.if %57 {
      %c0_176 = arith.constant 0 : index
      %c0_177 = arith.constant 0 : index
      %c0_178 = arith.constant 0 : index
      %278 = vector.load %arg17[%c0_176, %c0_177, %c0_178] : memref<2x8x32xbf16, #tpu.memory_space<vmem>>, vector<1x8x8xbf16>
      %279 = vector.shape_cast %278 : vector<1x8x8xbf16> to vector<8x8xbf16>
      %cst_179 = arith.constant dense<0.000000e+00> : vector<8x8xf32>
      %280 = tpu.matmul %52, %279, %cst_179 {dimension_numbers = #tpu.dot_dimension_numbers<[1], [1], [0], [0], [0, 0, 1, 0], [], []>} : vector<8x8xbf16>, vector<8x8xbf16>, vector<8x8xf32> -> vector<8x8xf32>
      %c0_i32_180 = arith.constant 0 : i32
      %281 = vector.broadcast %c0_i32_180 : i32 to vector<1x8xi32>
      %282 = arith.addi %281, %50 : vector<1x8xi32>
      %283 = vector.broadcast %282 : vector<1x8xi32> to vector<8x8xi32>
      %284 = vector.broadcast %49 : vector<8x1xi32> to vector<8x8xi32>
      %285 = arith.cmpi sle, %283, %284 : vector<8x8xi32>
      %cst_181 = arith.constant -1.000000e+30 : f32
      %286 = vector.broadcast %cst_181 : f32 to vector<8x8xf32>
      %287 = arith.select %285, %280, %286 : vector<8x8xi1>, vector<8x8xf32>
      %c0_182 = arith.constant 0 : index
      %c0_183 = arith.constant 0 : index
      %288 = vector.load %arg19[%c0_182, %c0_183] : memref<8x16xf32, #tpu.memory_space<vmem>>, vector<8x8xf32>
      tpu.vector_store %arg19[%c0_182, %c0_183], %287 {strides = array<i32>} : memref<8x16xf32, #tpu.memory_space<vmem>>, vector<8x8xf32>,
      %c0_184 = arith.constant 0 : index
      %c0_185 = arith.constant 0 : index
      %289 = vector.load %arg20[%c0_184, %c0_185] : memref<8x1xf32, #tpu.memory_space<vmem>>, vector<8x1xf32>
      %cst_186 = arith.constant dense<0xFF800000> : vector<8xf32>
      %290 = vector.multi_reduction <maximumf>, %287, %cst_186 [1] : vector<8x8xf32> to vector<8xf32>
      %291 = vector.shape_cast %290 : vector<8xf32> to vector<8x1xf32>
      %292 = arith.maximumf %289, %291 : vector<8x1xf32>
      %c0_187 = arith.constant 0 : index
      %c0_188 = arith.constant 0 : index
      %293 = vector.load %arg20[%c0_187, %c0_188] : memref<8x1xf32, #tpu.memory_space<vmem>>, vector<8x1xf32>
      tpu.vector_store %arg20[%c0_187, %c0_188], %292 {strides = array<i32>} : memref<8x1xf32, #tpu.memory_space<vmem>>, vector<8x1xf32>,
    } else {
    }
    %c1_i32 = arith.constant 1 : i32
    %58 = arith.cmpi sge, %arg1, %c1_i32 : i32
    %59 = arith.extui %58 : i1 to i32
    %c0_i32_24 = arith.constant 0 : i32
    %60 = arith.cmpi ne, %59, %c0_i32_24 : i32
    scf.if %60 {
      %c1 = arith.constant 1 : index
      %c0_176 = arith.constant 0 : index
      %c0_177 = arith.constant 0 : index
      %278 = vector.load %arg17[%c1, %c0_176, %c0_177] : memref<2x8x32xbf16, #tpu.memory_space<vmem>>, vector<1x8x8xbf16>
      %279 = vector.shape_cast %278 : vector<1x8x8xbf16> to vector<8x8xbf16>
      %cst_178 = arith.constant dense<0.000000e+00> : vector<8x8xf32>
      %280 = tpu.matmul %52, %279, %cst_178 {dimension_numbers = #tpu.dot_dimension_numbers<[1], [1], [0], [0], [0, 0, 1, 0], [], []>} : vector<8x8xbf16>, vector<8x8xbf16>, vector<8x8xf32> -> vector<8x8xf32>
      %c8_i32_179 = arith.constant 8 : i32
      %281 = vector.broadcast %c8_i32_179 : i32 to vector<1x8xi32>
      %282 = arith.addi %281, %50 : vector<1x8xi32>
      %283 = vector.broadcast %282 : vector<1x8xi32> to vector<8x8xi32>
      %284 = vector.broadcast %49 : vector<8x1xi32> to vector<8x8xi32>
      %285 = arith.cmpi sle, %283, %284 : vector<8x8xi32>
      %cst_180 = arith.constant -1.000000e+30 : f32
      %286 = vector.broadcast %cst_180 : f32 to vector<8x8xf32>
      %287 = arith.select %285, %280, %286 : vector<8x8xi1>, vector<8x8xf32>
      %c0_181 = arith.constant 0 : index
      %c8_182 = arith.constant 8 : index
      %288 = vector.load %arg19[%c0_181, %c8_182] : memref<8x16xf32, #tpu.memory_space<vmem>>, vector<8x8xf32>
      tpu.vector_store %arg19[%c0_181, %c8_182], %287 {strides = array<i32>} : memref<8x16xf32, #tpu.memory_space<vmem>>, vector<8x8xf32>,
      %c0_183 = arith.constant 0 : index
      %c0_184 = arith.constant 0 : index
      %289 = vector.load %arg20[%c0_183, %c0_184] : memref<8x1xf32, #tpu.memory_space<vmem>>, vector<8x1xf32>
      %cst_185 = arith.constant dense<0xFF800000> : vector<8xf32>
      %290 = vector.multi_reduction <maximumf>, %287, %cst_185 [1] : vector<8x8xf32> to vector<8xf32>
      %291 = vector.shape_cast %290 : vector<8xf32> to vector<8x1xf32>
      %292 = arith.maximumf %289, %291 : vector<8x1xf32>
      %c0_186 = arith.constant 0 : index
      %c0_187 = arith.constant 0 : index
      %293 = vector.load %arg20[%c0_186, %c0_187] : memref<8x1xf32, #tpu.memory_space<vmem>>, vector<8x1xf32>
      tpu.vector_store %arg20[%c0_186, %c0_187], %292 {strides = array<i32>} : memref<8x1xf32, #tpu.memory_space<vmem>>, vector<8x1xf32>,
    } else {
    }
    %cst_25 = arith.constant 0.000000e+00 : f32
    %61 = vector.broadcast %cst_25 : f32 to vector<8x1xf32>
    %c0_26 = arith.constant 0 : index
    %c0_27 = arith.constant 0 : index
    %62 = vector.load %arg21[%c0_26, %c0_27] : memref<8x1xf32, #tpu.memory_space<vmem>>, vector<8x1xf32>
    tpu.vector_store %arg21[%c0_26, %c0_27], %61 {strides = array<i32>} : memref<8x1xf32, #tpu.memory_space<vmem>>, vector<8x1xf32>,
    %cst_28 = arith.constant 0.000000e+00 : f32
    %63 = vector.broadcast %cst_28 : f32 to vector<8x8xf32>
    %c0_29 = arith.constant 0 : index
    %c0_30 = arith.constant 0 : index
    %64 = vector.load %arg22[%c0_29, %c0_30] : memref<8x8xf32, #tpu.memory_space<vmem>>, vector<8x8xf32>
    tpu.vector_store %arg22[%c0_29, %c0_30], %63 {strides = array<i32>} : memref<8x8xf32, #tpu.memory_space<vmem>>, vector<8x8xf32>,
    %c0_i32_31 = arith.constant 0 : i32
    %65 = arith.cmpi sge, %arg1, %c0_i32_31 : i32
    %66 = arith.extui %65 : i1 to i32
    %c0_i32_32 = arith.constant 0 : i32
    %67 = arith.cmpi ne, %66, %c0_i32_32 : i32
    scf.if %67 {
      %c0_176 = arith.constant 0 : index
      %c0_177 = arith.constant 0 : index
      %278 = vector.load %arg19[%c0_176, %c0_177] : memref<8x16xf32, #tpu.memory_space<vmem>>, vector<8x8xf32>
      %c0_178 = arith.constant 0 : index
      %c0_179 = arith.constant 0 : index
      %279 = vector.load %arg20[%c0_178, %c0_179] : memref<8x1xf32, #tpu.memory_space<vmem>>, vector<8x1xf32>
      %280 = vector.broadcast %279 : vector<8x1xf32> to vector<8x8xf32>
      %281 = arith.subf %278, %280 : vector<8x8xf32>
      %282 = math.exp %281 : vector<8x8xf32>
      %c0_180 = arith.constant 0 : index
      %c0_181 = arith.constant 0 : index
      %283 = vector.load %arg19[%c0_180, %c0_181] : memref<8x16xf32, #tpu.memory_space<vmem>>, vector<8x8xf32>
      tpu.vector_store %arg19[%c0_180, %c0_181], %282 {strides = array<i32>} : memref<8x16xf32, #tpu.memory_space<vmem>>, vector<8x8xf32>,
      %c0_182 = arith.constant 0 : index
      %c0_183 = arith.constant 0 : index
      %284 = vector.load %arg21[%c0_182, %c0_183] : memref<8x1xf32, #tpu.memory_space<vmem>>, vector<8x1xf32>
      %cst_184 = arith.constant dense<0.000000e+00> : vector<8xf32>
      %285 = vector.multi_reduction <add>, %282, %cst_184 [1] : vector<8x8xf32> to vector<8xf32>
      %286 = vector.shape_cast %285 : vector<8xf32> to vector<8x1xf32>
      %287 = arith.addf %284, %286 : vector<8x1xf32>
      %c0_185 = arith.constant 0 : index
      %c0_186 = arith.constant 0 : index
      %288 = vector.load %arg21[%c0_185, %c0_186] : memref<8x1xf32, #tpu.memory_space<vmem>>, vector<8x1xf32>
      tpu.vector_store %arg21[%c0_185, %c0_186], %287 {strides = array<i32>} : memref<8x1xf32, #tpu.memory_space<vmem>>, vector<8x1xf32>,
      %c0_187 = arith.constant 0 : index
      %c0_188 = arith.constant 0 : index
      %289 = vector.load %arg22[%c0_187, %c0_188] : memref<8x8xf32, #tpu.memory_space<vmem>>, vector<8x8xf32>
      %290 = arith.truncf %282 : vector<8x8xf32> to vector<8x8xbf16>
      %c0_189 = arith.constant 0 : index
      %c0_190 = arith.constant 0 : index
      %c0_191 = arith.constant 0 : index
      %291 = vector.load %arg18[%c0_189, %c0_190, %c0_191] : memref<2x8x32xbf16, #tpu.memory_space<vmem>>, vector<1x8x8xbf16>
      %292 = vector.shape_cast %291 : vector<1x8x8xbf16> to vector<8x8xbf16>
      %cst_192 = arith.constant dense<0.000000e+00> : vector<8x8xf32>
      %293 = tpu.matmul %290, %292, %cst_192 {dimension_numbers = #tpu.dot_dimension_numbers<[1], [0], [0], [1], [0, 0, 1, 1], [], []>} : vector<8x8xbf16>, vector<8x8xbf16>, vector<8x8xf32> -> vector<8x8xf32>
      %294 = arith.addf %289, %293 : vector<8x8xf32>
      %c0_193 = arith.constant 0 : index
      %c0_194 = arith.constant 0 : index
      %295 = vector.load %arg22[%c0_193, %c0_194] : memref<8x8xf32, #tpu.memory_space<vmem>>, vector<8x8xf32>
      tpu.vector_store %arg22[%c0_193, %c0_194], %294 {strides = array<i32>} : memref<8x8xf32, #tpu.memory_space<vmem>>, vector<8x8xf32>,
    } else {
    }
    %c1_i32_33 = arith.constant 1 : i32
    %68 = arith.cmpi sge, %arg1, %c1_i32_33 : i32
    %69 = arith.extui %68 : i1 to i32
    %c0_i32_34 = arith.constant 0 : i32
    %70 = arith.cmpi ne, %69, %c0_i32_34 : i32
    scf.if %70 {
      %c0_176 = arith.constant 0 : index
      %c8_177 = arith.constant 8 : index
      %278 = vector.load %arg19[%c0_176, %c8_177] : memref<8x16xf32, #tpu.memory_space<vmem>>, vector<8x8xf32>
      %c0_178 = arith.constant 0 : index
      %c0_179 = arith.constant 0 : index
      %279 = vector.load %arg20[%c0_178, %c0_179] : memref<8x1xf32, #tpu.memory_space<vmem>>, vector<8x1xf32>
      %280 = vector.broadcast %279 : vector<8x1xf32> to vector<8x8xf32>
      %281 = arith.subf %278, %280 : vector<8x8xf32>
      %282 = math.exp %281 : vector<8x8xf32>
      %c0_180 = arith.constant 0 : index
      %c8_181 = arith.constant 8 : index
      %283 = vector.load %arg19[%c0_180, %c8_181] : memref<8x16xf32, #tpu.memory_space<vmem>>, vector<8x8xf32>
      tpu.vector_store %arg19[%c0_180, %c8_181], %282 {strides = array<i32>} : memref<8x16xf32, #tpu.memory_space<vmem>>, vector<8x8xf32>,
      %c0_182 = arith.constant 0 : index
      %c0_183 = arith.constant 0 : index
      %284 = vector.load %arg21[%c0_182, %c0_183] : memref<8x1xf32, #tpu.memory_space<vmem>>, vector<8x1xf32>
      %cst_184 = arith.constant dense<0.000000e+00> : vector<8xf32>
      %285 = vector.multi_reduction <add>, %282, %cst_184 [1] : vector<8x8xf32> to vector<8xf32>
      %286 = vector.shape_cast %285 : vector<8xf32> to vector<8x1xf32>
      %287 = arith.addf %284, %286 : vector<8x1xf32>
      %c0_185 = arith.constant 0 : index
      %c0_186 = arith.constant 0 : index
      %288 = vector.load %arg21[%c0_185, %c0_186] : memref<8x1xf32, #tpu.memory_space<vmem>>, vector<8x1xf32>
      tpu.vector_store %arg21[%c0_185, %c0_186], %287 {strides = array<i32>} : memref<8x1xf32, #tpu.memory_space<vmem>>, vector<8x1xf32>,
      %c0_187 = arith.constant 0 : index
      %c0_188 = arith.constant 0 : index
      %289 = vector.load %arg22[%c0_187, %c0_188] : memref<8x8xf32, #tpu.memory_space<vmem>>, vector<8x8xf32>
      %290 = arith.truncf %282 : vector<8x8xf32> to vector<8x8xbf16>
      %c1 = arith.constant 1 : index
      %c0_189 = arith.constant 0 : index
      %c0_190 = arith.constant 0 : index
      %291 = vector.load %arg18[%c1, %c0_189, %c0_190] : memref<2x8x32xbf16, #tpu.memory_space<vmem>>, vector<1x8x8xbf16>
      %292 = vector.shape_cast %291 : vector<1x8x8xbf16> to vector<8x8xbf16>
      %cst_191 = arith.constant dense<0.000000e+00> : vector<8x8xf32>
      %293 = tpu.matmul %290, %292, %cst_191 {dimension_numbers = #tpu.dot_dimension_numbers<[1], [0], [0], [1], [0, 0, 1, 1], [], []>} : vector<8x8xbf16>, vector<8x8xbf16>, vector<8x8xf32> -> vector<8x8xf32>
      %294 = arith.addf %289, %293 : vector<8x8xf32>
      %c0_192 = arith.constant 0 : index
      %c0_193 = arith.constant 0 : index
      %295 = vector.load %arg22[%c0_192, %c0_193] : memref<8x8xf32, #tpu.memory_space<vmem>>, vector<8x8xf32>
      tpu.vector_store %arg22[%c0_192, %c0_193], %294 {strides = array<i32>} : memref<8x8xf32, #tpu.memory_space<vmem>>, vector<8x8xf32>,
    } else {
    }
    %c0_35 = arith.constant 0 : index
    %c0_36 = arith.constant 0 : index
    %71 = vector.load %arg21[%c0_35, %c0_36] : memref<8x1xf32, #tpu.memory_space<vmem>>, vector<8x1xf32>
    %72 = tpu.reciprocal %71 {approx = true} : vector<8x1xf32> -> vector<8x1xf32>
    %73 = arith.mulf %71, %72 : vector<8x1xf32>
    %cst_37 = arith.constant 2.000000e+00 : f32
    %74 = vector.broadcast %cst_37 : f32 to vector<8x1xf32>
    %75 = arith.subf %74, %73 : vector<8x1xf32>
    %76 = arith.mulf %72, %75 : vector<8x1xf32>
    %c0_38 = arith.constant 0 : index
    %c0_39 = arith.constant 0 : index
    %77 = vector.load %arg22[%c0_38, %c0_39] : memref<8x8xf32, #tpu.memory_space<vmem>>, vector<8x8xf32>
    %78 = vector.broadcast %76 : vector<8x1xf32> to vector<8x8xf32>
    %79 = arith.mulf %77, %78 : vector<8x8xf32>
    %80 = arith.truncf %79 : vector<8x8xf32> to vector<8x8xbf16>
    %c0_40 = arith.constant 0 : index
    %c0_41 = arith.constant 0 : index
    %81 = vector.load %arg23[%c0_40, %c0_41] : memref<8x32xbf16, #tpu.memory_space<vmem>>, vector<8x8xbf16>
    tpu.vector_store %arg23[%c0_40, %c0_41], %80 {strides = array<i32>} : memref<8x32xbf16, #tpu.memory_space<vmem>>, vector<8x8xbf16>,
    %c0_i32_42 = arith.constant 0 : i32
    %82 = arith.cmpi sge, %arg1, %c0_i32_42 : i32
    %83 = arith.extui %82 : i1 to i32
    %c0_i32_43 = arith.constant 0 : i32
    %84 = arith.cmpi ne, %83, %c0_i32_43 : i32
    scf.if %84 {
      %c0_176 = arith.constant 0 : index
      %c0_177 = arith.constant 0 : index
      %278 = vector.load %arg19[%c0_176, %c0_177] : memref<8x16xf32, #tpu.memory_space<vmem>>, vector<8x8xf32>
      %279 = vector.broadcast %76 : vector<8x1xf32> to vector<8x8xf32>
      %280 = arith.mulf %278, %279 : vector<8x8xf32>
      %281 = arith.truncf %280 : vector<8x8xf32> to vector<8x8xbf16>
      %c0_178 = arith.constant 0 : index
      %c0_179 = arith.constant 0 : index
      %c0_180 = arith.constant 0 : index
      %c0_181 = arith.constant 0 : index
      %282 = vector.load %arg16[%c0_178, %c0_179, %c0_180, %c0_181] : memref<1x4x8x16xbf16, #tpu.memory_space<vmem>>, vector<1x1x8x8xbf16>
      %283 = vector.shape_cast %282 : vector<1x1x8x8xbf16> to vector<8x8xbf16>
      %284 = vector.shape_cast %281 : vector<8x8xbf16> to vector<1x1x8x8xbf16>
      tpu.vector_store %arg16[%c0_178, %c0_179, %c0_180, %c0_181], %284 {strides = array<i32>} : memref<1x4x8x16xbf16, #tpu.memory_space<vmem>>, vector<1x1x8x8xbf16>,
    } else {
    }
    %c0_i32_44 = arith.constant 0 : i32
    %85 = arith.cmpi slt, %arg1, %c0_i32_44 : i32
    %86 = arith.extui %85 : i1 to i32
    %c0_i32_45 = arith.constant 0 : i32
    %87 = arith.cmpi ne, %86, %c0_i32_45 : i32
    scf.if %87 {
      %c0_176 = arith.constant 0 : index
      %c0_177 = arith.constant 0 : index
      %c0_178 = arith.constant 0 : index
      %c0_179 = arith.constant 0 : index
      %278 = vector.load %arg16[%c0_176, %c0_177, %c0_178, %c0_179] : memref<1x4x8x16xbf16, #tpu.memory_space<vmem>>, vector<1x1x8x8xbf16>
      %279 = vector.shape_cast %278 : vector<1x1x8x8xbf16> to vector<8x8xbf16>
      %280 = vector.shape_cast %51 : vector<8x8xbf16> to vector<1x1x8x8xbf16>
      tpu.vector_store %arg16[%c0_176, %c0_177, %c0_178, %c0_179], %280 {strides = array<i32>} : memref<1x4x8x16xbf16, #tpu.memory_space<vmem>>, vector<1x1x8x8xbf16>,
    } else {
    }
    %c1_i32_46 = arith.constant 1 : i32
    %88 = arith.cmpi sge, %arg1, %c1_i32_46 : i32
    %89 = arith.extui %88 : i1 to i32
    %c0_i32_47 = arith.constant 0 : i32
    %90 = arith.cmpi ne, %89, %c0_i32_47 : i32
    scf.if %90 {
      %c0_176 = arith.constant 0 : index
      %c8_177 = arith.constant 8 : index
      %278 = vector.load %arg19[%c0_176, %c8_177] : memref<8x16xf32, #tpu.memory_space<vmem>>, vector<8x8xf32>
      %279 = vector.broadcast %76 : vector<8x1xf32> to vector<8x8xf32>
      %280 = arith.mulf %278, %279 : vector<8x8xf32>
      %281 = arith.truncf %280 : vector<8x8xf32> to vector<8x8xbf16>
      %c0_178 = arith.constant 0 : index
      %c0_179 = arith.constant 0 : index
      %c0_180 = arith.constant 0 : index
      %c8_181 = arith.constant 8 : index
      %282 = vector.load %arg16[%c0_178, %c0_179, %c0_180, %c8_181] : memref<1x4x8x16xbf16, #tpu.memory_space<vmem>>, vector<1x1x8x8xbf16>
      %283 = vector.shape_cast %282 : vector<1x1x8x8xbf16> to vector<8x8xbf16>
      %284 = vector.shape_cast %281 : vector<8x8xbf16> to vector<1x1x8x8xbf16>
      tpu.vector_store %arg16[%c0_178, %c0_179, %c0_180, %c8_181], %284 {strides = array<i32>} : memref<1x4x8x16xbf16, #tpu.memory_space<vmem>>, vector<1x1x8x8xbf16>,
    } else {
    }
    %c1_i32_48 = arith.constant 1 : i32
    %91 = arith.cmpi slt, %arg1, %c1_i32_48 : i32
    %92 = arith.extui %91 : i1 to i32
    %c0_i32_49 = arith.constant 0 : i32
    %93 = arith.cmpi ne, %92, %c0_i32_49 : i32
    scf.if %93 {
      %c0_176 = arith.constant 0 : index
      %c0_177 = arith.constant 0 : index
      %c0_178 = arith.constant 0 : index
      %c8_179 = arith.constant 8 : index
      %278 = vector.load %arg16[%c0_176, %c0_177, %c0_178, %c8_179] : memref<1x4x8x16xbf16, #tpu.memory_space<vmem>>, vector<1x1x8x8xbf16>
      %279 = vector.shape_cast %278 : vector<1x1x8x8xbf16> to vector<8x8xbf16>
      %280 = vector.shape_cast %51 : vector<8x8xbf16> to vector<1x1x8x8xbf16>
      tpu.vector_store %arg16[%c0_176, %c0_177, %c0_178, %c8_179], %280 {strides = array<i32>} : memref<1x4x8x16xbf16, #tpu.memory_space<vmem>>, vector<1x1x8x8xbf16>,
    } else {
    }
    %94 = vector.extract_strided_slice %33 {offsets = [0, 8], sizes = [8, 8], strides = [1, 1]} : vector<8x32xbf16> to vector<8x8xbf16>
    %cst_50 = arith.constant -1.000000e+30 : f32
    %95 = vector.broadcast %cst_50 : f32 to vector<8x1xf32>
    %c0_51 = arith.constant 0 : index
    %c0_52 = arith.constant 0 : index
    %96 = vector.load %arg20[%c0_51, %c0_52] : memref<8x1xf32, #tpu.memory_space<vmem>>, vector<8x1xf32>
    tpu.vector_store %arg20[%c0_51, %c0_52], %95 {strides = array<i32>} : memref<8x1xf32, #tpu.memory_space<vmem>>, vector<8x1xf32>,
    %c0_i32_53 = arith.constant 0 : i32
    %97 = arith.cmpi sge, %arg1, %c0_i32_53 : i32
    %98 = arith.extui %97 : i1 to i32
    %c0_i32_54 = arith.constant 0 : i32
    %99 = arith.cmpi ne, %98, %c0_i32_54 : i32
    scf.if %99 {
      %c0_176 = arith.constant 0 : index
      %c0_177 = arith.constant 0 : index
      %c8_178 = arith.constant 8 : index
      %278 = vector.load %arg17[%c0_176, %c0_177, %c8_178] : memref<2x8x32xbf16, #tpu.memory_space<vmem>>, vector<1x8x8xbf16>
      %279 = vector.shape_cast %278 : vector<1x8x8xbf16> to vector<8x8xbf16>
      %cst_179 = arith.constant dense<0.000000e+00> : vector<8x8xf32>
      %280 = tpu.matmul %94, %279, %cst_179 {dimension_numbers = #tpu.dot_dimension_numbers<[1], [1], [0], [0], [0, 0, 1, 0], [], []>} : vector<8x8xbf16>, vector<8x8xbf16>, vector<8x8xf32> -> vector<8x8xf32>
      %c0_i32_180 = arith.constant 0 : i32
      %281 = vector.broadcast %c0_i32_180 : i32 to vector<1x8xi32>
      %282 = arith.addi %281, %50 : vector<1x8xi32>
      %283 = vector.broadcast %282 : vector<1x8xi32> to vector<8x8xi32>
      %284 = vector.broadcast %49 : vector<8x1xi32> to vector<8x8xi32>
      %285 = arith.cmpi sle, %283, %284 : vector<8x8xi32>
      %cst_181 = arith.constant -1.000000e+30 : f32
      %286 = vector.broadcast %cst_181 : f32 to vector<8x8xf32>
      %287 = arith.select %285, %280, %286 : vector<8x8xi1>, vector<8x8xf32>
      %c0_182 = arith.constant 0 : index
      %c0_183 = arith.constant 0 : index
      %288 = vector.load %arg19[%c0_182, %c0_183] : memref<8x16xf32, #tpu.memory_space<vmem>>, vector<8x8xf32>
      tpu.vector_store %arg19[%c0_182, %c0_183], %287 {strides = array<i32>} : memref<8x16xf32, #tpu.memory_space<vmem>>, vector<8x8xf32>,
      %c0_184 = arith.constant 0 : index
      %c0_185 = arith.constant 0 : index
      %289 = vector.load %arg20[%c0_184, %c0_185] : memref<8x1xf32, #tpu.memory_space<vmem>>, vector<8x1xf32>
      %cst_186 = arith.constant dense<0xFF800000> : vector<8xf32>
      %290 = vector.multi_reduction <maximumf>, %287, %cst_186 [1] : vector<8x8xf32> to vector<8xf32>
      %291 = vector.shape_cast %290 : vector<8xf32> to vector<8x1xf32>
      %292 = arith.maximumf %289, %291 : vector<8x1xf32>
      %c0_187 = arith.constant 0 : index
      %c0_188 = arith.constant 0 : index
      %293 = vector.load %arg20[%c0_187, %c0_188] : memref<8x1xf32, #tpu.memory_space<vmem>>, vector<8x1xf32>
      tpu.vector_store %arg20[%c0_187, %c0_188], %292 {strides = array<i32>} : memref<8x1xf32, #tpu.memory_space<vmem>>, vector<8x1xf32>,
    } else {
    }
    %c1_i32_55 = arith.constant 1 : i32
    %100 = arith.cmpi sge, %arg1, %c1_i32_55 : i32
    %101 = arith.extui %100 : i1 to i32
    %c0_i32_56 = arith.constant 0 : i32
    %102 = arith.cmpi ne, %101, %c0_i32_56 : i32
    scf.if %102 {
      %c1 = arith.constant 1 : index
      %c0_176 = arith.constant 0 : index
      %c8_177 = arith.constant 8 : index
      %278 = vector.load %arg17[%c1, %c0_176, %c8_177] : memref<2x8x32xbf16, #tpu.memory_space<vmem>>, vector<1x8x8xbf16>
      %279 = vector.shape_cast %278 : vector<1x8x8xbf16> to vector<8x8xbf16>
      %cst_178 = arith.constant dense<0.000000e+00> : vector<8x8xf32>
      %280 = tpu.matmul %94, %279, %cst_178 {dimension_numbers = #tpu.dot_dimension_numbers<[1], [1], [0], [0], [0, 0, 1, 0], [], []>} : vector<8x8xbf16>, vector<8x8xbf16>, vector<8x8xf32> -> vector<8x8xf32>
      %c8_i32_179 = arith.constant 8 : i32
      %281 = vector.broadcast %c8_i32_179 : i32 to vector<1x8xi32>
      %282 = arith.addi %281, %50 : vector<1x8xi32>
      %283 = vector.broadcast %282 : vector<1x8xi32> to vector<8x8xi32>
      %284 = vector.broadcast %49 : vector<8x1xi32> to vector<8x8xi32>
      %285 = arith.cmpi sle, %283, %284 : vector<8x8xi32>
      %cst_180 = arith.constant -1.000000e+30 : f32
      %286 = vector.broadcast %cst_180 : f32 to vector<8x8xf32>
      %287 = arith.select %285, %280, %286 : vector<8x8xi1>, vector<8x8xf32>
      %c0_181 = arith.constant 0 : index
      %c8_182 = arith.constant 8 : index
      %288 = vector.load %arg19[%c0_181, %c8_182] : memref<8x16xf32, #tpu.memory_space<vmem>>, vector<8x8xf32>
      tpu.vector_store %arg19[%c0_181, %c8_182], %287 {strides = array<i32>} : memref<8x16xf32, #tpu.memory_space<vmem>>, vector<8x8xf32>,
      %c0_183 = arith.constant 0 : index
      %c0_184 = arith.constant 0 : index
      %289 = vector.load %arg20[%c0_183, %c0_184] : memref<8x1xf32, #tpu.memory_space<vmem>>, vector<8x1xf32>
      %cst_185 = arith.constant dense<0xFF800000> : vector<8xf32>
      %290 = vector.multi_reduction <maximumf>, %287, %cst_185 [1] : vector<8x8xf32> to vector<8xf32>
      %291 = vector.shape_cast %290 : vector<8xf32> to vector<8x1xf32>
      %292 = arith.maximumf %289, %291 : vector<8x1xf32>
      %c0_186 = arith.constant 0 : index
      %c0_187 = arith.constant 0 : index
      %293 = vector.load %arg20[%c0_186, %c0_187] : memref<8x1xf32, #tpu.memory_space<vmem>>, vector<8x1xf32>
      tpu.vector_store %arg20[%c0_186, %c0_187], %292 {strides = array<i32>} : memref<8x1xf32, #tpu.memory_space<vmem>>, vector<8x1xf32>,
    } else {
    }
    %cst_57 = arith.constant 0.000000e+00 : f32
    %103 = vector.broadcast %cst_57 : f32 to vector<8x1xf32>
    %c0_58 = arith.constant 0 : index
    %c0_59 = arith.constant 0 : index
    %104 = vector.load %arg21[%c0_58, %c0_59] : memref<8x1xf32, #tpu.memory_space<vmem>>, vector<8x1xf32>
    tpu.vector_store %arg21[%c0_58, %c0_59], %103 {strides = array<i32>} : memref<8x1xf32, #tpu.memory_space<vmem>>, vector<8x1xf32>,
    %cst_60 = arith.constant 0.000000e+00 : f32
    %105 = vector.broadcast %cst_60 : f32 to vector<8x8xf32>
    %c0_61 = arith.constant 0 : index
    %c0_62 = arith.constant 0 : index
    %106 = vector.load %arg22[%c0_61, %c0_62] : memref<8x8xf32, #tpu.memory_space<vmem>>, vector<8x8xf32>
    tpu.vector_store %arg22[%c0_61, %c0_62], %105 {strides = array<i32>} : memref<8x8xf32, #tpu.memory_space<vmem>>, vector<8x8xf32>,
    %c0_i32_63 = arith.constant 0 : i32
    %107 = arith.cmpi sge, %arg1, %c0_i32_63 : i32
    %108 = arith.extui %107 : i1 to i32
    %c0_i32_64 = arith.constant 0 : i32
    %109 = arith.cmpi ne, %108, %c0_i32_64 : i32
    scf.if %109 {
      %c0_176 = arith.constant 0 : index
      %c0_177 = arith.constant 0 : index
      %278 = vector.load %arg19[%c0_176, %c0_177] : memref<8x16xf32, #tpu.memory_space<vmem>>, vector<8x8xf32>
      %c0_178 = arith.constant 0 : index
      %c0_179 = arith.constant 0 : index
      %279 = vector.load %arg20[%c0_178, %c0_179] : memref<8x1xf32, #tpu.memory_space<vmem>>, vector<8x1xf32>
      %280 = vector.broadcast %279 : vector<8x1xf32> to vector<8x8xf32>
      %281 = arith.subf %278, %280 : vector<8x8xf32>
      %282 = math.exp %281 : vector<8x8xf32>
      %c0_180 = arith.constant 0 : index
      %c0_181 = arith.constant 0 : index
      %283 = vector.load %arg19[%c0_180, %c0_181] : memref<8x16xf32, #tpu.memory_space<vmem>>, vector<8x8xf32>
      tpu.vector_store %arg19[%c0_180, %c0_181], %282 {strides = array<i32>} : memref<8x16xf32, #tpu.memory_space<vmem>>, vector<8x8xf32>,
      %c0_182 = arith.constant 0 : index
      %c0_183 = arith.constant 0 : index
      %284 = vector.load %arg21[%c0_182, %c0_183] : memref<8x1xf32, #tpu.memory_space<vmem>>, vector<8x1xf32>
      %cst_184 = arith.constant dense<0.000000e+00> : vector<8xf32>
      %285 = vector.multi_reduction <add>, %282, %cst_184 [1] : vector<8x8xf32> to vector<8xf32>
      %286 = vector.shape_cast %285 : vector<8xf32> to vector<8x1xf32>
      %287 = arith.addf %284, %286 : vector<8x1xf32>
      %c0_185 = arith.constant 0 : index
      %c0_186 = arith.constant 0 : index
      %288 = vector.load %arg21[%c0_185, %c0_186] : memref<8x1xf32, #tpu.memory_space<vmem>>, vector<8x1xf32>
      tpu.vector_store %arg21[%c0_185, %c0_186], %287 {strides = array<i32>} : memref<8x1xf32, #tpu.memory_space<vmem>>, vector<8x1xf32>,
      %c0_187 = arith.constant 0 : index
      %c0_188 = arith.constant 0 : index
      %289 = vector.load %arg22[%c0_187, %c0_188] : memref<8x8xf32, #tpu.memory_space<vmem>>, vector<8x8xf32>
      %290 = arith.truncf %282 : vector<8x8xf32> to vector<8x8xbf16>
      %c0_189 = arith.constant 0 : index
      %c0_190 = arith.constant 0 : index
      %c8_191 = arith.constant 8 : index
      %291 = vector.load %arg18[%c0_189, %c0_190, %c8_191] : memref<2x8x32xbf16, #tpu.memory_space<vmem>>, vector<1x8x8xbf16>
      %292 = vector.shape_cast %291 : vector<1x8x8xbf16> to vector<8x8xbf16>
      %cst_192 = arith.constant dense<0.000000e+00> : vector<8x8xf32>
      %293 = tpu.matmul %290, %292, %cst_192 {dimension_numbers = #tpu.dot_dimension_numbers<[1], [0], [0], [1], [0, 0, 1, 1], [], []>} : vector<8x8xbf16>, vector<8x8xbf16>, vector<8x8xf32> -> vector<8x8xf32>
      %294 = arith.addf %289, %293 : vector<8x8xf32>
      %c0_193 = arith.constant 0 : index
      %c0_194 = arith.constant 0 : index
      %295 = vector.load %arg22[%c0_193, %c0_194] : memref<8x8xf32, #tpu.memory_space<vmem>>, vector<8x8xf32>
      tpu.vector_store %arg22[%c0_193, %c0_194], %294 {strides = array<i32>} : memref<8x8xf32, #tpu.memory_space<vmem>>, vector<8x8xf32>,
    } else {
    }
    %c1_i32_65 = arith.constant 1 : i32
    %110 = arith.cmpi sge, %arg1, %c1_i32_65 : i32
    %111 = arith.extui %110 : i1 to i32
    %c0_i32_66 = arith.constant 0 : i32
    %112 = arith.cmpi ne, %111, %c0_i32_66 : i32
    scf.if %112 {
      %c0_176 = arith.constant 0 : index
      %c8_177 = arith.constant 8 : index
      %278 = vector.load %arg19[%c0_176, %c8_177] : memref<8x16xf32, #tpu.memory_space<vmem>>, vector<8x8xf32>
      %c0_178 = arith.constant 0 : index
      %c0_179 = arith.constant 0 : index
      %279 = vector.load %arg20[%c0_178, %c0_179] : memref<8x1xf32, #tpu.memory_space<vmem>>, vector<8x1xf32>
      %280 = vector.broadcast %279 : vector<8x1xf32> to vector<8x8xf32>
      %281 = arith.subf %278, %280 : vector<8x8xf32>
      %282 = math.exp %281 : vector<8x8xf32>
      %c0_180 = arith.constant 0 : index
      %c8_181 = arith.constant 8 : index
      %283 = vector.load %arg19[%c0_180, %c8_181] : memref<8x16xf32, #tpu.memory_space<vmem>>, vector<8x8xf32>
      tpu.vector_store %arg19[%c0_180, %c8_181], %282 {strides = array<i32>} : memref<8x16xf32, #tpu.memory_space<vmem>>, vector<8x8xf32>,
      %c0_182 = arith.constant 0 : index
      %c0_183 = arith.constant 0 : index
      %284 = vector.load %arg21[%c0_182, %c0_183] : memref<8x1xf32, #tpu.memory_space<vmem>>, vector<8x1xf32>
      %cst_184 = arith.constant dense<0.000000e+00> : vector<8xf32>
      %285 = vector.multi_reduction <add>, %282, %cst_184 [1] : vector<8x8xf32> to vector<8xf32>
      %286 = vector.shape_cast %285 : vector<8xf32> to vector<8x1xf32>
      %287 = arith.addf %284, %286 : vector<8x1xf32>
      %c0_185 = arith.constant 0 : index
      %c0_186 = arith.constant 0 : index
      %288 = vector.load %arg21[%c0_185, %c0_186] : memref<8x1xf32, #tpu.memory_space<vmem>>, vector<8x1xf32>
      tpu.vector_store %arg21[%c0_185, %c0_186], %287 {strides = array<i32>} : memref<8x1xf32, #tpu.memory_space<vmem>>, vector<8x1xf32>,
      %c0_187 = arith.constant 0 : index
      %c0_188 = arith.constant 0 : index
      %289 = vector.load %arg22[%c0_187, %c0_188] : memref<8x8xf32, #tpu.memory_space<vmem>>, vector<8x8xf32>
      %290 = arith.truncf %282 : vector<8x8xf32> to vector<8x8xbf16>
      %c1 = arith.constant 1 : index
      %c0_189 = arith.constant 0 : index
      %c8_190 = arith.constant 8 : index
      %291 = vector.load %arg18[%c1, %c0_189, %c8_190] : memref<2x8x32xbf16, #tpu.memory_space<vmem>>, vector<1x8x8xbf16>
      %292 = vector.shape_cast %291 : vector<1x8x8xbf16> to vector<8x8xbf16>
      %cst_191 = arith.constant dense<0.000000e+00> : vector<8x8xf32>
      %293 = tpu.matmul %290, %292, %cst_191 {dimension_numbers = #tpu.dot_dimension_numbers<[1], [0], [0], [1], [0, 0, 1, 1], [], []>} : vector<8x8xbf16>, vector<8x8xbf16>, vector<8x8xf32> -> vector<8x8xf32>
      %294 = arith.addf %289, %293 : vector<8x8xf32>
      %c0_192 = arith.constant 0 : index
      %c0_193 = arith.constant 0 : index
      %295 = vector.load %arg22[%c0_192, %c0_193] : memref<8x8xf32, #tpu.memory_space<vmem>>, vector<8x8xf32>
      tpu.vector_store %arg22[%c0_192, %c0_193], %294 {strides = array<i32>} : memref<8x8xf32, #tpu.memory_space<vmem>>, vector<8x8xf32>,
    } else {
    }
    %c0_67 = arith.constant 0 : index
    %c0_68 = arith.constant 0 : index
    %113 = vector.load %arg21[%c0_67, %c0_68] : memref<8x1xf32, #tpu.memory_space<vmem>>, vector<8x1xf32>
    %114 = tpu.reciprocal %113 {approx = true} : vector<8x1xf32> -> vector<8x1xf32>
    %115 = arith.mulf %113, %114 : vector<8x1xf32>
    %cst_69 = arith.constant 2.000000e+00 : f32
    %116 = vector.broadcast %cst_69 : f32 to vector<8x1xf32>
    %117 = arith.subf %116, %115 : vector<8x1xf32>
    %118 = arith.mulf %114, %117 : vector<8x1xf32>
    %c0_70 = arith.constant 0 : index
    %c0_71 = arith.constant 0 : index
    %119 = vector.load %arg22[%c0_70, %c0_71] : memref<8x8xf32, #tpu.memory_space<vmem>>, vector<8x8xf32>
    %120 = vector.broadcast %118 : vector<8x1xf32> to vector<8x8xf32>
    %121 = arith.mulf %119, %120 : vector<8x8xf32>
    %122 = arith.truncf %121 : vector<8x8xf32> to vector<8x8xbf16>
    %c0_72 = arith.constant 0 : index
    %c8 = arith.constant 8 : index
    %123 = vector.load %arg23[%c0_72, %c8] : memref<8x32xbf16, #tpu.memory_space<vmem>>, vector<8x8xbf16>
    tpu.vector_store %arg23[%c0_72, %c8], %122 {strides = array<i32>} : memref<8x32xbf16, #tpu.memory_space<vmem>>, vector<8x8xbf16>,
    %c0_i32_73 = arith.constant 0 : i32
    %124 = arith.cmpi sge, %arg1, %c0_i32_73 : i32
    %125 = arith.extui %124 : i1 to i32
    %c0_i32_74 = arith.constant 0 : i32
    %126 = arith.cmpi ne, %125, %c0_i32_74 : i32
    scf.if %126 {
      %c0_176 = arith.constant 0 : index
      %c0_177 = arith.constant 0 : index
      %278 = vector.load %arg19[%c0_176, %c0_177] : memref<8x16xf32, #tpu.memory_space<vmem>>, vector<8x8xf32>
      %279 = vector.broadcast %118 : vector<8x1xf32> to vector<8x8xf32>
      %280 = arith.mulf %278, %279 : vector<8x8xf32>
      %281 = arith.truncf %280 : vector<8x8xf32> to vector<8x8xbf16>
      %c0_178 = arith.constant 0 : index
      %c1 = arith.constant 1 : index
      %c0_179 = arith.constant 0 : index
      %c0_180 = arith.constant 0 : index
      %282 = vector.load %arg16[%c0_178, %c1, %c0_179, %c0_180] : memref<1x4x8x16xbf16, #tpu.memory_space<vmem>>, vector<1x1x8x8xbf16>
      %283 = vector.shape_cast %282 : vector<1x1x8x8xbf16> to vector<8x8xbf16>
      %284 = vector.shape_cast %281 : vector<8x8xbf16> to vector<1x1x8x8xbf16>
      tpu.vector_store %arg16[%c0_178, %c1, %c0_179, %c0_180], %284 {strides = array<i32>} : memref<1x4x8x16xbf16, #tpu.memory_space<vmem>>, vector<1x1x8x8xbf16>,
    } else {
    }
    %c0_i32_75 = arith.constant 0 : i32
    %127 = arith.cmpi slt, %arg1, %c0_i32_75 : i32
    %128 = arith.extui %127 : i1 to i32
    %c0_i32_76 = arith.constant 0 : i32
    %129 = arith.cmpi ne, %128, %c0_i32_76 : i32
    scf.if %129 {
      %c0_176 = arith.constant 0 : index
      %c1 = arith.constant 1 : index
      %c0_177 = arith.constant 0 : index
      %c0_178 = arith.constant 0 : index
      %278 = vector.load %arg16[%c0_176, %c1, %c0_177, %c0_178] : memref<1x4x8x16xbf16, #tpu.memory_space<vmem>>, vector<1x1x8x8xbf16>
      %279 = vector.shape_cast %278 : vector<1x1x8x8xbf16> to vector<8x8xbf16>
      %280 = vector.shape_cast %51 : vector<8x8xbf16> to vector<1x1x8x8xbf16>
      tpu.vector_store %arg16[%c0_176, %c1, %c0_177, %c0_178], %280 {strides = array<i32>} : memref<1x4x8x16xbf16, #tpu.memory_space<vmem>>, vector<1x1x8x8xbf16>,
    } else {
    }
    %c1_i32_77 = arith.constant 1 : i32
    %130 = arith.cmpi sge, %arg1, %c1_i32_77 : i32
    %131 = arith.extui %130 : i1 to i32
    %c0_i32_78 = arith.constant 0 : i32
    %132 = arith.cmpi ne, %131, %c0_i32_78 : i32
    scf.if %132 {
      %c0_176 = arith.constant 0 : index
      %c8_177 = arith.constant 8 : index
      %278 = vector.load %arg19[%c0_176, %c8_177] : memref<8x16xf32, #tpu.memory_space<vmem>>, vector<8x8xf32>
      %279 = vector.broadcast %118 : vector<8x1xf32> to vector<8x8xf32>
      %280 = arith.mulf %278, %279 : vector<8x8xf32>
      %281 = arith.truncf %280 : vector<8x8xf32> to vector<8x8xbf16>
      %c0_178 = arith.constant 0 : index
      %c1 = arith.constant 1 : index
      %c0_179 = arith.constant 0 : index
      %c8_180 = arith.constant 8 : index
      %282 = vector.load %arg16[%c0_178, %c1, %c0_179, %c8_180] : memref<1x4x8x16xbf16, #tpu.memory_space<vmem>>, vector<1x1x8x8xbf16>
      %283 = vector.shape_cast %282 : vector<1x1x8x8xbf16> to vector<8x8xbf16>
      %284 = vector.shape_cast %281 : vector<8x8xbf16> to vector<1x1x8x8xbf16>
      tpu.vector_store %arg16[%c0_178, %c1, %c0_179, %c8_180], %284 {strides = array<i32>} : memref<1x4x8x16xbf16, #tpu.memory_space<vmem>>, vector<1x1x8x8xbf16>,
    } else {
    }
    %c1_i32_79 = arith.constant 1 : i32
    %133 = arith.cmpi slt, %arg1, %c1_i32_79 : i32
    %134 = arith.extui %133 : i1 to i32
    %c0_i32_80 = arith.constant 0 : i32
    %135 = arith.cmpi ne, %134, %c0_i32_80 : i32
    scf.if %135 {
      %c0_176 = arith.constant 0 : index
      %c1 = arith.constant 1 : index
      %c0_177 = arith.constant 0 : index
      %c8_178 = arith.constant 8 : index
      %278 = vector.load %arg16[%c0_176, %c1, %c0_177, %c8_178] : memref<1x4x8x16xbf16, #tpu.memory_space<vmem>>, vector<1x1x8x8xbf16>
      %279 = vector.shape_cast %278 : vector<1x1x8x8xbf16> to vector<8x8xbf16>
      %280 = vector.shape_cast %51 : vector<8x8xbf16> to vector<1x1x8x8xbf16>
      tpu.vector_store %arg16[%c0_176, %c1, %c0_177, %c8_178], %280 {strides = array<i32>} : memref<1x4x8x16xbf16, #tpu.memory_space<vmem>>, vector<1x1x8x8xbf16>,
    } else {
    }
    %136 = vector.extract_strided_slice %33 {offsets = [0, 16], sizes = [8, 8], strides = [1, 1]} : vector<8x32xbf16> to vector<8x8xbf16>
    %cst_81 = arith.constant -1.000000e+30 : f32
    %137 = vector.broadcast %cst_81 : f32 to vector<8x1xf32>
    %c0_82 = arith.constant 0 : index
    %c0_83 = arith.constant 0 : index
    %138 = vector.load %arg20[%c0_82, %c0_83] : memref<8x1xf32, #tpu.memory_space<vmem>>, vector<8x1xf32>
    tpu.vector_store %arg20[%c0_82, %c0_83], %137 {strides = array<i32>} : memref<8x1xf32, #tpu.memory_space<vmem>>, vector<8x1xf32>,
    %c0_i32_84 = arith.constant 0 : i32
    %139 = arith.cmpi sge, %arg1, %c0_i32_84 : i32
    %140 = arith.extui %139 : i1 to i32
    %c0_i32_85 = arith.constant 0 : i32
    %141 = arith.cmpi ne, %140, %c0_i32_85 : i32
    scf.if %141 {
      %c0_176 = arith.constant 0 : index
      %c0_177 = arith.constant 0 : index
      %c16_178 = arith.constant 16 : index
      %278 = vector.load %arg17[%c0_176, %c0_177, %c16_178] : memref<2x8x32xbf16, #tpu.memory_space<vmem>>, vector<1x8x8xbf16>
      %279 = vector.shape_cast %278 : vector<1x8x8xbf16> to vector<8x8xbf16>
      %cst_179 = arith.constant dense<0.000000e+00> : vector<8x8xf32>
      %280 = tpu.matmul %136, %279, %cst_179 {dimension_numbers = #tpu.dot_dimension_numbers<[1], [1], [0], [0], [0, 0, 1, 0], [], []>} : vector<8x8xbf16>, vector<8x8xbf16>, vector<8x8xf32> -> vector<8x8xf32>
      %c0_i32_180 = arith.constant 0 : i32
      %281 = vector.broadcast %c0_i32_180 : i32 to vector<1x8xi32>
      %282 = arith.addi %281, %50 : vector<1x8xi32>
      %283 = vector.broadcast %282 : vector<1x8xi32> to vector<8x8xi32>
      %284 = vector.broadcast %49 : vector<8x1xi32> to vector<8x8xi32>
      %285 = arith.cmpi sle, %283, %284 : vector<8x8xi32>
      %cst_181 = arith.constant -1.000000e+30 : f32
      %286 = vector.broadcast %cst_181 : f32 to vector<8x8xf32>
      %287 = arith.select %285, %280, %286 : vector<8x8xi1>, vector<8x8xf32>
      %c0_182 = arith.constant 0 : index
      %c0_183 = arith.constant 0 : index
      %288 = vector.load %arg19[%c0_182, %c0_183] : memref<8x16xf32, #tpu.memory_space<vmem>>, vector<8x8xf32>
      tpu.vector_store %arg19[%c0_182, %c0_183], %287 {strides = array<i32>} : memref<8x16xf32, #tpu.memory_space<vmem>>, vector<8x8xf32>,
      %c0_184 = arith.constant 0 : index
      %c0_185 = arith.constant 0 : index
      %289 = vector.load %arg20[%c0_184, %c0_185] : memref<8x1xf32, #tpu.memory_space<vmem>>, vector<8x1xf32>
      %cst_186 = arith.constant dense<0xFF800000> : vector<8xf32>
      %290 = vector.multi_reduction <maximumf>, %287, %cst_186 [1] : vector<8x8xf32> to vector<8xf32>
      %291 = vector.shape_cast %290 : vector<8xf32> to vector<8x1xf32>
      %292 = arith.maximumf %289, %291 : vector<8x1xf32>
      %c0_187 = arith.constant 0 : index
      %c0_188 = arith.constant 0 : index
      %293 = vector.load %arg20[%c0_187, %c0_188] : memref<8x1xf32, #tpu.memory_space<vmem>>, vector<8x1xf32>
      tpu.vector_store %arg20[%c0_187, %c0_188], %292 {strides = array<i32>} : memref<8x1xf32, #tpu.memory_space<vmem>>, vector<8x1xf32>,
    } else {
    }
    %c1_i32_86 = arith.constant 1 : i32
    %142 = arith.cmpi sge, %arg1, %c1_i32_86 : i32
    %143 = arith.extui %142 : i1 to i32
    %c0_i32_87 = arith.constant 0 : i32
    %144 = arith.cmpi ne, %143, %c0_i32_87 : i32
    scf.if %144 {
      %c1 = arith.constant 1 : index
      %c0_176 = arith.constant 0 : index
      %c16_177 = arith.constant 16 : index
      %278 = vector.load %arg17[%c1, %c0_176, %c16_177] : memref<2x8x32xbf16, #tpu.memory_space<vmem>>, vector<1x8x8xbf16>
      %279 = vector.shape_cast %278 : vector<1x8x8xbf16> to vector<8x8xbf16>
      %cst_178 = arith.constant dense<0.000000e+00> : vector<8x8xf32>
      %280 = tpu.matmul %136, %279, %cst_178 {dimension_numbers = #tpu.dot_dimension_numbers<[1], [1], [0], [0], [0, 0, 1, 0], [], []>} : vector<8x8xbf16>, vector<8x8xbf16>, vector<8x8xf32> -> vector<8x8xf32>
      %c8_i32_179 = arith.constant 8 : i32
      %281 = vector.broadcast %c8_i32_179 : i32 to vector<1x8xi32>
      %282 = arith.addi %281, %50 : vector<1x8xi32>
      %283 = vector.broadcast %282 : vector<1x8xi32> to vector<8x8xi32>
      %284 = vector.broadcast %49 : vector<8x1xi32> to vector<8x8xi32>
      %285 = arith.cmpi sle, %283, %284 : vector<8x8xi32>
      %cst_180 = arith.constant -1.000000e+30 : f32
      %286 = vector.broadcast %cst_180 : f32 to vector<8x8xf32>
      %287 = arith.select %285, %280, %286 : vector<8x8xi1>, vector<8x8xf32>
      %c0_181 = arith.constant 0 : index
      %c8_182 = arith.constant 8 : index
      %288 = vector.load %arg19[%c0_181, %c8_182] : memref<8x16xf32, #tpu.memory_space<vmem>>, vector<8x8xf32>
      tpu.vector_store %arg19[%c0_181, %c8_182], %287 {strides = array<i32>} : memref<8x16xf32, #tpu.memory_space<vmem>>, vector<8x8xf32>,
      %c0_183 = arith.constant 0 : index
      %c0_184 = arith.constant 0 : index
      %289 = vector.load %arg20[%c0_183, %c0_184] : memref<8x1xf32, #tpu.memory_space<vmem>>, vector<8x1xf32>
      %cst_185 = arith.constant dense<0xFF800000> : vector<8xf32>
      %290 = vector.multi_reduction <maximumf>, %287, %cst_185 [1] : vector<8x8xf32> to vector<8xf32>
      %291 = vector.shape_cast %290 : vector<8xf32> to vector<8x1xf32>
      %292 = arith.maximumf %289, %291 : vector<8x1xf32>
      %c0_186 = arith.constant 0 : index
      %c0_187 = arith.constant 0 : index
      %293 = vector.load %arg20[%c0_186, %c0_187] : memref<8x1xf32, #tpu.memory_space<vmem>>, vector<8x1xf32>
      tpu.vector_store %arg20[%c0_186, %c0_187], %292 {strides = array<i32>} : memref<8x1xf32, #tpu.memory_space<vmem>>, vector<8x1xf32>,
    } else {
    }
    %cst_88 = arith.constant 0.000000e+00 : f32
    %145 = vector.broadcast %cst_88 : f32 to vector<8x1xf32>
    %c0_89 = arith.constant 0 : index
    %c0_90 = arith.constant 0 : index
    %146 = vector.load %arg21[%c0_89, %c0_90] : memref<8x1xf32, #tpu.memory_space<vmem>>, vector<8x1xf32>
    tpu.vector_store %arg21[%c0_89, %c0_90], %145 {strides = array<i32>} : memref<8x1xf32, #tpu.memory_space<vmem>>, vector<8x1xf32>,
    %cst_91 = arith.constant 0.000000e+00 : f32
    %147 = vector.broadcast %cst_91 : f32 to vector<8x8xf32>
    %c0_92 = arith.constant 0 : index
    %c0_93 = arith.constant 0 : index
    %148 = vector.load %arg22[%c0_92, %c0_93] : memref<8x8xf32, #tpu.memory_space<vmem>>, vector<8x8xf32>
    tpu.vector_store %arg22[%c0_92, %c0_93], %147 {strides = array<i32>} : memref<8x8xf32, #tpu.memory_space<vmem>>, vector<8x8xf32>,
    %c0_i32_94 = arith.constant 0 : i32
    %149 = arith.cmpi sge, %arg1, %c0_i32_94 : i32
    %150 = arith.extui %149 : i1 to i32
    %c0_i32_95 = arith.constant 0 : i32
    %151 = arith.cmpi ne, %150, %c0_i32_95 : i32
    scf.if %151 {
      %c0_176 = arith.constant 0 : index
      %c0_177 = arith.constant 0 : index
      %278 = vector.load %arg19[%c0_176, %c0_177] : memref<8x16xf32, #tpu.memory_space<vmem>>, vector<8x8xf32>
      %c0_178 = arith.constant 0 : index
      %c0_179 = arith.constant 0 : index
      %279 = vector.load %arg20[%c0_178, %c0_179] : memref<8x1xf32, #tpu.memory_space<vmem>>, vector<8x1xf32>
      %280 = vector.broadcast %279 : vector<8x1xf32> to vector<8x8xf32>
      %281 = arith.subf %278, %280 : vector<8x8xf32>
      %282 = math.exp %281 : vector<8x8xf32>
      %c0_180 = arith.constant 0 : index
      %c0_181 = arith.constant 0 : index
      %283 = vector.load %arg19[%c0_180, %c0_181] : memref<8x16xf32, #tpu.memory_space<vmem>>, vector<8x8xf32>
      tpu.vector_store %arg19[%c0_180, %c0_181], %282 {strides = array<i32>} : memref<8x16xf32, #tpu.memory_space<vmem>>, vector<8x8xf32>,
      %c0_182 = arith.constant 0 : index
      %c0_183 = arith.constant 0 : index
      %284 = vector.load %arg21[%c0_182, %c0_183] : memref<8x1xf32, #tpu.memory_space<vmem>>, vector<8x1xf32>
      %cst_184 = arith.constant dense<0.000000e+00> : vector<8xf32>
      %285 = vector.multi_reduction <add>, %282, %cst_184 [1] : vector<8x8xf32> to vector<8xf32>
      %286 = vector.shape_cast %285 : vector<8xf32> to vector<8x1xf32>
      %287 = arith.addf %284, %286 : vector<8x1xf32>
      %c0_185 = arith.constant 0 : index
      %c0_186 = arith.constant 0 : index
      %288 = vector.load %arg21[%c0_185, %c0_186] : memref<8x1xf32, #tpu.memory_space<vmem>>, vector<8x1xf32>
      tpu.vector_store %arg21[%c0_185, %c0_186], %287 {strides = array<i32>} : memref<8x1xf32, #tpu.memory_space<vmem>>, vector<8x1xf32>,
      %c0_187 = arith.constant 0 : index
      %c0_188 = arith.constant 0 : index
      %289 = vector.load %arg22[%c0_187, %c0_188] : memref<8x8xf32, #tpu.memory_space<vmem>>, vector<8x8xf32>
      %290 = arith.truncf %282 : vector<8x8xf32> to vector<8x8xbf16>
      %c0_189 = arith.constant 0 : index
      %c0_190 = arith.constant 0 : index
      %c16_191 = arith.constant 16 : index
      %291 = vector.load %arg18[%c0_189, %c0_190, %c16_191] : memref<2x8x32xbf16, #tpu.memory_space<vmem>>, vector<1x8x8xbf16>
      %292 = vector.shape_cast %291 : vector<1x8x8xbf16> to vector<8x8xbf16>
      %cst_192 = arith.constant dense<0.000000e+00> : vector<8x8xf32>
      %293 = tpu.matmul %290, %292, %cst_192 {dimension_numbers = #tpu.dot_dimension_numbers<[1], [0], [0], [1], [0, 0, 1, 1], [], []>} : vector<8x8xbf16>, vector<8x8xbf16>, vector<8x8xf32> -> vector<8x8xf32>
      %294 = arith.addf %289, %293 : vector<8x8xf32>
      %c0_193 = arith.constant 0 : index
      %c0_194 = arith.constant 0 : index
      %295 = vector.load %arg22[%c0_193, %c0_194] : memref<8x8xf32, #tpu.memory_space<vmem>>, vector<8x8xf32>
      tpu.vector_store %arg22[%c0_193, %c0_194], %294 {strides = array<i32>} : memref<8x8xf32, #tpu.memory_space<vmem>>, vector<8x8xf32>,
    } else {
    }
    %c1_i32_96 = arith.constant 1 : i32
    %152 = arith.cmpi sge, %arg1, %c1_i32_96 : i32
    %153 = arith.extui %152 : i1 to i32
    %c0_i32_97 = arith.constant 0 : i32
    %154 = arith.cmpi ne, %153, %c0_i32_97 : i32
    scf.if %154 {
      %c0_176 = arith.constant 0 : index
      %c8_177 = arith.constant 8 : index
      %278 = vector.load %arg19[%c0_176, %c8_177] : memref<8x16xf32, #tpu.memory_space<vmem>>, vector<8x8xf32>
      %c0_178 = arith.constant 0 : index
      %c0_179 = arith.constant 0 : index
      %279 = vector.load %arg20[%c0_178, %c0_179] : memref<8x1xf32, #tpu.memory_space<vmem>>, vector<8x1xf32>
      %280 = vector.broadcast %279 : vector<8x1xf32> to vector<8x8xf32>
      %281 = arith.subf %278, %280 : vector<8x8xf32>
      %282 = math.exp %281 : vector<8x8xf32>
      %c0_180 = arith.constant 0 : index
      %c8_181 = arith.constant 8 : index
      %283 = vector.load %arg19[%c0_180, %c8_181] : memref<8x16xf32, #tpu.memory_space<vmem>>, vector<8x8xf32>
      tpu.vector_store %arg19[%c0_180, %c8_181], %282 {strides = array<i32>} : memref<8x16xf32, #tpu.memory_space<vmem>>, vector<8x8xf32>,
      %c0_182 = arith.constant 0 : index
      %c0_183 = arith.constant 0 : index
      %284 = vector.load %arg21[%c0_182, %c0_183] : memref<8x1xf32, #tpu.memory_space<vmem>>, vector<8x1xf32>
      %cst_184 = arith.constant dense<0.000000e+00> : vector<8xf32>
      %285 = vector.multi_reduction <add>, %282, %cst_184 [1] : vector<8x8xf32> to vector<8xf32>
      %286 = vector.shape_cast %285 : vector<8xf32> to vector<8x1xf32>
      %287 = arith.addf %284, %286 : vector<8x1xf32>
      %c0_185 = arith.constant 0 : index
      %c0_186 = arith.constant 0 : index
      %288 = vector.load %arg21[%c0_185, %c0_186] : memref<8x1xf32, #tpu.memory_space<vmem>>, vector<8x1xf32>
      tpu.vector_store %arg21[%c0_185, %c0_186], %287 {strides = array<i32>} : memref<8x1xf32, #tpu.memory_space<vmem>>, vector<8x1xf32>,
      %c0_187 = arith.constant 0 : index
      %c0_188 = arith.constant 0 : index
      %289 = vector.load %arg22[%c0_187, %c0_188] : memref<8x8xf32, #tpu.memory_space<vmem>>, vector<8x8xf32>
      %290 = arith.truncf %282 : vector<8x8xf32> to vector<8x8xbf16>
      %c1 = arith.constant 1 : index
      %c0_189 = arith.constant 0 : index
      %c16_190 = arith.constant 16 : index
      %291 = vector.load %arg18[%c1, %c0_189, %c16_190] : memref<2x8x32xbf16, #tpu.memory_space<vmem>>, vector<1x8x8xbf16>
      %292 = vector.shape_cast %291 : vector<1x8x8xbf16> to vector<8x8xbf16>
      %cst_191 = arith.constant dense<0.000000e+00> : vector<8x8xf32>
      %293 = tpu.matmul %290, %292, %cst_191 {dimension_numbers = #tpu.dot_dimension_numbers<[1], [0], [0], [1], [0, 0, 1, 1], [], []>} : vector<8x8xbf16>, vector<8x8xbf16>, vector<8x8xf32> -> vector<8x8xf32>
      %294 = arith.addf %289, %293 : vector<8x8xf32>
      %c0_192 = arith.constant 0 : index
      %c0_193 = arith.constant 0 : index
      %295 = vector.load %arg22[%c0_192, %c0_193] : memref<8x8xf32, #tpu.memory_space<vmem>>, vector<8x8xf32>
      tpu.vector_store %arg22[%c0_192, %c0_193], %294 {strides = array<i32>} : memref<8x8xf32, #tpu.memory_space<vmem>>, vector<8x8xf32>,
    } else {
    }
    %c0_98 = arith.constant 0 : index
    %c0_99 = arith.constant 0 : index
    %155 = vector.load %arg21[%c0_98, %c0_99] : memref<8x1xf32, #tpu.memory_space<vmem>>, vector<8x1xf32>
    %156 = tpu.reciprocal %155 {approx = true} : vector<8x1xf32> -> vector<8x1xf32>
    %157 = arith.mulf %155, %156 : vector<8x1xf32>
    %cst_100 = arith.constant 2.000000e+00 : f32
    %158 = vector.broadcast %cst_100 : f32 to vector<8x1xf32>
    %159 = arith.subf %158, %157 : vector<8x1xf32>
    %160 = arith.mulf %156, %159 : vector<8x1xf32>
    %c0_101 = arith.constant 0 : index
    %c0_102 = arith.constant 0 : index
    %161 = vector.load %arg22[%c0_101, %c0_102] : memref<8x8xf32, #tpu.memory_space<vmem>>, vector<8x8xf32>
    %162 = vector.broadcast %160 : vector<8x1xf32> to vector<8x8xf32>
    %163 = arith.mulf %161, %162 : vector<8x8xf32>
    %164 = arith.truncf %163 : vector<8x8xf32> to vector<8x8xbf16>
    %c0_103 = arith.constant 0 : index
    %c16 = arith.constant 16 : index
    %165 = vector.load %arg23[%c0_103, %c16] : memref<8x32xbf16, #tpu.memory_space<vmem>>, vector<8x8xbf16>
    tpu.vector_store %arg23[%c0_103, %c16], %164 {strides = array<i32>} : memref<8x32xbf16, #tpu.memory_space<vmem>>, vector<8x8xbf16>,
    %c0_i32_104 = arith.constant 0 : i32
    %166 = arith.cmpi sge, %arg1, %c0_i32_104 : i32
    %167 = arith.extui %166 : i1 to i32
    %c0_i32_105 = arith.constant 0 : i32
    %168 = arith.cmpi ne, %167, %c0_i32_105 : i32
    scf.if %168 {
      %c0_176 = arith.constant 0 : index
      %c0_177 = arith.constant 0 : index
      %278 = vector.load %arg19[%c0_176, %c0_177] : memref<8x16xf32, #tpu.memory_space<vmem>>, vector<8x8xf32>
      %279 = vector.broadcast %160 : vector<8x1xf32> to vector<8x8xf32>
      %280 = arith.mulf %278, %279 : vector<8x8xf32>
      %281 = arith.truncf %280 : vector<8x8xf32> to vector<8x8xbf16>
      %c0_178 = arith.constant 0 : index
      %c2 = arith.constant 2 : index
      %c0_179 = arith.constant 0 : index
      %c0_180 = arith.constant 0 : index
      %282 = vector.load %arg16[%c0_178, %c2, %c0_179, %c0_180] : memref<1x4x8x16xbf16, #tpu.memory_space<vmem>>, vector<1x1x8x8xbf16>
      %283 = vector.shape_cast %282 : vector<1x1x8x8xbf16> to vector<8x8xbf16>
      %284 = vector.shape_cast %281 : vector<8x8xbf16> to vector<1x1x8x8xbf16>
      tpu.vector_store %arg16[%c0_178, %c2, %c0_179, %c0_180], %284 {strides = array<i32>} : memref<1x4x8x16xbf16, #tpu.memory_space<vmem>>, vector<1x1x8x8xbf16>,
    } else {
    }
    %c0_i32_106 = arith.constant 0 : i32
    %169 = arith.cmpi slt, %arg1, %c0_i32_106 : i32
    %170 = arith.extui %169 : i1 to i32
    %c0_i32_107 = arith.constant 0 : i32
    %171 = arith.cmpi ne, %170, %c0_i32_107 : i32
    scf.if %171 {
      %c0_176 = arith.constant 0 : index
      %c2 = arith.constant 2 : index
      %c0_177 = arith.constant 0 : index
      %c0_178 = arith.constant 0 : index
      %278 = vector.load %arg16[%c0_176, %c2, %c0_177, %c0_178] : memref<1x4x8x16xbf16, #tpu.memory_space<vmem>>, vector<1x1x8x8xbf16>
      %279 = vector.shape_cast %278 : vector<1x1x8x8xbf16> to vector<8x8xbf16>
      %280 = vector.shape_cast %51 : vector<8x8xbf16> to vector<1x1x8x8xbf16>
      tpu.vector_store %arg16[%c0_176, %c2, %c0_177, %c0_178], %280 {strides = array<i32>} : memref<1x4x8x16xbf16, #tpu.memory_space<vmem>>, vector<1x1x8x8xbf16>,
    } else {
    }
    %c1_i32_108 = arith.constant 1 : i32
    %172 = arith.cmpi sge, %arg1, %c1_i32_108 : i32
    %173 = arith.extui %172 : i1 to i32
    %c0_i32_109 = arith.constant 0 : i32
    %174 = arith.cmpi ne, %173, %c0_i32_109 : i32
    scf.if %174 {
      %c0_176 = arith.constant 0 : index
      %c8_177 = arith.constant 8 : index
      %278 = vector.load %arg19[%c0_176, %c8_177] : memref<8x16xf32, #tpu.memory_space<vmem>>, vector<8x8xf32>
      %279 = vector.broadcast %160 : vector<8x1xf32> to vector<8x8xf32>
      %280 = arith.mulf %278, %279 : vector<8x8xf32>
      %281 = arith.truncf %280 : vector<8x8xf32> to vector<8x8xbf16>
      %c0_178 = arith.constant 0 : index
      %c2 = arith.constant 2 : index
      %c0_179 = arith.constant 0 : index
      %c8_180 = arith.constant 8 : index
      %282 = vector.load %arg16[%c0_178, %c2, %c0_179, %c8_180] : memref<1x4x8x16xbf16, #tpu.memory_space<vmem>>, vector<1x1x8x8xbf16>
      %283 = vector.shape_cast %282 : vector<1x1x8x8xbf16> to vector<8x8xbf16>
      %284 = vector.shape_cast %281 : vector<8x8xbf16> to vector<1x1x8x8xbf16>
      tpu.vector_store %arg16[%c0_178, %c2, %c0_179, %c8_180], %284 {strides = array<i32>} : memref<1x4x8x16xbf16, #tpu.memory_space<vmem>>, vector<1x1x8x8xbf16>,
    } else {
    }
    %c1_i32_110 = arith.constant 1 : i32
    %175 = arith.cmpi slt, %arg1, %c1_i32_110 : i32
    %176 = arith.extui %175 : i1 to i32
    %c0_i32_111 = arith.constant 0 : i32
    %177 = arith.cmpi ne, %176, %c0_i32_111 : i32
    scf.if %177 {
      %c0_176 = arith.constant 0 : index
      %c2 = arith.constant 2 : index
      %c0_177 = arith.constant 0 : index
      %c8_178 = arith.constant 8 : index
      %278 = vector.load %arg16[%c0_176, %c2, %c0_177, %c8_178] : memref<1x4x8x16xbf16, #tpu.memory_space<vmem>>, vector<1x1x8x8xbf16>
      %279 = vector.shape_cast %278 : vector<1x1x8x8xbf16> to vector<8x8xbf16>
      %280 = vector.shape_cast %51 : vector<8x8xbf16> to vector<1x1x8x8xbf16>
      tpu.vector_store %arg16[%c0_176, %c2, %c0_177, %c8_178], %280 {strides = array<i32>} : memref<1x4x8x16xbf16, #tpu.memory_space<vmem>>, vector<1x1x8x8xbf16>,
    } else {
    }
    %178 = vector.extract_strided_slice %33 {offsets = [0, 24], sizes = [8, 8], strides = [1, 1]} : vector<8x32xbf16> to vector<8x8xbf16>
    %cst_112 = arith.constant -1.000000e+30 : f32
    %179 = vector.broadcast %cst_112 : f32 to vector<8x1xf32>
    %c0_113 = arith.constant 0 : index
    %c0_114 = arith.constant 0 : index
    %180 = vector.load %arg20[%c0_113, %c0_114] : memref<8x1xf32, #tpu.memory_space<vmem>>, vector<8x1xf32>
    tpu.vector_store %arg20[%c0_113, %c0_114], %179 {strides = array<i32>} : memref<8x1xf32, #tpu.memory_space<vmem>>, vector<8x1xf32>,
    %c0_i32_115 = arith.constant 0 : i32
    %181 = arith.cmpi sge, %arg1, %c0_i32_115 : i32
    %182 = arith.extui %181 : i1 to i32
    %c0_i32_116 = arith.constant 0 : i32
    %183 = arith.cmpi ne, %182, %c0_i32_116 : i32
    scf.if %183 {
      %c0_176 = arith.constant 0 : index
      %c0_177 = arith.constant 0 : index
      %c24_178 = arith.constant 24 : index
      %278 = vector.load %arg17[%c0_176, %c0_177, %c24_178] : memref<2x8x32xbf16, #tpu.memory_space<vmem>>, vector<1x8x8xbf16>
      %279 = vector.shape_cast %278 : vector<1x8x8xbf16> to vector<8x8xbf16>
      %cst_179 = arith.constant dense<0.000000e+00> : vector<8x8xf32>
      %280 = tpu.matmul %178, %279, %cst_179 {dimension_numbers = #tpu.dot_dimension_numbers<[1], [1], [0], [0], [0, 0, 1, 0], [], []>} : vector<8x8xbf16>, vector<8x8xbf16>, vector<8x8xf32> -> vector<8x8xf32>
      %c0_i32_180 = arith.constant 0 : i32
      %281 = vector.broadcast %c0_i32_180 : i32 to vector<1x8xi32>
      %282 = arith.addi %281, %50 : vector<1x8xi32>
      %283 = vector.broadcast %282 : vector<1x8xi32> to vector<8x8xi32>
      %284 = vector.broadcast %49 : vector<8x1xi32> to vector<8x8xi32>
      %285 = arith.cmpi sle, %283, %284 : vector<8x8xi32>
      %cst_181 = arith.constant -1.000000e+30 : f32
      %286 = vector.broadcast %cst_181 : f32 to vector<8x8xf32>
      %287 = arith.select %285, %280, %286 : vector<8x8xi1>, vector<8x8xf32>
      %c0_182 = arith.constant 0 : index
      %c0_183 = arith.constant 0 : index
      %288 = vector.load %arg19[%c0_182, %c0_183] : memref<8x16xf32, #tpu.memory_space<vmem>>, vector<8x8xf32>
      tpu.vector_store %arg19[%c0_182, %c0_183], %287 {strides = array<i32>} : memref<8x16xf32, #tpu.memory_space<vmem>>, vector<8x8xf32>,
      %c0_184 = arith.constant 0 : index
      %c0_185 = arith.constant 0 : index
      %289 = vector.load %arg20[%c0_184, %c0_185] : memref<8x1xf32, #tpu.memory_space<vmem>>, vector<8x1xf32>
      %cst_186 = arith.constant dense<0xFF800000> : vector<8xf32>
      %290 = vector.multi_reduction <maximumf>, %287, %cst_186 [1] : vector<8x8xf32> to vector<8xf32>
      %291 = vector.shape_cast %290 : vector<8xf32> to vector<8x1xf32>
      %292 = arith.maximumf %289, %291 : vector<8x1xf32>
      %c0_187 = arith.constant 0 : index
      %c0_188 = arith.constant 0 : index
      %293 = vector.load %arg20[%c0_187, %c0_188] : memref<8x1xf32, #tpu.memory_space<vmem>>, vector<8x1xf32>
      tpu.vector_store %arg20[%c0_187, %c0_188], %292 {strides = array<i32>} : memref<8x1xf32, #tpu.memory_space<vmem>>, vector<8x1xf32>,
    } else {
    }
    %c1_i32_117 = arith.constant 1 : i32
    %184 = arith.cmpi sge, %arg1, %c1_i32_117 : i32
    %185 = arith.extui %184 : i1 to i32
    %c0_i32_118 = arith.constant 0 : i32
    %186 = arith.cmpi ne, %185, %c0_i32_118 : i32
    scf.if %186 {
      %c1 = arith.constant 1 : index
      %c0_176 = arith.constant 0 : index
      %c24_177 = arith.constant 24 : index
      %278 = vector.load %arg17[%c1, %c0_176, %c24_177] : memref<2x8x32xbf16, #tpu.memory_space<vmem>>, vector<1x8x8xbf16>
      %279 = vector.shape_cast %278 : vector<1x8x8xbf16> to vector<8x8xbf16>
      %cst_178 = arith.constant dense<0.000000e+00> : vector<8x8xf32>
      %280 = tpu.matmul %178, %279, %cst_178 {dimension_numbers = #tpu.dot_dimension_numbers<[1], [1], [0], [0], [0, 0, 1, 0], [], []>} : vector<8x8xbf16>, vector<8x8xbf16>, vector<8x8xf32> -> vector<8x8xf32>
      %c8_i32_179 = arith.constant 8 : i32
      %281 = vector.broadcast %c8_i32_179 : i32 to vector<1x8xi32>
      %282 = arith.addi %281, %50 : vector<1x8xi32>
      %283 = vector.broadcast %282 : vector<1x8xi32> to vector<8x8xi32>
      %284 = vector.broadcast %49 : vector<8x1xi32> to vector<8x8xi32>
      %285 = arith.cmpi sle, %283, %284 : vector<8x8xi32>
      %cst_180 = arith.constant -1.000000e+30 : f32
      %286 = vector.broadcast %cst_180 : f32 to vector<8x8xf32>
      %287 = arith.select %285, %280, %286 : vector<8x8xi1>, vector<8x8xf32>
      %c0_181 = arith.constant 0 : index
      %c8_182 = arith.constant 8 : index
      %288 = vector.load %arg19[%c0_181, %c8_182] : memref<8x16xf32, #tpu.memory_space<vmem>>, vector<8x8xf32>
      tpu.vector_store %arg19[%c0_181, %c8_182], %287 {strides = array<i32>} : memref<8x16xf32, #tpu.memory_space<vmem>>, vector<8x8xf32>,
      %c0_183 = arith.constant 0 : index
      %c0_184 = arith.constant 0 : index
      %289 = vector.load %arg20[%c0_183, %c0_184] : memref<8x1xf32, #tpu.memory_space<vmem>>, vector<8x1xf32>
      %cst_185 = arith.constant dense<0xFF800000> : vector<8xf32>
      %290 = vector.multi_reduction <maximumf>, %287, %cst_185 [1] : vector<8x8xf32> to vector<8xf32>
      %291 = vector.shape_cast %290 : vector<8xf32> to vector<8x1xf32>
      %292 = arith.maximumf %289, %291 : vector<8x1xf32>
      %c0_186 = arith.constant 0 : index
      %c0_187 = arith.constant 0 : index
      %293 = vector.load %arg20[%c0_186, %c0_187] : memref<8x1xf32, #tpu.memory_space<vmem>>, vector<8x1xf32>
      tpu.vector_store %arg20[%c0_186, %c0_187], %292 {strides = array<i32>} : memref<8x1xf32, #tpu.memory_space<vmem>>, vector<8x1xf32>,
    } else {
    }
    %cst_119 = arith.constant 0.000000e+00 : f32
    %187 = vector.broadcast %cst_119 : f32 to vector<8x1xf32>
    %c0_120 = arith.constant 0 : index
    %c0_121 = arith.constant 0 : index
    %188 = vector.load %arg21[%c0_120, %c0_121] : memref<8x1xf32, #tpu.memory_space<vmem>>, vector<8x1xf32>
    tpu.vector_store %arg21[%c0_120, %c0_121], %187 {strides = array<i32>} : memref<8x1xf32, #tpu.memory_space<vmem>>, vector<8x1xf32>,
    %cst_122 = arith.constant 0.000000e+00 : f32
    %189 = vector.broadcast %cst_122 : f32 to vector<8x8xf32>
    %c0_123 = arith.constant 0 : index
    %c0_124 = arith.constant 0 : index
    %190 = vector.load %arg22[%c0_123, %c0_124] : memref<8x8xf32, #tpu.memory_space<vmem>>, vector<8x8xf32>
    tpu.vector_store %arg22[%c0_123, %c0_124], %189 {strides = array<i32>} : memref<8x8xf32, #tpu.memory_space<vmem>>, vector<8x8xf32>,
    %c0_i32_125 = arith.constant 0 : i32
    %191 = arith.cmpi sge, %arg1, %c0_i32_125 : i32
    %192 = arith.extui %191 : i1 to i32
    %c0_i32_126 = arith.constant 0 : i32
    %193 = arith.cmpi ne, %192, %c0_i32_126 : i32
    scf.if %193 {
      %c0_176 = arith.constant 0 : index
      %c0_177 = arith.constant 0 : index
      %278 = vector.load %arg19[%c0_176, %c0_177] : memref<8x16xf32, #tpu.memory_space<vmem>>, vector<8x8xf32>
      %c0_178 = arith.constant 0 : index
      %c0_179 = arith.constant 0 : index
      %279 = vector.load %arg20[%c0_178, %c0_179] : memref<8x1xf32, #tpu.memory_space<vmem>>, vector<8x1xf32>
      %280 = vector.broadcast %279 : vector<8x1xf32> to vector<8x8xf32>
      %281 = arith.subf %278, %280 : vector<8x8xf32>
      %282 = math.exp %281 : vector<8x8xf32>
      %c0_180 = arith.constant 0 : index
      %c0_181 = arith.constant 0 : index
      %283 = vector.load %arg19[%c0_180, %c0_181] : memref<8x16xf32, #tpu.memory_space<vmem>>, vector<8x8xf32>
      tpu.vector_store %arg19[%c0_180, %c0_181], %282 {strides = array<i32>} : memref<8x16xf32, #tpu.memory_space<vmem>>, vector<8x8xf32>,
      %c0_182 = arith.constant 0 : index
      %c0_183 = arith.constant 0 : index
      %284 = vector.load %arg21[%c0_182, %c0_183] : memref<8x1xf32, #tpu.memory_space<vmem>>, vector<8x1xf32>
      %cst_184 = arith.constant dense<0.000000e+00> : vector<8xf32>
      %285 = vector.multi_reduction <add>, %282, %cst_184 [1] : vector<8x8xf32> to vector<8xf32>
      %286 = vector.shape_cast %285 : vector<8xf32> to vector<8x1xf32>
      %287 = arith.addf %284, %286 : vector<8x1xf32>
      %c0_185 = arith.constant 0 : index
      %c0_186 = arith.constant 0 : index
      %288 = vector.load %arg21[%c0_185, %c0_186] : memref<8x1xf32, #tpu.memory_space<vmem>>, vector<8x1xf32>
      tpu.vector_store %arg21[%c0_185, %c0_186], %287 {strides = array<i32>} : memref<8x1xf32, #tpu.memory_space<vmem>>, vector<8x1xf32>,
      %c0_187 = arith.constant 0 : index
      %c0_188 = arith.constant 0 : index
      %289 = vector.load %arg22[%c0_187, %c0_188] : memref<8x8xf32, #tpu.memory_space<vmem>>, vector<8x8xf32>
      %290 = arith.truncf %282 : vector<8x8xf32> to vector<8x8xbf16>
      %c0_189 = arith.constant 0 : index
      %c0_190 = arith.constant 0 : index
      %c24_191 = arith.constant 24 : index
      %291 = vector.load %arg18[%c0_189, %c0_190, %c24_191] : memref<2x8x32xbf16, #tpu.memory_space<vmem>>, vector<1x8x8xbf16>
      %292 = vector.shape_cast %291 : vector<1x8x8xbf16> to vector<8x8xbf16>
      %cst_192 = arith.constant dense<0.000000e+00> : vector<8x8xf32>
      %293 = tpu.matmul %290, %292, %cst_192 {dimension_numbers = #tpu.dot_dimension_numbers<[1], [0], [0], [1], [0, 0, 1, 1], [], []>} : vector<8x8xbf16>, vector<8x8xbf16>, vector<8x8xf32> -> vector<8x8xf32>
      %294 = arith.addf %289, %293 : vector<8x8xf32>
      %c0_193 = arith.constant 0 : index
      %c0_194 = arith.constant 0 : index
      %295 = vector.load %arg22[%c0_193, %c0_194] : memref<8x8xf32, #tpu.memory_space<vmem>>, vector<8x8xf32>
      tpu.vector_store %arg22[%c0_193, %c0_194], %294 {strides = array<i32>} : memref<8x8xf32, #tpu.memory_space<vmem>>, vector<8x8xf32>,
    } else {
    }
    %c1_i32_127 = arith.constant 1 : i32
    %194 = arith.cmpi sge, %arg1, %c1_i32_127 : i32
    %195 = arith.extui %194 : i1 to i32
    %c0_i32_128 = arith.constant 0 : i32
    %196 = arith.cmpi ne, %195, %c0_i32_128 : i32
    scf.if %196 {
      %c0_176 = arith.constant 0 : index
      %c8_177 = arith.constant 8 : index
      %278 = vector.load %arg19[%c0_176, %c8_177] : memref<8x16xf32, #tpu.memory_space<vmem>>, vector<8x8xf32>
      %c0_178 = arith.constant 0 : index
      %c0_179 = arith.constant 0 : index
      %279 = vector.load %arg20[%c0_178, %c0_179] : memref<8x1xf32, #tpu.memory_space<vmem>>, vector<8x1xf32>
      %280 = vector.broadcast %279 : vector<8x1xf32> to vector<8x8xf32>
      %281 = arith.subf %278, %280 : vector<8x8xf32>
      %282 = math.exp %281 : vector<8x8xf32>
      %c0_180 = arith.constant 0 : index
      %c8_181 = arith.constant 8 : index
      %283 = vector.load %arg19[%c0_180, %c8_181] : memref<8x16xf32, #tpu.memory_space<vmem>>, vector<8x8xf32>
      tpu.vector_store %arg19[%c0_180, %c8_181], %282 {strides = array<i32>} : memref<8x16xf32, #tpu.memory_space<vmem>>, vector<8x8xf32>,
      %c0_182 = arith.constant 0 : index
      %c0_183 = arith.constant 0 : index
      %284 = vector.load %arg21[%c0_182, %c0_183] : memref<8x1xf32, #tpu.memory_space<vmem>>, vector<8x1xf32>
      %cst_184 = arith.constant dense<0.000000e+00> : vector<8xf32>
      %285 = vector.multi_reduction <add>, %282, %cst_184 [1] : vector<8x8xf32> to vector<8xf32>
      %286 = vector.shape_cast %285 : vector<8xf32> to vector<8x1xf32>
      %287 = arith.addf %284, %286 : vector<8x1xf32>
      %c0_185 = arith.constant 0 : index
      %c0_186 = arith.constant 0 : index
      %288 = vector.load %arg21[%c0_185, %c0_186] : memref<8x1xf32, #tpu.memory_space<vmem>>, vector<8x1xf32>
      tpu.vector_store %arg21[%c0_185, %c0_186], %287 {strides = array<i32>} : memref<8x1xf32, #tpu.memory_space<vmem>>, vector<8x1xf32>,
      %c0_187 = arith.constant 0 : index
      %c0_188 = arith.constant 0 : index
      %289 = vector.load %arg22[%c0_187, %c0_188] : memref<8x8xf32, #tpu.memory_space<vmem>>, vector<8x8xf32>
      %290 = arith.truncf %282 : vector<8x8xf32> to vector<8x8xbf16>
      %c1 = arith.constant 1 : index
      %c0_189 = arith.constant 0 : index
      %c24_190 = arith.constant 24 : index
      %291 = vector.load %arg18[%c1, %c0_189, %c24_190] : memref<2x8x32xbf16, #tpu.memory_space<vmem>>, vector<1x8x8xbf16>
      %292 = vector.shape_cast %291 : vector<1x8x8xbf16> to vector<8x8xbf16>
      %cst_191 = arith.constant dense<0.000000e+00> : vector<8x8xf32>
      %293 = tpu.matmul %290, %292, %cst_191 {dimension_numbers = #tpu.dot_dimension_numbers<[1], [0], [0], [1], [0, 0, 1, 1], [], []>} : vector<8x8xbf16>, vector<8x8xbf16>, vector<8x8xf32> -> vector<8x8xf32>
      %294 = arith.addf %289, %293 : vector<8x8xf32>
      %c0_192 = arith.constant 0 : index
      %c0_193 = arith.constant 0 : index
      %295 = vector.load %arg22[%c0_192, %c0_193] : memref<8x8xf32, #tpu.memory_space<vmem>>, vector<8x8xf32>
      tpu.vector_store %arg22[%c0_192, %c0_193], %294 {strides = array<i32>} : memref<8x8xf32, #tpu.memory_space<vmem>>, vector<8x8xf32>,
    } else {
    }
    %c0_129 = arith.constant 0 : index
    %c0_130 = arith.constant 0 : index
    %197 = vector.load %arg21[%c0_129, %c0_130] : memref<8x1xf32, #tpu.memory_space<vmem>>, vector<8x1xf32>
    %198 = tpu.reciprocal %197 {approx = true} : vector<8x1xf32> -> vector<8x1xf32>
    %199 = arith.mulf %197, %198 : vector<8x1xf32>
    %cst_131 = arith.constant 2.000000e+00 : f32
    %200 = vector.broadcast %cst_131 : f32 to vector<8x1xf32>
    %201 = arith.subf %200, %199 : vector<8x1xf32>
    %202 = arith.mulf %198, %201 : vector<8x1xf32>
    %c0_132 = arith.constant 0 : index
    %c0_133 = arith.constant 0 : index
    %203 = vector.load %arg22[%c0_132, %c0_133] : memref<8x8xf32, #tpu.memory_space<vmem>>, vector<8x8xf32>
    %204 = vector.broadcast %202 : vector<8x1xf32> to vector<8x8xf32>
    %205 = arith.mulf %203, %204 : vector<8x8xf32>
    %206 = arith.truncf %205 : vector<8x8xf32> to vector<8x8xbf16>
    %c0_134 = arith.constant 0 : index
    %c24 = arith.constant 24 : index
    %207 = vector.load %arg23[%c0_134, %c24] : memref<8x32xbf16, #tpu.memory_space<vmem>>, vector<8x8xbf16>
    tpu.vector_store %arg23[%c0_134, %c24], %206 {strides = array<i32>} : memref<8x32xbf16, #tpu.memory_space<vmem>>, vector<8x8xbf16>,
    %c0_i32_135 = arith.constant 0 : i32
    %208 = arith.cmpi sge, %arg1, %c0_i32_135 : i32
    %209 = arith.extui %208 : i1 to i32
    %c0_i32_136 = arith.constant 0 : i32
    %210 = arith.cmpi ne, %209, %c0_i32_136 : i32
    scf.if %210 {
      %c0_176 = arith.constant 0 : index
      %c0_177 = arith.constant 0 : index
      %278 = vector.load %arg19[%c0_176, %c0_177] : memref<8x16xf32, #tpu.memory_space<vmem>>, vector<8x8xf32>
      %279 = vector.broadcast %202 : vector<8x1xf32> to vector<8x8xf32>
      %280 = arith.mulf %278, %279 : vector<8x8xf32>
      %281 = arith.truncf %280 : vector<8x8xf32> to vector<8x8xbf16>
      %c0_178 = arith.constant 0 : index
      %c3 = arith.constant 3 : index
      %c0_179 = arith.constant 0 : index
      %c0_180 = arith.constant 0 : index
      %282 = vector.load %arg16[%c0_178, %c3, %c0_179, %c0_180] : memref<1x4x8x16xbf16, #tpu.memory_space<vmem>>, vector<1x1x8x8xbf16>
      %283 = vector.shape_cast %282 : vector<1x1x8x8xbf16> to vector<8x8xbf16>
      %284 = vector.shape_cast %281 : vector<8x8xbf16> to vector<1x1x8x8xbf16>
      tpu.vector_store %arg16[%c0_178, %c3, %c0_179, %c0_180], %284 {strides = array<i32>} : memref<1x4x8x16xbf16, #tpu.memory_space<vmem>>, vector<1x1x8x8xbf16>,
    } else {
    }
    %c0_i32_137 = arith.constant 0 : i32
    %211 = arith.cmpi slt, %arg1, %c0_i32_137 : i32
    %212 = arith.extui %211 : i1 to i32
    %c0_i32_138 = arith.constant 0 : i32
    %213 = arith.cmpi ne, %212, %c0_i32_138 : i32
    scf.if %213 {
      %c0_176 = arith.constant 0 : index
      %c3 = arith.constant 3 : index
      %c0_177 = arith.constant 0 : index
      %c0_178 = arith.constant 0 : index
      %278 = vector.load %arg16[%c0_176, %c3, %c0_177, %c0_178] : memref<1x4x8x16xbf16, #tpu.memory_space<vmem>>, vector<1x1x8x8xbf16>
      %279 = vector.shape_cast %278 : vector<1x1x8x8xbf16> to vector<8x8xbf16>
      %280 = vector.shape_cast %51 : vector<8x8xbf16> to vector<1x1x8x8xbf16>
      tpu.vector_store %arg16[%c0_176, %c3, %c0_177, %c0_178], %280 {strides = array<i32>} : memref<1x4x8x16xbf16, #tpu.memory_space<vmem>>, vector<1x1x8x8xbf16>,
    } else {
    }
    %c1_i32_139 = arith.constant 1 : i32
    %214 = arith.cmpi sge, %arg1, %c1_i32_139 : i32
    %215 = arith.extui %214 : i1 to i32
    %c0_i32_140 = arith.constant 0 : i32
    %216 = arith.cmpi ne, %215, %c0_i32_140 : i32
    scf.if %216 {
      %c0_176 = arith.constant 0 : index
      %c8_177 = arith.constant 8 : index
      %278 = vector.load %arg19[%c0_176, %c8_177] : memref<8x16xf32, #tpu.memory_space<vmem>>, vector<8x8xf32>
      %279 = vector.broadcast %202 : vector<8x1xf32> to vector<8x8xf32>
      %280 = arith.mulf %278, %279 : vector<8x8xf32>
      %281 = arith.truncf %280 : vector<8x8xf32> to vector<8x8xbf16>
      %c0_178 = arith.constant 0 : index
      %c3 = arith.constant 3 : index
      %c0_179 = arith.constant 0 : index
      %c8_180 = arith.constant 8 : index
      %282 = vector.load %arg16[%c0_178, %c3, %c0_179, %c8_180] : memref<1x4x8x16xbf16, #tpu.memory_space<vmem>>, vector<1x1x8x8xbf16>
      %283 = vector.shape_cast %282 : vector<1x1x8x8xbf16> to vector<8x8xbf16>
      %284 = vector.shape_cast %281 : vector<8x8xbf16> to vector<1x1x8x8xbf16>
      tpu.vector_store %arg16[%c0_178, %c3, %c0_179, %c8_180], %284 {strides = array<i32>} : memref<1x4x8x16xbf16, #tpu.memory_space<vmem>>, vector<1x1x8x8xbf16>,
    } else {
    }
    %c1_i32_141 = arith.constant 1 : i32
    %217 = arith.cmpi slt, %arg1, %c1_i32_141 : i32
    %218 = arith.extui %217 : i1 to i32
    %c0_i32_142 = arith.constant 0 : i32
    %219 = arith.cmpi ne, %218, %c0_i32_142 : i32
    scf.if %219 {
      %c0_176 = arith.constant 0 : index
      %c3 = arith.constant 3 : index
      %c0_177 = arith.constant 0 : index
      %c8_178 = arith.constant 8 : index
      %278 = vector.load %arg16[%c0_176, %c3, %c0_177, %c8_178] : memref<1x4x8x16xbf16, #tpu.memory_space<vmem>>, vector<1x1x8x8xbf16>
      %279 = vector.shape_cast %278 : vector<1x1x8x8xbf16> to vector<8x8xbf16>
      %280 = vector.shape_cast %51 : vector<8x8xbf16> to vector<1x1x8x8xbf16>
      tpu.vector_store %arg16[%c0_176, %c3, %c0_177, %c8_178], %280 {strides = array<i32>} : memref<1x4x8x16xbf16, #tpu.memory_space<vmem>>, vector<1x1x8x8xbf16>,
    } else {
    }
    %c0_143 = arith.constant 0 : index
    %c0_144 = arith.constant 0 : index
    %220 = vector.load %arg23[%c0_143, %c0_144] : memref<8x32xbf16, #tpu.memory_space<vmem>>, vector<8x32xbf16>
    %c0_145 = arith.constant 0 : index
    %c0_146 = arith.constant 0 : index
    %221 = vector.load %arg5[%c0_145, %c0_146] : memref<32x32xbf16, #tpu.memory_space<vmem>>, vector<32x32xbf16>
    %cst_147 = arith.constant dense<0.000000e+00> : vector<8x32xf32>
    %222 = tpu.matmul %220, %221, %cst_147 {dimension_numbers = #tpu.dot_dimension_numbers<[1], [0], [0], [1], [0, 0, 1, 1], [], []>} : vector<8x32xbf16>, vector<32x32xbf16>, vector<8x32xf32> -> vector<8x32xf32>
    %c0_148 = arith.constant 0 : index
    %c0_149 = arith.constant 0 : index
    %223 = vector.load %arg6[%c0_148, %c0_149] : memref<1x32xf32, #tpu.memory_space<vmem>>, vector<1x32xf32>
    %224 = vector.broadcast %223 : vector<1x32xf32> to vector<8x32xf32>
    %225 = arith.addf %222, %224 : vector<8x32xf32>
    %c0_150 = arith.constant 0 : index
    %c0_151 = arith.constant 0 : index
    %226 = vector.load %arg9[%c0_150, %c0_151] : memref<1x32xf32, #tpu.memory_space<vmem>>, vector<1x32xf32>
    %c0_152 = arith.constant 0 : index
    %c0_153 = arith.constant 0 : index
    %227 = vector.load %arg10[%c0_152, %c0_153] : memref<1x32xf32, #tpu.memory_space<vmem>>, vector<1x32xf32>
    %cst_154 = arith.constant dense<0.000000e+00> : vector<8xf32>
    %228 = vector.multi_reduction <add>, %225, %cst_154 [1] : vector<8x32xf32> to vector<8xf32>
    %229 = vector.shape_cast %228 : vector<8xf32> to vector<8x1xf32>
    %cst_155 = arith.constant 3.200000e+01 : f32
    %230 = vector.broadcast %cst_155 : f32 to vector<8x1xf32>
    %231 = arith.divf %229, %230 : vector<8x1xf32>
    %232 = vector.broadcast %231 : vector<8x1xf32> to vector<8x32xf32>
    %233 = arith.subf %225, %232 : vector<8x32xf32>
    %234 = arith.mulf %233, %233 : vector<8x32xf32>
    %cst_156 = arith.constant dense<0.000000e+00> : vector<8xf32>
    %235 = vector.multi_reduction <add>, %234, %cst_156 [1] : vector<8x32xf32> to vector<8xf32>
    %236 = vector.shape_cast %235 : vector<8xf32> to vector<8x1xf32>
    %cst_157 = arith.constant 3.200000e+01 : f32
    %237 = vector.broadcast %cst_157 : f32 to vector<8x1xf32>
    %238 = arith.divf %236, %237 : vector<8x1xf32>
    %239 = vector.broadcast %231 : vector<8x1xf32> to vector<8x32xf32>
    %240 = arith.subf %225, %239 : vector<8x32xf32>
    %cst_158 = arith.constant 9.99999974E-6 : f32
    %241 = vector.broadcast %cst_158 : f32 to vector<8x1xf32>
    %242 = arith.addf %238, %241 : vector<8x1xf32>
    %243 = math.rsqrt %242 : vector<8x1xf32>
    %244 = vector.broadcast %243 : vector<8x1xf32> to vector<8x32xf32>
    %245 = arith.mulf %240, %244 : vector<8x32xf32>
    %246 = vector.broadcast %226 : vector<1x32xf32> to vector<8x32xf32>
    %247 = arith.mulf %245, %246 : vector<8x32xf32>
    %248 = vector.broadcast %227 : vector<1x32xf32> to vector<8x32xf32>
    %249 = arith.addf %247, %248 : vector<8x32xf32>
    %250 = arith.truncf %249 : vector<8x32xf32> to vector<8x32xbf16>
    %c0_159 = arith.constant 0 : index
    %c0_160 = arith.constant 0 : index
    %251 = vector.load %arg11[%c0_159, %c0_160] : memref<32x64xbf16, #tpu.memory_space<vmem>>, vector<32x64xbf16>
    %cst_161 = arith.constant dense<0.000000e+00> : vector<8x64xf32>
    %252 = tpu.matmul %250, %251, %cst_161 {dimension_numbers = #tpu.dot_dimension_numbers<[1], [0], [0], [1], [0, 0, 1, 1], [], []>} : vector<8x32xbf16>, vector<32x64xbf16>, vector<8x64xf32> -> vector<8x64xf32>
    %c0_162 = arith.constant 0 : index
    %c0_163 = arith.constant 0 : index
    %253 = vector.load %arg12[%c0_162, %c0_163] : memref<1x64xf32, #tpu.memory_space<vmem>>, vector<1x64xf32>
    %254 = vector.broadcast %253 : vector<1x64xf32> to vector<8x64xf32>
    %255 = arith.addf %252, %254 : vector<8x64xf32>
    %256 = arith.mulf %255, %255 : vector<8x64xf32>
    %257 = arith.mulf %255, %256 : vector<8x64xf32>
    %cst_164 = arith.constant 4.471500e-02 : f32
    %258 = vector.broadcast %cst_164 : f32 to vector<8x64xf32>
    %259 = arith.mulf %258, %257 : vector<8x64xf32>
    %260 = arith.addf %255, %259 : vector<8x64xf32>
    %cst_165 = arith.constant 0.797884583 : f32
    %261 = vector.broadcast %cst_165 : f32 to vector<8x64xf32>
    %262 = arith.mulf %261, %260 : vector<8x64xf32>
    %263 = math.tanh %262 : vector<8x64xf32>
    %cst_166 = arith.constant 1.000000e+00 : f32
    %264 = vector.broadcast %cst_166 : f32 to vector<8x64xf32>
    %265 = arith.addf %264, %263 : vector<8x64xf32>
    %cst_167 = arith.constant 5.000000e-01 : f32
    %266 = vector.broadcast %cst_167 : f32 to vector<8x64xf32>
    %267 = arith.mulf %266, %265 : vector<8x64xf32>
    %268 = arith.mulf %255, %267 : vector<8x64xf32>
    %269 = arith.truncf %268 : vector<8x64xf32> to vector<8x64xbf16>
    %c0_168 = arith.constant 0 : index
    %c0_169 = arith.constant 0 : index
    %270 = vector.load %arg13[%c0_168, %c0_169] : memref<64x32xbf16, #tpu.memory_space<vmem>>, vector<64x32xbf16>
    %cst_170 = arith.constant dense<0.000000e+00> : vector<8x32xf32>
    %271 = tpu.matmul %269, %270, %cst_170 {dimension_numbers = #tpu.dot_dimension_numbers<[1], [0], [0], [1], [0, 0, 1, 1], [], []>} : vector<8x64xbf16>, vector<64x32xbf16>, vector<8x32xf32> -> vector<8x32xf32>
    %c0_171 = arith.constant 0 : index
    %c0_172 = arith.constant 0 : index
    %272 = vector.load %arg14[%c0_171, %c0_172] : memref<1x32xf32, #tpu.memory_space<vmem>>, vector<1x32xf32>
    %273 = vector.broadcast %272 : vector<1x32xf32> to vector<8x32xf32>
    %274 = arith.addf %271, %273 : vector<8x32xf32>
    %c0_173 = arith.constant 0 : index
    %c0_174 = arith.constant 0 : index
    %c0_175 = arith.constant 0 : index
    %275 = vector.load %arg15[%c0_173, %c0_174, %c0_175] : memref<1x8x32xf32, #tpu.memory_space<vmem>>, vector<1x8x32xf32>
    %276 = vector.shape_cast %275 : vector<1x8x32xf32> to vector<8x32xf32>
    %277 = vector.shape_cast %274 : vector<8x32xf32> to vector<1x8x32xf32>
    tpu.vector_store %arg15[%c0_173, %c0_174, %c0_175], %277 {strides = array<i32>} : memref<1x8x32xf32, #tpu.memory_space<vmem>>, vector<1x8x32xf32>,
    return
  }
  func.func @transform_0(%arg0: i32, %arg1: i32) -> (i32, i32, i32) {
    %c0_i32 = arith.constant 0 : i32
    %c0_i32_0 = arith.constant 0 : i32
    return %arg0, %arg1, %c0_i32 : i32, i32, i32
  }
  func.func @transform_1(%arg0: i32, %arg1: i32) -> (i32, i32) {
    %c0_i32 = arith.constant 0 : i32
    %c0_i32_0 = arith.constant 0 : i32
    %c0_i32_1 = arith.constant 0 : i32
    return %c0_i32, %c0_i32_0 : i32, i32
  }
  func.func @transform_2(%arg0: i32, %arg1: i32) -> (i32, i32) {
    %c0_i32 = arith.constant 0 : i32
    %c0_i32_0 = arith.constant 0 : i32
    %c0_i32_1 = arith.constant 0 : i32
    return %c0_i32, %c0_i32_0 : i32, i32
  }
  func.func @transform_3(%arg0: i32, %arg1: i32) -> (i32, i32) {
    %c0_i32 = arith.constant 0 : i32
    %c0_i32_0 = arith.constant 0 : i32
    %c0_i32_1 = arith.constant 0 : i32
    return %c0_i32, %c0_i32_0 : i32, i32
  }
  func.func @transform_4(%arg0: i32, %arg1: i32) -> (i32, i32) {
    %c0_i32 = arith.constant 0 : i32
    %c0_i32_0 = arith.constant 0 : i32
    %c0_i32_1 = arith.constant 0 : i32
    return %c0_i32, %c0_i32_0 : i32, i32
  }
  func.func @transform_5(%arg0: i32, %arg1: i32) -> (i32, i32) {
    %c0_i32 = arith.constant 0 : i32
    %c0_i32_0 = arith.constant 0 : i32
    %c0_i32_1 = arith.constant 0 : i32
    return %c0_i32, %c0_i32_0 : i32, i32
  }
  func.func @transform_6(%arg0: i32, %arg1: i32) -> (i32, i32) {
    %c0_i32 = arith.constant 0 : i32
    %c0_i32_0 = arith.constant 0 : i32
    %c0_i32_1 = arith.constant 0 : i32
    return %c0_i32, %c0_i32_0 : i32, i32
  }
  func.func @transform_7(%arg0: i32, %arg1: i32) -> (i32, i32) {
    %c0_i32 = arith.constant 0 : i32
    %c0_i32_0 = arith.constant 0 : i32
    %c0_i32_1 = arith.constant 0 : i32
    return %c0_i32, %c0_i32_0 : i32, i32
  }
  func.func @transform_8(%arg0: i32, %arg1: i32) -> (i32, i32) {
    %c0_i32 = arith.constant 0 : i32
    %c0_i32_0 = arith.constant 0 : i32
    %c0_i32_1 = arith.constant 0 : i32
    return %c0_i32, %c0_i32_0 : i32, i32
  }
  func.func @transform_9(%arg0: i32, %arg1: i32) -> (i32, i32) {
    %c0_i32 = arith.constant 0 : i32
    %c0_i32_0 = arith.constant 0 : i32
    %c0_i32_1 = arith.constant 0 : i32
    return %c0_i32, %c0_i32_0 : i32, i32
  }
  func.func @transform_10(%arg0: i32, %arg1: i32) -> (i32, i32) {
    %c0_i32 = arith.constant 0 : i32
    %c0_i32_0 = arith.constant 0 : i32
    %c0_i32_1 = arith.constant 0 : i32
    return %c0_i32, %c0_i32_0 : i32, i32
  }
  func.func @transform_11(%arg0: i32, %arg1: i32) -> (i32, i32) {
    %c0_i32 = arith.constant 0 : i32
    %c0_i32_0 = arith.constant 0 : i32
    %c0_i32_1 = arith.constant 0 : i32
    return %c0_i32, %c0_i32_0 : i32, i32
  }
  func.func @transform_12(%arg0: i32, %arg1: i32) -> (i32, i32) {
    %c0_i32 = arith.constant 0 : i32
    %c0_i32_0 = arith.constant 0 : i32
    %c0_i32_1 = arith.constant 0 : i32
    return %c0_i32, %c0_i32_0 : i32, i32
  }
  func.func @transform_13(%arg0: i32, %arg1: i32) -> (i32, i32, i32) {
    %c0_i32 = arith.constant 0 : i32
    %c0_i32_0 = arith.constant 0 : i32
    return %arg0, %arg1, %c0_i32 : i32, i32, i32
  }
  func.func @transform_14(%arg0: i32, %arg1: i32) -> (i32, i32, i32, i32) {
    %c0_i32 = arith.constant 0 : i32
    %c0_i32_0 = arith.constant 0 : i32
    %c0_i32_1 = arith.constant 0 : i32
    return %arg0, %c0_i32, %arg1, %c0_i32_0 : i32, i32, i32, i32
  }
}

</mosaic_0001>

<bundles_post_ra>
// kernel: tpu_custom_call.1
= control target key start
LH: loop header
LB: loop body
LE: loop exit
PB: predicated region body
PF: predicated region fallthrough
CT: control target
= control target key end

     0   :  { %s4093_s0 = inlined_call_operand.vmem [shape: f32[2,16,32], index: 0, kind: input, shape index: {}]   ;;  %s4094_s1 = inlined_call_operand.vmem [shape: bf16[32,96], index: 1, kind: input, shape index: {}]   ;;  %s4095_s2 = inlined_call_operand.vmem [shape: f32[1,96], index: 2, kind: input, shape index: {}]   ;;  %s4096_s3 = inlined_call_operand.hbm [shape: bf16[32,32], index: 3, kind: input, shape index: {}]   ;;  %s4097_s4 = inlined_call_operand.vmem [shape: f32[1,32], index: 4, kind: input, shape index: {}]   ;;  %s4098_s5 = inlined_call_operand.vmem [shape: f32[1,32], index: 5, kind: input, shape index: {}]   ;;  %s4099_s6 = inlined_call_operand.vmem [shape: f32[1,32], index: 6, kind: input, shape index: {}]   ;;  %s4100_s7 = inlined_call_operand.hbm [shape: f32[1,32], index: 7, kind: input, shape index: {}]   ;;  %s4101_s8 = inlined_call_operand.hbm [shape: f32[1,32], index: 8, kind: input, shape index: {}]   ;;  %s4102_s9 = inlined_call_operand.hbm [shape: bf16[32,64], index: 9, kind: input, shape index: {}]   ;;  %s4103_s10 = inlined_call_operand.hbm [shape: f32[1,64], index: 10, kind: input, shape index: {}]   ;;  %s4104_s11 = inlined_call_operand.vmem [shape: bf16[64,32], index: 11, kind: input, shape index: {}]   ;;  %s4105_s12 = inlined_call_operand.vmem [shape: f32[1,32], index: 12, kind: input, shape index: {}]   ;;  %s4106_s13 = inlined_call_operand.hbm [shape: f32[2,16,32], index: 13, kind: output, shape index: {0}]   ;;  %s4107_s14 = inlined_call_operand.hbm [shape: bf16[2,4,16,16], index: 14, kind: output, shape index: {1}]  }
   0x1   :  { %4121 = sst [smem:[#allocation35_spill]] %s4093_s0 }
   0x2   :  { %4122 = sst [smem:[#allocation36_spill]] %s4094_s1 }
   0x3   :  { %4123 = sst [smem:[#allocation37_spill]] %s4095_s2 }
   0x4   :  { %4124 = sst [smem:[#allocation38_spill]] %s4096_s3 }
   0x5   :  { %4125 = sst [smem:[#allocation39_spill]] %s4100_s7 }
   0x6   :  { %4126 = sst [smem:[#allocation40_spill]] %s4105_s12 }
   0x7   :  { %4127 = sst [smem:[#allocation41_spill]] %s4106_s13 }
   0x8   :  { %20 = vsyncpa [#allocation10], 0 }
   0x9   :  { %21 = vsyncpa [#allocation13], 0 }
   0xa   :  { %22 = vsyncpa [#allocation16], 0 }
   0xb   :  { %23 = vsyncpa [#allocation11], 0 }
   0xc   :  { %25 = vsyncpa [#allocation11 + $0x1], 0 }
   0xd   :  { %26 = vsyncpa [#allocation20], 0 }
   0xe   :  { %28 = vsyncpa [#allocation20 + $0x1], 0  ;;  %s3549_s29 = smov 0   ;;  %s3551_s30 = smov 0  }
   0xf   :  { %s3553_s15 = smov 0   ;;  %s3555_s16 = smov 0  }
  0x10   :  { %s3557_s17 = smov 0   ;;  %s3559_s18 = smov 0  }
  0x11   :  { %s3561_s19 = smov 0   ;;  %s3563_s20 = smov 0  }
  0x12 LB: > { %4128 = sst [smem:[#allocation26_spill]] %s3357_s29  ;;  %s2540_s21 = sadd.s32 4294967295, %s3385_s20   ;;  %s3385_s20 = sphi %s3563_s20, %s34_s20   ;;  %s3381_s19 = sphi %s3561_s19, %s4161_s19   ;;  %s3377_s18 = sphi %s3559_s18, %s4160_s18   ;;  %s3373_s17 = sphi %s3557_s17, %s4159_s17   ;;  %s3369_s16 = sphi %s3555_s16, %s4158_s16   ;;  %s3365_s15 = sphi %s3553_s15, %s4157_s15   ;;  %s3361_s30 = sphi %s3551_s30, %s4163_s30   ;;  %s3357_s29 = sphi %s3549_s29, %s4162_s29  }
  0x13   : > { %4129 = sst [smem:[#allocation27_spill]] %s3365_s15  ;;  %s2541_s22 = sadd.s32 4294967294, %s3385_s20  }
  0x14   : > { %4130 = sst [smem:[#allocation28_spill]] %s3377_s18  ;;  %s43_s23 = sadd.s32 1, %s3377_s18 }
  0x15   : > { %4131 = sst [smem:[#allocation29_spill]] %s3381_s19  ;;  %s46_s24 = sadd.s32 1, %s3381_s19 }
  0x16   : > { %4132 = sst [smem:[#allocation30_spill]] %s3385_s20  ;;  %p44_p0 = scmp.ge.s32.totalorder %s43_s23, 2 }
  0x17   : > { %s335_s25 = sadd.s32 1, %s3365_s15  ;;  %p345_p1 = scmp.ne.s32.totalorder %s3365_s15, %s3361_s30 }
  0x18   : > { %p346_p2 = scmp.eq.s32.totalorder %s2540_s21, 3  ;;  %s4165_s23 = smov (%p44_p0, %s43_s23), 0 }
  0x19   : > { %4133 = sst [smem:[#allocation31_spill]] %s4165_s23  ;;  %s4167_s24 = smov (!%p44_p0, %s46_s24), %s3381_s19 }
  0x1a   : > { %s331_s26 = ssub.s32 %s3377_s18, %s4165_s23  ;;  %p3601_p3 = por %p346_p2, %p345_p1 }
  0x1b   : > { %p48_p4 = scmp.ge.s32.totalorder %s4167_s24, 2  ;;  %p351_p5 = scmp.ne.s32.totalorder %s3361_s30, %s3357_s29 }
  0x1c   : > { %s4134_s27 = scalar_select %p3601_p3, 1, 0 }
  0x1d   : > { %p352_p6 = scmp.eq.s32.totalorder %s2541_s22, 3  ;;  %p2542_p7 = scmp.ge.s32.totalorder %s3385_s20, 1 }
  0x1e   : > { %s4169_s24 = smov (%p48_p4, %s4167_s24), 0  ;;  %p387_p9 = scmp.lt.s32.totalorder %s3385_s20, 5 }
  0x1f   : > { %4135 = sst [smem:[#allocation32_spill]] %s4169_s24  ;;  %p3610_p8 = por %p352_p6, %p351_p5 }
  0x20   : > { %s330_s13 = ssub.s32 %s3381_s19, %s4169_s24  ;;  %p3617_p10 = pnand %p2542_p7, %p387_p9 }
  0x21   : > { %s4136_s28 = scalar_select %p3610_p8, 1, 0 }
  0x22   : > { %s332_s12 = sor.u32 %s331_s26, %s330_s13  ;;  %p3621_p12 = scmp.eq.s32.totalorder %s2540_s21, 0 }
  0x23   : > { %4137 = sst [smem:[#allocation33_spill]] %s4136_s28  ;;  %p333_p11 = scmp.eq.s32.totalorder %s332_s12, 0 }
  0x24   : > { %s4139_s18 = scalar_select %p3621_p12, 1, 0 }
  0x25   : > { %p2874_p13 = pneg %p3617_p10  ;;  %s3387_s13 = smov [#allocation12]  }
  0x26   : > { %s3628_s22 = scalar_select %p333_p11, %s3365_s15, %s335_s25  }
  0x27   : > { %p3632_p0 = pnand %p3621_p12, %p2874_p13  ;;  %s428_s26 = sshll.u32 %s3387_s13, 4  ;;  %s429_s26 = int_to_ptr.vmem [resolvable:$true] %s428_s26 }
  0x28   : > { %4140 = sst [smem:[#allocation34_spill]] %s3628_s22  ;;  %s3132_s21 = scalar_lea.vmem %s429_s26, 16 }
  0x29   : > { %p3638_p1 = pneg %p3632_p0  ;;  %p3133_p2 = scmp.ne.s32.totalorder %s429_s26, %s3132_s21 }
  0x2a   : > { %s3139_s25 = scalar_lea.vmem %s429_s26, 32  ;;  %p3140_p6 = scmp.lt.s32.totalorder %s429_s26, %s429_s26 }
  0x2b   : > { %p3135_p4 = pnand %p3133_p2, %p3638_p1  ;;  %p3141_p7 = scmp.lt.s32.totalorder %s3139_s25, %s3132_s21 }
  0x2d   : > { %p3136_p5 = pneg %p3135_p4  ;;  %p3142_p9 = por %p3141_p7, %p3140_p6 }
  0x2f   : > { %p3143_p11 = pnand %p3142_p9, %p3136_p5 }
  0x31   : > { %3146 = shalt.err (!%p3143_p11)
}
  0x32   : > { %s4143_s7 = sld [smem:[#allocation39_spill]]  ;;  %s3388_s19 = smov [#allocation15]  }
  0x33   : > { %s449_s22 = sshll.u32 %s3388_s19, 4  ;;  %s450_s22 = int_to_ptr.vmem [resolvable:$true] %s449_s22 }
  0x34   : > { %s3158_s15 = scalar_lea.vmem %s450_s22, 256  ;;  %p3166_p8 = scmp.lt.s32.totalorder %s450_s22, %s450_s22 }
  0x35   : > { %p3159_p13 = scmp.ne.s32.totalorder %s450_s22, %s3158_s15  ;;  %p3167_p3 = scmp.lt.s32.totalorder %s3158_s15, %s3158_s15 }
  0x37   : > { %p3161_p2 = pnand %p3159_p13, %p3638_p1  ;;  %p3168_p6 = por %p3167_p3, %p3166_p8 }
  0x38   : > { %2880 = dma.hbm_to_vmem [thread:$0]  (!%p3632_p0), %s4143_s7, 16, %s429_s26, [#allocation13]  }
  0x39   : > { %p3162_p4 = pneg %p3161_p2 }
  0x3b   : > { %p3169_p5 = pnand %p3168_p6, %p3162_p4 }
  0x3d   : > { %3172 = shalt.err (!%p3169_p5)
}
  0x3e   : > { %s3389_s21 = smov 64   ;;  %s3390_s25 = smov 4  }
  0x3f   : > { %2886 = dma.hbm_to_vmem [thread:$0]  (!%p3632_p0), %s4102_s9, 256, %s450_s22, [#allocation16], %s3389_s21, %s3389_s21, %s3390_s25  }
  0x40   : > { %s3391_s19 = smov [#allocation9]   ;;  %s3392_s7 = smov [#allocation14]  }
  0x41   : > { %s405_s13 = sshll.u32 %s3391_s19, 4  ;;  %s439_s29 = sshll.u32 %s3392_s7, 4  ;;  %s406_s13 = int_to_ptr.vmem [resolvable:$true] %s405_s13  ;;  %s440_s29 = int_to_ptr.vmem [resolvable:$true] %s439_s29 }
  0x42   : > { %s3184_s20 = scalar_lea.vmem %s406_s13, 256  ;;  %p3192_p9 = scmp.lt.s32.totalorder %s406_s13, %s406_s13 }
  0x43   : > { %p3185_p7 = scmp.ne.s32.totalorder %s406_s13, %s3184_s20  ;;  %p3193_p11 = scmp.lt.s32.totalorder %s3184_s20, %s3184_s20 }
  0x45   : > { %p3187_p3 = pnand %p3185_p7, %p3638_p1  ;;  %p3194_p13 = por %p3193_p11, %p3192_p9 }
  0x47   : > { %p3188_p8 = pneg %p3187_p3 }
  0x49   : > { %p3195_p2 = pnand %p3194_p13, %p3188_p8 }
  0x4b   : > { %3198 = shalt.err (!%p3195_p2)
}
  0x4c   : > { %s4144_s3 = sld [smem:[#allocation38_spill]]  ;;  %s3210_s22 = scalar_lea.vmem %s440_s29, 16 }
  0x4d   : > { %p3211_p4 = scmp.ne.s32.totalorder %s440_s29, %s3210_s22  ;;  %s3217_s7 = scalar_lea.vmem %s440_s29, 32 }
  0x4e   : > { %p3218_p7 = scmp.lt.s32.totalorder %s440_s29, %s440_s29  ;;  %p3219_p3 = scmp.lt.s32.totalorder %s3217_s7, %s3210_s22 }
  0x4f   : > { %p3213_p6 = pnand %p3211_p4, %p3638_p1 }
  0x50   : > { %p3220_p12 = por %p3219_p3, %p3218_p7 }
  0x51   : > { %p3214_p5 = pneg %p3213_p6 }
  0x52   : > { %2877 = dma.hbm_to_vmem [thread:$0]  (!%p3632_p0), %s4144_s3, 256, %s406_s13, [#allocation10], %s3389_s21, %s3389_s21, %s3390_s25  }
  0x53   : > { %p3221_p9 = pnand %p3220_p12, %p3214_p5 }
  0x55   : > { %3224 = shalt.err (!%p3221_p9)
}
  0x56   : > { %2883 = dma.hbm_to_vmem [thread:$0]  (!%p3632_p0), %s4101_s8, 16, %s440_s29, [#allocation13]  }
  0x57   : > { %s3393_s21 = smov [#allocation17]  }
  0x58   : > { %s463_s25 = sshll.u32 %s3393_s21, 4  ;;  %s464_s25 = int_to_ptr.vmem [resolvable:$true] %s463_s25 }
  0x59   : > { %s3236_s19 = scalar_lea.vmem %s464_s25, 16  ;;  %s3243_s13 = scalar_lea.vmem %s464_s25, 32 }
  0x5a   : > { %p3237_p8 = scmp.ne.s32.totalorder %s464_s25, %s3236_s19  ;;  %p3244_p2 = scmp.lt.s32.totalorder %s464_s25, %s464_s25 }
  0x5b   : > { %p3245_p4 = scmp.lt.s32.totalorder %s3243_s13, %s3236_s19 }
  0x5c   : > { %p3239_p11 = pnand %p3237_p8, %p3638_p1 }
  0x5d   : > { %p3246_p12 = por %p3245_p4, %p3244_p2 }
  0x5e   : > { %p3240_p13 = pneg %p3239_p11 }
  0x60   : > { %p3247_p6 = pnand %p3246_p12, %p3240_p13 }
  0x62   : > { %3250 = shalt.err (!%p3247_p6)
}
  0x63   : > { %2889 = dma.hbm_to_vmem [thread:$0]  (!%p3632_p0), %s4103_s10, 16, %s464_s25, [#allocation16]  }
  0x64   : > { %493 = sbr.rel (%p3617_p10) target bundleno = 9524 (0x2534), region = 72  ;;  %p4145_p5 = scmp.ne.s32.totalorder (!%p3617_p10), %s4139_s18, 0 }
  0x69   : > { %3336 = dma.done.wait (%p4145_p5), [#allocation10], 256  }
  0x6a   : > { %3338 = vsyncadd (%p4145_p5), [#allocation10], 4294967040 }
  0x6b   : > { %3340 = dma.done.wait (%p4145_p5), [#allocation13], 32  }
  0x6c   : > { %3342 = vsyncadd (%p4145_p5), [#allocation13], 4294967264 }
  0x6d   : > { %3344 = dma.done.wait (%p4145_p5), [#allocation16], 272  }
  0x6e   : > { %3346 = vsyncadd (%p4145_p5), [#allocation16], 4294967024  ;;  %vm695_vm0 = vcmask 7168   ;;  %p563_p10 = scmp.lt.s32.totalorder %s3373_s17, 1  ;;  %v3394_v0 = vmov -1e+30   ;;  %v689_v21 = vlaneseq }
  0x6f   : > { %696 = vst.msk [vmem:[#allocation5] sm:$0xff] %vm695_vm0, %v3394_v0  ;;  %p565_p0 = scmp.lt.s32.totalorder %s3369_s16, 1  ;;  %vm575_vm1 = vcmask 261120   ;;  %s4146_s0 = sld [smem:[#allocation35_spill]]  ;;  %v3395_v9 = vmov 0.0   ;;  %vm3396_vm2 = vmmov 0  }
  0x70   : > { %s564_s29 = scalar_select %p563_p10, %s3373_s17, 1  ;;  %2718 = vmatprep.subr.bf16.mxu0 %v3395_v9  ;;  %2722 = vmatprep.mubr.msk.bf16.mxu0 %vm3396_vm2, %v3395_v9  ;;  %v2559_v15 = vld [vmem:[%s4098_s5] ss:$0 sm:$0xff]  ;;  %v690_v22 = vshrl.u32 %v689_v21, 7  ;;  %v3729_v25 = vand.u32 127, %v689_v21  ;;  %vm680_vm3 = vcmask 257024  }
  0x71   : > { %s566_s23 = scalar_select %p565_p0, %s3369_s16, 1  ;;  %v2560_v17 = vld [vmem:[%s4099_s6] ss:$0 sm:$0xff] }
  0x72   : > { %s2557_s28 = sshll.u32 %s564_s29, 1  ;;  %s3705_s26 = sand.u32 1, %s3361_s30  }
  0x73   : > { %s568_s12 = sadd.s32 %s2557_s28, %s566_s23  ;;  %s4147_s1 = sld [smem:[#allocation36_spill]] }
  0x74   : > { %s2558_s18 = sshll.u32 %s568_s12, 3  ;;  %s2555_s19 = sshll.u32 %s3705_s26, 3 }
  0x75   : > { %s570_s20 = scalar_lea.vmem %s4146_s0, %s2558_s18  ;;  %s2556_s13 = sshll.u32 %s3705_s26, 4 }
  0x76   : > { %v572_v1 = vld [vmem:[%s570_s20] sm:$0xff]  ;;  %s2568_s18 = sshll.u32 %s3369_s16, 3  ;;  %s4148_s2 = sld [smem:[#allocation37_spill]] }
  0x77   : > { %v576_v2 = vsel %vm575_vm1, %v572_v1, 0.0  ;;  %v691_v23 = vstv %s2568_s18  ;;  %s3397_s20 = smov 96   ;;  %s3398_s21 = smov 64  }
  0x78   : > { %577 = vadd.xlane.f32.xlu0 %v576_v2  ;;  %v3727_v24 = vadd.s32 %v691_v23, %v690_v22  ;;  %s2566_s25 = sshll.u32 %s3369_s16, 2  ;;  %s3742_s29 = scalar_lea.vmem [#allocation18], %s2555_s19 }
  0x79   : > { %v3057_v8 = vld [vmem:[%s4147_s1 + $0x8] sm:$0xff]   ;;  %v3058_v10 = vld [vmem:[%s4147_s1] sm:$0xff]   ;;  %s679_s15 = scalar_lea.vmem [#allocation2], %s2566_s25  ;;  %s686_s24 = scalar_lea.vmem [#allocation3], %s2566_s25 }
  0x7a   : > { %2719 = vmatpush3.bf16.msra.mxu0 %v3057_v8  ;;  %s3746_s23 = scalar_lea.vmem [#allocation19], %s2556_s13  ;;  %p2569_p1 = scmp.lt.s32.totalorder %s3369_s16, 0 }
  0x7b   : > { %2720 = vmatprep.subr.bf16.mxu0 %v3395_v9 }
  0x7c   : > { %v2561_v26 = vld [vmem:[%s4148_s2] ss:$0 sm:$0xff] }
  0x7e   : > { %2721 = vmatpush3.bf16.msra.mxu0 %v3058_v10 }
 0x101   : > { %v578_v3 = vpop.xlane.xlu0 %577 }
 0x102   : > { %v580_v4 = vmul.f32 0.03125, %v578_v3 }
 0x104   : > { %v581_v5 = vsub.f32 %v572_v1, %v580_v4 }
 0x106   : > { %v582_v6 = vmul.f32 %v581_v5, %v581_v5 }
 0x108   : > { %v583_v7 = vsel %vm575_vm1, %v582_v6, 0.0 }
 0x109   : > { %584 = vadd.xlane.f32.xlu0 %v583_v7 }
 0x192   : > { %v585_v11 = vpop.xlane.xlu0 %584 }
 0x193   : > { %v586_v12 = vmul.f32 0.03125, %v585_v11 }
 0x195   : > { %v587_v13 = vadd.f32 1e-05, %v586_v12 }
 0x197   : > { %3059 = vrsqrt.f32 %v587_v13 }
 0x1a4   : > { %v3060_v14 = vpop.eup %3059 }
 0x1a5   : > { %v589_v16 = vmul.f32 %v3060_v14, %v581_v5 }
 0x1a7   : > { %v596_v18 = vmul.f32 %v2559_v15, %v589_v16 }
 0x1a9   : > { %v603_v19 = vadd.f32 %v2560_v17, %v596_v18 }
 0x1ab   : > { %v604_v20 = vpack.c.bf16 %v603_v19, %v603_v19 }
 0x1ad   : > { %2723 = vmatmul.mubr.msk.bf16.vlgmr.msra.gmra.mxu0 %vm575_vm1, %v604_v20 }
 0x26d   : > { %v665_v27 = vpop.f32.mrf.mxu0 }
 0x26e   : > { %v666_v28 = vadd.f32 %v2561_v26, %v665_v27 }
 0x26f   : > { %v2724_v29 = vpop.f32.mrf.mxu0 }
 0x270   : > { %v3734_v30 = vpack.c.bf16 %v666_v28, %v666_v28 }
 0x271   : > { %v668_v31 = vpop.f32.mrf.mxu0 }
 0x272   : > { %675 = vrot.lane.b32.xlu1 %v3734_v30, %s3397_s20 }
 0x273   : > { %v2725_v32 = vpop.f32.mrf.mxu0 }
 0x276   : > { %682 = vrot.lane.b32.xlu1 %v3734_v30, %s3398_s21 }
 0x2e4   : > { %v676_v33 = vpop.permute.xlu1 %675 }
 0x2e5   : > { %681 = vst.msk [vmem:[%s679_s15] sm:$0xf] %vm680_vm3, %v676_v33  ;;  %700 = sbr.rel (%p2569_p1) target bundleno = 1093 (0x445), region = 96 }
 0x2e8   : > { %v683_v34 = vpop.permute.xlu1 %682 }
 0x2e9   : > { %687 = vst.msk [vmem:[%s686_s24] sm:$0xf] %vm680_vm3, %v683_v34 }
 0x2ea   : > { %vm702_vm4 = vcmask 64512   ;;  %v3399_v36 = vmov 0.0   ;;  %vm3400_vm5 = vmmov 0   ;;  %vm749_vm6 = vcmp.le.s32.totalorder %v3729_v25, %v3727_v24  ;;  %v752_v44 = vld [vmem:[#allocation5] sm:$0xff] }
 0x2eb   : > { %2726 = vmatprep.subr.bf16.mxu0 %v3399_v36  ;;  %2728 = vmatprep.mubr.msk.bf16.mxu0 %vm3400_vm5, %v3399_v36 }
 0x2ec   : > { %v701_v35 = vld [vmem:[#allocation2] sm:$0xf] }
 0x2ed   : > { %v707_v37 = vsel %vm702_vm4, %v701_v35, 0 }
 0x2ee   : > { %2727 = vmatpush3.bf16.xpose.msra.mxu0 %v707_v37 }
 0x2f5   : > { %2729 = vmatmul.mubr.msk.bf16.vlgmr.msra.gmra.mxu0 %vm702_vm4, %v3734_v30 }
 0x3b5   : > { %v743_v38 = vpop.f32.mrf.mxu0 }
 0x3b6   : > { %v750_v39 = vsel %vm749_vm6, %v743_v38, -1e+30 }
 0x3b7   : > { %751 = vst.msk [vmem:[#allocation4] sm:$0xff] %vm702_vm4, %v750_v39  ;;  %v2730_v40 = vpop.f32.mrf.mxu0  ;;  %v753_v41 = vsel %vm702_vm4, %v750_v39, -inf }
 0x3b8   : > { %754 = vmax.xlane.f32.xlu0 %v753_v41 }
 0x3b9   : > { %v746_v42 = vpop.f32.mrf.mxu0 }
 0x3bb   : > { %v2731_v43 = vpop.f32.mrf.mxu0 }
 0x441   : > { %v755_v45 = vpop.xlane.xlu0 %754 }
 0x442   : > { %v756_v46 = vmax.f32 %v752_v44, %v755_v45 }
 0x444   : > { %757 = vst.msk [vmem:[#allocation5] sm:$0xff] %vm695_vm0, %v756_v46 }
 0x445 PF: > { %761 = sbr.rel (%p565_p0) target bundleno = 1445 (0x5a5), region = 100  ;;  %s3403_s19 = smov (!%p565_p0), 8  }
 0x44a   : > { %v763_v47 = vld [vmem:[#allocation2 + $0x4] sm:$0xf]  ;;  %vm764_vm7 = vcmask 64512   ;;  %v3401_v48 = vmov 0.0   ;;  %vm3402_vm8 = vmmov 0   ;;  %v811_v50 = vadd.s32 8, %v3729_v25 }
 0x44b   : > { %2732 = vmatprep.subr.bf16.mxu0 %v3401_v48  ;;  %v769_v49 = vsel %vm764_vm7, %v763_v47, 0  ;;  %2734 = vmatprep.mubr.msk.bf16.mxu0 %vm3402_vm8, %v3401_v48  ;;  %v820_v57 = vld [vmem:[#allocation5] sm:$0xff]  ;;  %vm818_vm10 = vcmask 130112  }
 0x44c   : > { %2733 = vmatpush3.bf16.xpose.msra.mxu0 %v769_v49  ;;  %vm812_vm9 = vcmp.le.s32.totalorder %v811_v50, %v3727_v24 }
 0x453   : > { %2735 = vmatmul.mubr.msk.bf16.vlgmr.msra.gmra.mxu0 %vm764_vm7, %v3734_v30 }
 0x513   : > { %v805_v51 = vpop.f32.mrf.mxu0 }
 0x514   : > { %v813_v52 = vsel %vm812_vm9, %v805_v51, -1e+30 }
 0x515   : > { %v2736_v53 = vpop.f32.mrf.mxu0  ;;  %v821_v54 = vsel %vm764_vm7, %v813_v52, -inf }
 0x516   : > { %822 = vmax.xlane.f32.xlu0 %v821_v54 }
 0x517   : > { %v808_v55 = vpop.f32.mrf.mxu0 }
 0x519   : > { %v2737_v56 = vpop.f32.mrf.mxu0 }
 0x52c   : > { %815 = vrot.lane.b32.xlu0 %v813_v52, %s3403_s19 }
 0x59f   : > { %v823_v58 = vpop.xlane.xlu0 %822 }
 0x5a0   : > { %v824_v59 = vmax.f32 %v820_v57, %v823_v58 }
 0x5a2   : > { %825 = vst.msk [vmem:[#allocation5] sm:$0xff] %vm695_vm0, %v824_v59 }
 0x5a3   : > { %v816_v60 = vpop.permute.xlu0 %815 }
 0x5a4   : > { %819 = vst.msk [vmem:[#allocation4] sm:$0xff] %vm818_vm10, %v816_v60 }
 0x5a5 PF: > { %826 = vst.msk [vmem:[#allocation6] sm:$0xff] %vm695_vm0, %v3395_v9  ;;  %vm827_vm11 = vcmask 64512   ;;  %831 = sbr.rel (%p2569_p1) target bundleno = 1795 (0x703), region = 104 }
 0x5a6   : > { %828 = vst.msk [vmem:[#allocation7] sm:$0xff] %vm827_vm11, %v3395_v9 }
 0x5aa   : > { %v833_v61 = vld [vmem:[#allocation5] sm:$0xff]  ;;  %v3404_v62 = vmov 0   ;;  %v851_v63 = vld [vmem:[#allocation3] sm:$0xf]  ;;  %vm855_vm12 = vcmask 1043456   ;;  %v3405_v1 = vmov 0.0  }
 0x5ab   : > { %3061 = vset.pattern.permute.xlu0 %v3404_v62  ;;  %2738 = vmatprep.subr.bf16.mxu0 %v3405_v1  ;;  %v857_v2 = vsel %vm855_vm12, %v851_v63, 0  ;;  %vm3406_vm13 = vmmov 0   ;;  %v832_v3 = vld [vmem:[#allocation4] sm:$0xff] }
 0x5ac   : > { %836 = vperm.xlu0 %3061, %v833_v61   ;;  %2739 = vmatpush3.bf16.msra.mxu0 %v857_v2  ;;  %v843_v11 = vld [vmem:[#allocation6] sm:$0xff] }
 0x5ad   : > { %2740 = vmatprep.mubr.msk.bf16.mxu0 %vm3406_vm13, %v3405_v1  ;;  %v849_v14 = vld [vmem:[#allocation7] sm:$0xff] }
 0x627   : > { %v837_v4 = vpop.permute.xlu0 %836 }
 0x628   : > { %v839_v5 = vsub.f32 %v832_v3, %v837_v4 }
 0x62a   : > { %v840_v6 = vmul.f32 1.442695, %v839_v5 }
 0x62c   : > { %3062 = vpow2.f32 %v840_v6 }
 0x639   : > { %v3063_v7 = vpop.eup %3062 }
 0x63a   : > { %842 = vst.msk [vmem:[#allocation4] sm:$0xff] %vm827_vm11, %v3063_v7  ;;  %v844_v8 = vsel %vm827_vm11, %v3063_v7, 0.0  ;;  %v850_v10 = vpack.c.bf16 %v3063_v7, %v3063_v7 }
 0x63b   : > { %845 = vadd.xlane.f32.xlu0 %v844_v8 }
 0x63c   : > { %2741 = vmatmul.mubr.msk.bf16.vlgmr.msra.gmra.mxu0 %vm827_vm11, %v850_v10 }
 0x6c4   : > { %v846_v12 = vpop.xlane.xlu0 %845 }
 0x6c5   : > { %v847_v13 = vadd.f32 %v846_v12, %v843_v11 }
 0x6c7   : > { %848 = vst.msk [vmem:[#allocation6] sm:$0xff] %vm695_vm0, %v847_v13 }
 0x6fc   : > { %v893_v15 = vpop.f32.mrf.mxu0 }
 0x6fd   : > { %v899_v16 = vadd.f32 %v893_v15, %v849_v14 }
 0x6fe   : > { %v2742_v17 = vpop.f32.mrf.mxu0 }
 0x6ff   : > { %900 = vst.msk [vmem:[#allocation7] sm:$0xff] %vm827_vm11, %v899_v16 }
 0x700   : > { %v896_v18 = vpop.f32.mrf.mxu0 }
 0x702   : > { %v2743_v19 = vpop.f32.mrf.mxu0 }
 0x703 PF: > { %903 = sbr.rel (%p565_p0) target bundleno = 2260 (0x8d4), region = 108  ;;  %s3410_s13 = smov (!%p565_p0), 120  }
 0x708   : > { %v905_v20 = vld [vmem:[#allocation5] sm:$0xff]  ;;  %v3407_v21 = vmov 0   ;;  %v929_v22 = vld [vmem:[#allocation3 + $0x4] sm:$0xf]  ;;  %vm936_vm14 = vcmask 1043456   ;;  %v3408_v23 = vmov 0.0  }
 0x709   : > { %3064 = vset.pattern.permute.xlu0 %v3407_v21  ;;  %2744 = vmatprep.subr.bf16.mxu0 %v3408_v23  ;;  %v938_v26 = vsel %vm936_vm14, %v929_v22, 0  ;;  %v904_v27 = vld [vmem:[#allocation4] sm:$0xff]  ;;  %vm3409_vm15 = vmmov 0   ;;  %vm914_vm3 = vcmask 130112   ;;  %v916_v37 = vld [vmem:[#allocation6] sm:$0xff]  ;;  %v926_v40 = vld [vmem:[#allocation7] sm:$0xff] }
 0x70a   : > { %908 = vperm.xlu0 %3064, %v905_v20   ;;  %2745 = vmatpush3.bf16.msra.mxu0 %v938_v26 }
 0x70b   : > { %2746 = vmatprep.mubr.msk.bf16.mxu0 %vm3409_vm15, %v3408_v23 }
 0x785   : > { %v909_v28 = vpop.permute.xlu0 %908 }
 0x786   : > { %v911_v29 = vsub.f32 %v904_v27, %v909_v28 }
 0x788   : > { %v912_v31 = vmul.f32 1.442695, %v911_v29 }
 0x78a   : > { %3065 = vpow2.f32 %v912_v31 }
 0x797   : > { %v3066_v32 = vpop.eup %3065 }
 0x798   : > { %915 = vst.msk [vmem:[#allocation4] sm:$0xff] %vm914_vm3, %v3066_v32  ;;  %918 = vrot.lane.b32.xlu1 %v3066_v32, %s3410_s13  ;;  %v927_v33 = vpack.c.bf16 %v3066_v32, %v3066_v32 }
 0x79a   : > { %931 = vrot.lane.b32.xlu0 %v927_v33, %s3410_s13 }
 0x80a   : > { %v919_v34 = vpop.permute.xlu1 %918 }
 0x80b   : > { %v921_v35 = vsel %vm827_vm11, %v919_v34, 0.0 }
 0x80c   : > { %922 = vadd.xlane.f32.xlu1 %v921_v35  ;;  %v932_v36 = vpop.permute.xlu0 %931 }
 0x80d   : > { %2747 = vmatmul.mubr.msk.bf16.vlgmr.msra.gmra.mxu0 %vm827_vm11, %v932_v36 }
 0x895   : > { %v923_v38 = vpop.xlane.xlu1 %922 }
 0x896   : > { %v924_v39 = vadd.f32 %v923_v38, %v916_v37 }
 0x898   : > { %925 = vst.msk [vmem:[#allocation6] sm:$0xff] %vm695_vm0, %v924_v39 }
 0x8cd   : > { %v974_v41 = vpop.f32.mrf.mxu0 }
 0x8ce   : > { %v980_v42 = vadd.f32 %v974_v41, %v926_v40 }
 0x8cf   : > { %v2748_v43 = vpop.f32.mrf.mxu0 }
 0x8d0   : > { %981 = vst.msk [vmem:[#allocation7] sm:$0xff] %vm827_vm11, %v980_v42 }
 0x8d1   : > { %v977_v44 = vpop.f32.mrf.mxu0 }
 0x8d3   : > { %v2749_v45 = vpop.f32.mrf.mxu0 }
 0x8d4 PF: > { %v982_v46 = vld [vmem:[#allocation6] sm:$0xff]  ;;  %v3411_v47 = vmov 0   ;;  %vm995_vm4 = vcmask 60416  }
 0x8d5   : > { %3067 = vset.pattern.permute.xlu0 %v3411_v47  ;;  %3068 = vrcp.f32 %v982_v46 }
 0x8d7   : > { %v987_v52 = vld [vmem:[#allocation7] sm:$0xff] }
 0x8e2   : > { %v3069_v48 = vpop.eup %3068 }
 0x8e3   : > { %v984_v49 = vmul.f32 %v3069_v48, %v982_v46 }
 0x8e5   : > { %v985_v50 = vsub.f32 2.0, %v984_v49 }
 0x8e7   : > { %v986_v51 = vmul.f32 %v3069_v48, %v985_v50 }
 0x8e9   : > { %990 = vperm.xlu0 %3067, %v986_v51  }
 0x964   : > { %v991_v53 = vpop.permute.xlu0 %990 }
 0x965   : > { %v993_v54 = vmul.f32 %v991_v53, %v987_v52  ;;  %999 = sbr.rel (%p2569_p1) target bundleno = 2416 (0x970), region = 112 }
 0x967   : > { %v994_v55 = vpack.c.bf16 %v993_v54, %v993_v54 }
 0x969   : > { %996 = vst.msk [vmem:[#allocation8] sm:$0xf] %vm995_vm4, %v994_v55 }
 0x96a   : > { %v1000_v56 = vld [vmem:[#allocation4] sm:$0xff] }
 0x96b   : > { %v1001_v57 = vmul.f32 %v1000_v56, %v991_v53 }
 0x96d   : > { %v1002_v58 = vpack.c.bf16 %v1001_v57, %v1001_v57 }
 0x96f   : > { %1003 = vst.msk [vmem:[%s3746_s23] sm:$0xf] %vm995_vm4, %v1002_v58 }
 0x970 PF: > { %p2578_p7 = scmp.ge.s32.totalorder %s3369_s16, 0 }
 0x972   : > { %1007 = sbr.rel (%p2578_p7) target bundleno = 2425 (0x979), region = 116 }
 0x977   : > { %v3412_v59 = vmov 0  }
 0x978   : > { %1008 = vst.msk [vmem:[%s3746_s23] sm:$0xf] %vm995_vm4, %v3412_v59 }
 0x979 PF: > { %1011 = sbr.rel (%p565_p0) target bundleno = 2436 (0x984), region = 120 }
 0x97e   : > { %v1012_v60 = vld [vmem:[#allocation4] sm:$0xff]  ;;  %vm1015_vm5 = vcmask 126016  }
 0x97f   : > { %v1013_v61 = vmul.f32 %v1012_v60, %v991_v53 }
 0x981   : > { %v1014_v62 = vpack.c.bf16 %v1013_v61, %v1013_v61 }
 0x983   : > { %1016 = vst.msk [vmem:[%s3746_s23] sm:$0xf] %vm1015_vm5, %v1014_v62 }
 0x984 PF: > { %p2580_p3 = scmp.ge.s32.totalorder %s3369_s16, 1 }
 0x986   : > { %1020 = sbr.rel (%p2580_p3) target bundleno = 2445 (0x98d), region = 124 }
 0x98b   : > { %vm1021_vm6 = vcmask 126016   ;;  %v3413_v63 = vmov 0  }
 0x98c   : > { %1022 = vst.msk [vmem:[%s3746_s23] sm:$0xf] %vm1021_vm6, %v3413_v63 }
 0x98d PF: > { %1023 = vst.msk [vmem:[#allocation5] sm:$0xff] %vm695_vm0, %v3394_v0  ;;  %1026 = sbr.rel (%p2569_p1) target bundleno = 2910 (0xb5e), region = 128  ;;  %s3415_s28 = smov (!%p2569_p1), 120  }
 0x992   : > { %v3070_v1 = vld [vmem:[#allocation2] ss:$0 sps:$4 sm:$0xff]   ;;  %v3414_v2 = vmov 0.0   ;;  %vm3416_vm7 = vmmov 0   ;;  %vm1081_vm8 = vcmp.le.s32.totalorder %v3729_v25, %v3727_v24 }
 0x993   : > { %2750 = vmatprep.subr.bf16.mxu0 %v3414_v2  ;;  %1033 = vrot.lane.b32.xlu0 %v3070_v1, %s3415_s28 }
 0x994   : > { %2752 = vmatprep.mubr.msk.bf16.mxu0 %vm3416_vm7, %v3414_v2  ;;  %v1084_v13 = vld [vmem:[#allocation5] sm:$0xff] }
 0x997   : > { %1028 = vrot.lane.b32.xlu0 %v3734_v30, %s3415_s28 }
 0xa05   : > { %v1034_v3 = vpop.permute.xlu0 %1033 }
 0xa06   : > { %v1039_v4 = vsel %vm827_vm11, %v1034_v3, 0 }
 0xa07   : > { %2751 = vmatpush3.bf16.xpose.msra.mxu0 %v1039_v4 }
 0xa09   : > { %v1029_v5 = vpop.permute.xlu0 %1028 }
 0xa0e   : > { %2753 = vmatmul.mubr.msk.bf16.vlgmr.msra.gmra.mxu0 %vm827_vm11, %v1029_v5 }
 0xace   : > { %v1075_v6 = vpop.f32.mrf.mxu0 }
 0xacf   : > { %v1082_v7 = vsel %vm1081_vm8, %v1075_v6, -1e+30 }
 0xad0   : > { %1083 = vst.msk [vmem:[#allocation4] sm:$0xff] %vm827_vm11, %v1082_v7  ;;  %v2754_v8 = vpop.f32.mrf.mxu0  ;;  %v1085_v10 = vsel %vm827_vm11, %v1082_v7, -inf }
 0xad1   : > { %1086 = vmax.xlane.f32.xlu1 %v1085_v10 }
 0xad2   : > { %v1078_v11 = vpop.f32.mrf.mxu0 }
 0xad4   : > { %v2755_v12 = vpop.f32.mrf.mxu0 }
 0xb5a   : > { %v1087_v14 = vpop.xlane.xlu1 %1086 }
 0xb5b   : > { %v1088_v15 = vmax.f32 %v1084_v13, %v1087_v14 }
 0xb5d   : > { %1089 = vst.msk [vmem:[#allocation5] sm:$0xff] %vm695_vm0, %v1088_v15 }
 0xb5e PF: > { %1092 = sbr.rel (%p565_p0) target bundleno = 3377 (0xd31), region = 132  ;;  %s3418_s12 = smov (!%p565_p0), 120  }
 0xb5f   : > { %s3420_s18 = smov (!%p565_p0), 8  }
 0xb63   : > { %v3071_v16 = vld [vmem:[#allocation2 + $0x4] ss:$0 sps:$4 sm:$0xff]   ;;  %v3417_v17 = vmov 0.0   ;;  %vm3419_vm9 = vmmov 0   ;;  %v1148_v21 = vadd.s32 8, %v3729_v25  ;;  %vm1155_vm12 = vcmask 130112  }
 0xb64   : > { %2756 = vmatprep.subr.bf16.mxu0 %v3417_v17  ;;  %1100 = vrot.lane.b32.xlu0 %v3071_v16, %s3418_s12  ;;  %v1157_v31 = vld [vmem:[#allocation5] sm:$0xff] }
 0xb65   : > { %2758 = vmatprep.mubr.msk.bf16.mxu0 %vm3419_vm9, %v3417_v17  ;;  %vm1149_vm10 = vcmp.le.s32.totalorder %v1148_v21, %v3727_v24 }
 0xb68   : > { %1095 = vrot.lane.b32.xlu0 %v3734_v30, %s3418_s12 }
 0xbd6   : > { %v1101_v18 = vpop.permute.xlu0 %1100 }
 0xbd7   : > { %v1106_v19 = vsel %vm827_vm11, %v1101_v18, 0 }
 0xbd8   : > { %2757 = vmatpush3.bf16.xpose.msra.mxu0 %v1106_v19 }
 0xbda   : > { %v1096_v20 = vpop.permute.xlu0 %1095 }
 0xbdf   : > { %2759 = vmatmul.mubr.msk.bf16.vlgmr.msra.gmra.mxu0 %vm827_vm11, %v1096_v20 }
 0xc9f   : > { %v1142_v22 = vpop.f32.mrf.mxu0 }
 0xca0   : > { %v1150_v23 = vsel %vm1149_vm10, %v1142_v22, -1e+30 }
 0xca1   : > { %v2760_v26 = vpop.f32.mrf.mxu0  ;;  %v1158_v27 = vsel %vm827_vm11, %v1150_v23, -inf }
 0xca2   : > { %1159 = vmax.xlane.f32.xlu1 %v1158_v27 }
 0xca3   : > { %v1145_v28 = vpop.f32.mrf.mxu0 }
 0xca5   : > { %v2761_v29 = vpop.f32.mrf.mxu0 }
 0xcb3   : > { %1152 = vrot.lane.b32.xlu1 %v1150_v23, %s3420_s18 }
 0xd2b   : > { %v1160_v32 = vpop.xlane.xlu1 %1159 }
 0xd2c   : > { %v1161_v33 = vmax.f32 %v1157_v31, %v1160_v32 }
 0xd2e   : > { %1162 = vst.msk [vmem:[#allocation5] sm:$0xff] %vm695_vm0, %v1161_v33 }
 0xd2f   : > { %v1153_v34 = vpop.permute.xlu1 %1152 }
 0xd30   : > { %1156 = vst.msk [vmem:[#allocation4] sm:$0xff] %vm1155_vm12, %v1153_v34 }
 0xd31 PF: > { %1163 = vst.msk [vmem:[#allocation6] sm:$0xff] %vm695_vm0, %v3395_v9  ;;  %1167 = sbr.rel (%p2569_p1) target bundleno = 3727 (0xe8f), region = 136  ;;  %s3422_s22 = smov (!%p2569_p1), 120  }
 0xd32   : > { %1164 = vst.msk [vmem:[#allocation7] sm:$0xff] %vm827_vm11, %v3395_v9 }
 0xd36   : > { %v1169_v35 = vld [vmem:[#allocation5] sm:$0xff]  ;;  %v3421_v36 = vmov 0   ;;  %v3073_v37 = vld [vmem:[#allocation3] ss:$0 sps:$4 sm:$0xff]   ;;  %v3423_v38 = vmov 0.0   ;;  %vm3424_vm13 = vmmov 0  }
 0xd37   : > { %3072 = vset.pattern.permute.xlu0 %v3421_v36  ;;  %2762 = vmatprep.subr.bf16.mxu0 %v3423_v38  ;;  %v1168_v39 = vld [vmem:[#allocation4] sm:$0xff]  ;;  %vm1196_vm14 = vcmask 1043456  }
 0xd38   : > { %1172 = vperm.xlu0 %3072, %v1169_v35   ;;  %2764 = vmatprep.mubr.msk.bf16.mxu0 %vm3424_vm13, %v3423_v38  ;;  %v1179_v49 = vld [vmem:[#allocation6] sm:$0xff] }
 0xd39   : > { %v1185_v52 = vld [vmem:[#allocation7] sm:$0xff] }
 0xd3c   : > { %1191 = vrot.lane.b32.xlu0 %v3073_v37, %s3422_s22 }
 0xdb3   : > { %v1173_v40 = vpop.permute.xlu0 %1172 }
 0xdb4   : > { %v1175_v41 = vsub.f32 %v1168_v39, %v1173_v40 }
 0xdb6   : > { %v1176_v42 = vmul.f32 1.442695, %v1175_v41 }
 0xdb7   : > { %v1192_v43 = vpop.permute.xlu0 %1191 }
 0xdb8   : > { %3074 = vpow2.f32 %v1176_v42  ;;  %v1198_v44 = vsel %vm1196_vm14, %v1192_v43, 0 }
 0xdb9   : > { %2763 = vmatpush3.bf16.msra.mxu0 %v1198_v44 }
 0xdc5   : > { %v3075_v45 = vpop.eup %3074 }
 0xdc6   : > { %1178 = vst.msk [vmem:[#allocation4] sm:$0xff] %vm827_vm11, %v3075_v45  ;;  %v1180_v46 = vsel %vm827_vm11, %v3075_v45, 0.0  ;;  %v1186_v48 = vpack.c.bf16 %v3075_v45, %v3075_v45 }
 0xdc7   : > { %1181 = vadd.xlane.f32.xlu1 %v1180_v46 }
 0xdc8   : > { %2765 = vmatmul.mubr.msk.bf16.vlgmr.msra.gmra.mxu0 %vm827_vm11, %v1186_v48 }
 0xe50   : > { %v1182_v50 = vpop.xlane.xlu1 %1181 }
 0xe51   : > { %v1183_v51 = vadd.f32 %v1182_v50, %v1179_v49 }
 0xe53   : > { %1184 = vst.msk [vmem:[#allocation6] sm:$0xff] %vm695_vm0, %v1183_v51 }
 0xe88   : > { %v1234_v53 = vpop.f32.mrf.mxu0 }
 0xe89   : > { %v1240_v54 = vadd.f32 %v1234_v53, %v1185_v52 }
 0xe8a   : > { %v2766_v55 = vpop.f32.mrf.mxu0 }
 0xe8b   : > { %1241 = vst.msk [vmem:[#allocation7] sm:$0xff] %vm827_vm11, %v1240_v54 }
 0xe8c   : > { %v1237_v56 = vpop.f32.mrf.mxu0 }
 0xe8e   : > { %v2767_v57 = vpop.f32.mrf.mxu0 }
 0xe8f PF: > { %1244 = sbr.rel (%p565_p0) target bundleno = 4192 (0x1060), region = 140  ;;  %s3426_s7 = smov (!%p565_p0), 120  }
 0xe94   : > { %v1246_v58 = vld [vmem:[#allocation5] sm:$0xff]  ;;  %v3425_v59 = vmov 0   ;;  %v3077_v60 = vld [vmem:[#allocation3 + $0x4] ss:$0 sps:$4 sm:$0xff]   ;;  %v3427_v61 = vmov 0.0   ;;  %vm3428_vm15 = vmmov 0  }
 0xe95   : > { %3076 = vset.pattern.permute.xlu0 %v3425_v59  ;;  %2768 = vmatprep.subr.bf16.mxu0 %v3427_v61  ;;  %v1245_v62 = vld [vmem:[#allocation4] sm:$0xff]  ;;  %vm1282_vm3 = vcmask 1043456   ;;  %vm1255_vm5 = vcmask 130112   ;;  %v1257_v11 = vld [vmem:[#allocation6] sm:$0xff]  ;;  %v1267_v14 = vld [vmem:[#allocation7] sm:$0xff] }
 0xe96   : > { %1249 = vperm.xlu0 %3076, %v1246_v58   ;;  %2770 = vmatprep.mubr.msk.bf16.mxu0 %vm3428_vm15, %v3427_v61 }
 0xe9a   : > { %1277 = vrot.lane.b32.xlu0 %v3077_v60, %s3426_s7 }
 0xf11   : > { %v1250_v63 = vpop.permute.xlu0 %1249 }
 0xf12   : > { %v1252_v1 = vsub.f32 %v1245_v62, %v1250_v63 }
 0xf14   : > { %v1253_v2 = vmul.f32 1.442695, %v1252_v1 }
 0xf15   : > { %v1278_v3 = vpop.permute.xlu0 %1277 }
 0xf16   : > { %3078 = vpow2.f32 %v1253_v2  ;;  %v1284_v4 = vsel %vm1282_vm3, %v1278_v3, 0 }
 0xf17   : > { %2769 = vmatpush3.bf16.msra.mxu0 %v1284_v4 }
 0xf23   : > { %v3079_v5 = vpop.eup %3078 }
 0xf24   : > { %1256 = vst.msk [vmem:[#allocation4] sm:$0xff] %vm1255_vm5, %v3079_v5  ;;  %v1268_v6 = vpack.c.bf16 %v3079_v5, %v3079_v5 }
 0xf26   : > { %1272 = vrot.lane.b32.xlu1 %v1268_v6, %s3426_s7 }
 0xf2a   : > { %1259 = vrot.lane.b32.xlu1 %v3079_v5, %s3426_s7 }
 0xf98   : > { %v1273_v7 = vpop.permute.xlu1 %1272 }
 0xf99   : > { %2771 = vmatmul.mubr.msk.bf16.vlgmr.msra.gmra.mxu0 %vm827_vm11, %v1273_v7 }
 0xf9c   : > { %v1260_v8 = vpop.permute.xlu1 %1259 }
 0xf9d   : > { %v1262_v10 = vsel %vm827_vm11, %v1260_v8, 0.0 }
 0xf9e   : > { %1263 = vadd.xlane.f32.xlu0 %v1262_v10 }
0x1027   : > { %v1264_v12 = vpop.xlane.xlu0 %1263 }
0x1028   : > { %v1265_v13 = vadd.f32 %v1264_v12, %v1257_v11 }
0x102a   : > { %1266 = vst.msk [vmem:[#allocation6] sm:$0xff] %vm695_vm0, %v1265_v13 }
0x1059   : > { %v1320_v15 = vpop.f32.mrf.mxu0 }
0x105a   : > { %v1326_v16 = vadd.f32 %v1320_v15, %v1267_v14 }
0x105b   : > { %v2772_v17 = vpop.f32.mrf.mxu0 }
0x105c   : > { %1327 = vst.msk [vmem:[#allocation7] sm:$0xff] %vm827_vm11, %v1326_v16 }
0x105d   : > { %v1323_v18 = vpop.f32.mrf.mxu0 }
0x105f   : > { %v2773_v19 = vpop.f32.mrf.mxu0 }
0x1060 PF: > { %3080 = vset.pattern.permute.xlu0 %v3411_v47  ;;  %v1328_v20 = vld [vmem:[#allocation6] sm:$0xff]  ;;  %s3429_s20 = smov 8   ;;  %vm1347_vm6 = vcmask 126016  }
0x1061   : > { %3081 = vrcp.f32 %v1328_v20 }
0x1063   : > { %v1333_v27 = vld [vmem:[#allocation7] sm:$0xff] }
0x106e   : > { %v3082_v21 = vpop.eup %3081 }
0x106f   : > { %v1330_v22 = vmul.f32 %v3082_v21, %v1328_v20 }
0x1071   : > { %v1331_v23 = vsub.f32 2.0, %v1330_v22 }
0x1073   : > { %v1332_v26 = vmul.f32 %v3082_v21, %v1331_v23 }
0x1075   : > { %1336 = vperm.xlu0 %3080, %v1332_v26  }
0x10f0   : > { %v1337_v28 = vpop.permute.xlu0 %1336 }
0x10f1   : > { %v1339_v29 = vmul.f32 %v1337_v28, %v1333_v27 }
0x10f3   : > { %v2669_v31 = vpack.c.bf16 %v1339_v29, %v1339_v29 }
0x10f5   : > { %1344 = vrot.lane.b32.xlu0 %v2669_v31, %s3429_s20 }
0x1164   : > { %1351 = sbr.rel (%p2569_p1) target bundleno = 4463 (0x116f), region = 144 }
0x1167   : > { %v1345_v32 = vpop.permute.xlu0 %1344 }
0x1168   : > { %1348 = vst.msk [vmem:[#allocation8] sm:$0xf] %vm1347_vm6, %v1345_v32 }
0x1169   : > { %v1352_v33 = vld [vmem:[#allocation4] sm:$0xff] }
0x116a   : > { %v1353_v34 = vmul.f32 %v1352_v33, %v1337_v28 }
0x116c   : > { %v1354_v35 = vpack.c.bf16 %v1353_v34, %v1353_v34 }
0x116e   : > { %2595 = vst.msk [vmem:[%s3746_s23 + $0x4] sm:$0xf] %vm995_vm4, %v1354_v35 }
0x116f PF: > { %1359 = sbr.rel (%p2578_p7) target bundleno = 4470 (0x1176), region = 148 }
0x1174   : > { %v3430_v36 = vmov 0  }
0x1175   : > { %2597 = vst.msk [vmem:[%s3746_s23 + $0x4] sm:$0xf] %vm995_vm4, %v3430_v36 }
0x1176 PF: > { %1364 = sbr.rel (%p565_p0) target bundleno = 4481 (0x1181), region = 152 }
0x117b   : > { %v1365_v37 = vld [vmem:[#allocation4] sm:$0xff] }
0x117c   : > { %v1366_v38 = vmul.f32 %v1365_v37, %v1337_v28 }
0x117e   : > { %v1367_v39 = vpack.c.bf16 %v1366_v38, %v1366_v38 }
0x1180   : > { %2599 = vst.msk [vmem:[%s3746_s23 + $0x4] sm:$0xf] %vm1347_vm6, %v1367_v39 }
0x1181 PF: > { %1372 = sbr.rel (%p2580_p3) target bundleno = 4488 (0x1188), region = 156 }
0x1186   : > { %v3431_v40 = vmov 0  }
0x1187   : > { %2601 = vst.msk [vmem:[%s3746_s23 + $0x4] sm:$0xf] %vm1347_vm6, %v3431_v40 }
0x1188 PF: > { %1375 = vst.msk [vmem:[#allocation5] sm:$0xff] %vm695_vm0, %v3394_v0  ;;  %1378 = sbr.rel (%p2569_p1) target bundleno = 4953 (0x1359), region = 160  ;;  %s3433_s25 = smov (!%p2569_p1), 112  }
0x118d   : > { %v3083_v41 = vld [vmem:[#allocation2] ss:$0 sps:$4 sm:$0xff]   ;;  %v3432_v42 = vmov 0.0   ;;  %vm3434_vm7 = vmmov 0   ;;  %vm1433_vm8 = vcmp.le.s32.totalorder %v3729_v25, %v3727_v24 }
0x118e   : > { %2774 = vmatprep.subr.bf16.mxu0 %v3432_v42  ;;  %1385 = vrot.lane.b32.xlu0 %v3083_v41, %s3433_s25 }
0x118f   : > { %2776 = vmatprep.mubr.msk.bf16.mxu0 %vm3434_vm7, %v3432_v42  ;;  %v1436_v53 = vld [vmem:[#allocation5] sm:$0xff] }
0x1192   : > { %1380 = vrot.lane.b32.xlu0 %v3734_v30, %s3433_s25 }
0x1200   : > { %v1386_v43 = vpop.permute.xlu0 %1385 }
0x1201   : > { %v1391_v44 = vsel %vm827_vm11, %v1386_v43, 0 }
0x1202   : > { %2775 = vmatpush3.bf16.xpose.msra.mxu0 %v1391_v44 }
0x1204   : > { %v1381_v45 = vpop.permute.xlu0 %1380 }
0x1209   : > { %2777 = vmatmul.mubr.msk.bf16.vlgmr.msra.gmra.mxu0 %vm827_vm11, %v1381_v45 }
0x12c9   : > { %v1427_v46 = vpop.f32.mrf.mxu0 }
0x12ca   : > { %v1434_v48 = vsel %vm1433_vm8, %v1427_v46, -1e+30 }
0x12cb   : > { %1435 = vst.msk [vmem:[#allocation4] sm:$0xff] %vm827_vm11, %v1434_v48  ;;  %v2778_v49 = vpop.f32.mrf.mxu0  ;;  %v1437_v50 = vsel %vm827_vm11, %v1434_v48, -inf }
0x12cc   : > { %1438 = vmax.xlane.f32.xlu1 %v1437_v50 }
0x12cd   : > { %v1430_v51 = vpop.f32.mrf.mxu0 }
0x12cf   : > { %v2779_v52 = vpop.f32.mrf.mxu0 }
0x1355   : > { %v1439_v54 = vpop.xlane.xlu1 %1438 }
0x1356   : > { %v1440_v55 = vmax.f32 %v1436_v53, %v1439_v54 }
0x1358   : > { %1441 = vst.msk [vmem:[#allocation5] sm:$0xff] %vm695_vm0, %v1440_v55 }
0x1359 PF: > { %1444 = sbr.rel (%p565_p0) target bundleno = 5420 (0x152c), region = 164  ;;  %s3436_s15 = smov (!%p565_p0), 112  }
0x135a   : > { %s3438_s24 = smov (!%p565_p0), 8  }
0x135e   : > { %v3084_v56 = vld [vmem:[#allocation2 + $0x4] ss:$0 sps:$4 sm:$0xff]   ;;  %v3435_v57 = vmov 0.0   ;;  %vm3437_vm9 = vmmov 0   ;;  %v1500_v61 = vadd.s32 8, %v3729_v25  ;;  %vm1507_vm12 = vcmask 130112  }
0x135f   : > { %2780 = vmatprep.subr.bf16.mxu0 %v3435_v57  ;;  %1452 = vrot.lane.b32.xlu0 %v3084_v56, %s3436_s15  ;;  %v1509_v5 = vld [vmem:[#allocation5] sm:$0xff] }
0x1360   : > { %2782 = vmatprep.mubr.msk.bf16.mxu0 %vm3437_vm9, %v3435_v57  ;;  %vm1501_vm10 = vcmp.le.s32.totalorder %v1500_v61, %v3727_v24 }
0x1363   : > { %1447 = vrot.lane.b32.xlu0 %v3734_v30, %s3436_s15 }
0x13d1   : > { %v1453_v58 = vpop.permute.xlu0 %1452 }
0x13d2   : > { %v1458_v59 = vsel %vm827_vm11, %v1453_v58, 0 }
0x13d3   : > { %2781 = vmatpush3.bf16.xpose.msra.mxu0 %v1458_v59 }
0x13d5   : > { %v1448_v60 = vpop.permute.xlu0 %1447 }
0x13da   : > { %2783 = vmatmul.mubr.msk.bf16.vlgmr.msra.gmra.mxu0 %vm827_vm11, %v1448_v60 }
0x149a   : > { %v1494_v62 = vpop.f32.mrf.mxu0 }
0x149b   : > { %v1502_v63 = vsel %vm1501_vm10, %v1494_v62, -1e+30 }
0x149c   : > { %v2784_v1 = vpop.f32.mrf.mxu0  ;;  %v1510_v2 = vsel %vm827_vm11, %v1502_v63, -inf }
0x149d   : > { %1511 = vmax.xlane.f32.xlu1 %v1510_v2 }
0x149e   : > { %v1497_v3 = vpop.f32.mrf.mxu0 }
0x14a0   : > { %v2785_v4 = vpop.f32.mrf.mxu0 }
0x14ae   : > { %1504 = vrot.lane.b32.xlu1 %v1502_v63, %s3438_s24 }
0x1526   : > { %v1512_v6 = vpop.xlane.xlu1 %1511 }
0x1527   : > { %v1513_v7 = vmax.f32 %v1509_v5, %v1512_v6 }
0x1529   : > { %1514 = vst.msk [vmem:[#allocation5] sm:$0xff] %vm695_vm0, %v1513_v7 }
0x152a   : > { %v1505_v8 = vpop.permute.xlu1 %1504 }
0x152b   : > { %1508 = vst.msk [vmem:[#allocation4] sm:$0xff] %vm1507_vm12, %v1505_v8 }
0x152c PF: > { %1515 = vst.msk [vmem:[#allocation6] sm:$0xff] %vm695_vm0, %v3395_v9  ;;  %1519 = sbr.rel (%p2569_p1) target bundleno = 5770 (0x168a), region = 168  ;;  %s3440_s19 = smov (!%p2569_p1), 112  }
0x152d   : > { %1516 = vst.msk [vmem:[#allocation7] sm:$0xff] %vm827_vm11, %v3395_v9 }
0x1531   : > { %v1521_v10 = vld [vmem:[#allocation5] sm:$0xff]  ;;  %v3439_v11 = vmov 0   ;;  %v3086_v12 = vld [vmem:[#allocation3] ss:$0 sps:$4 sm:$0xff]   ;;  %v3441_v13 = vmov 0.0   ;;  %vm3442_vm13 = vmmov 0  }
0x1532   : > { %3085 = vset.pattern.permute.xlu0 %v3439_v11  ;;  %2786 = vmatprep.subr.bf16.mxu0 %v3441_v13  ;;  %v1520_v14 = vld [vmem:[#allocation4] sm:$0xff]  ;;  %vm1548_vm14 = vcmask 1043456  }
0x1533   : > { %1524 = vperm.xlu0 %3085, %v1521_v10   ;;  %2788 = vmatprep.mubr.msk.bf16.mxu0 %vm3442_vm13, %v3441_v13  ;;  %v1531_v23 = vld [vmem:[#allocation6] sm:$0xff] }
0x1534   : > { %v1537_v28 = vld [vmem:[#allocation7] sm:$0xff] }
0x1537   : > { %1543 = vrot.lane.b32.xlu0 %v3086_v12, %s3440_s19 }
0x15ae   : > { %v1525_v15 = vpop.permute.xlu0 %1524 }
0x15af   : > { %v1527_v16 = vsub.f32 %v1520_v14, %v1525_v15 }
0x15b1   : > { %v1528_v17 = vmul.f32 1.442695, %v1527_v16 }
0x15b2   : > { %v1544_v18 = vpop.permute.xlu0 %1543 }
0x15b3   : > { %3087 = vpow2.f32 %v1528_v17  ;;  %v1550_v19 = vsel %vm1548_vm14, %v1544_v18, 0 }
0x15b4   : > { %2787 = vmatpush3.bf16.msra.mxu0 %v1550_v19 }
0x15c0   : > { %v3088_v20 = vpop.eup %3087 }
0x15c1   : > { %1530 = vst.msk [vmem:[#allocation4] sm:$0xff] %vm827_vm11, %v3088_v20  ;;  %v1532_v21 = vsel %vm827_vm11, %v3088_v20, 0.0  ;;  %v1538_v22 = vpack.c.bf16 %v3088_v20, %v3088_v20 }
0x15c2   : > { %1533 = vadd.xlane.f32.xlu1 %v1532_v21 }
0x15c3   : > { %2789 = vmatmul.mubr.msk.bf16.vlgmr.msra.gmra.mxu0 %vm827_vm11, %v1538_v22 }
0x164b   : > { %v1534_v26 = vpop.xlane.xlu1 %1533 }
0x164c   : > { %v1535_v27 = vadd.f32 %v1534_v26, %v1531_v23 }
0x164e   : > { %1536 = vst.msk [vmem:[#allocation6] sm:$0xff] %vm695_vm0, %v1535_v27 }
0x1683   : > { %v1586_v29 = vpop.f32.mrf.mxu0 }
0x1684   : > { %v1592_v31 = vadd.f32 %v1586_v29, %v1537_v28 }
0x1685   : > { %v2790_v32 = vpop.f32.mrf.mxu0 }
0x1686   : > { %1593 = vst.msk [vmem:[#allocation7] sm:$0xff] %vm827_vm11, %v1592_v31 }
0x1687   : > { %v1589_v33 = vpop.f32.mrf.mxu0 }
0x1689   : > { %v2791_v34 = vpop.f32.mrf.mxu0 }
0x168a PF: > { %1596 = sbr.rel (%p565_p0) target bundleno = 6235 (0x185b), region = 172  ;;  %s3444_s13 = smov (!%p565_p0), 112  }
0x168b   : > { %s3447_s28 = smov (!%p565_p0), 120  }
0x168f   : > { %v1598_v35 = vld [vmem:[#allocation5] sm:$0xff]  ;;  %v3443_v36 = vmov 0   ;;  %v3090_v37 = vld [vmem:[#allocation3 + $0x4] ss:$0 sps:$4 sm:$0xff]   ;;  %v3445_v38 = vmov 0.0   ;;  %vm3446_vm15 = vmmov 0  }
0x1690   : > { %3089 = vset.pattern.permute.xlu0 %v3443_v36  ;;  %2792 = vmatprep.subr.bf16.mxu0 %v3445_v38  ;;  %v1597_v39 = vld [vmem:[#allocation4] sm:$0xff]  ;;  %vm1634_vm3 = vcmask 1043456   ;;  %vm1607_vm5 = vcmask 130112   ;;  %v1609_v51 = vld [vmem:[#allocation6] sm:$0xff]  ;;  %v1619_v54 = vld [vmem:[#allocation7] sm:$0xff] }
0x1691   : > { %1601 = vperm.xlu0 %3089, %v1598_v35   ;;  %2794 = vmatprep.mubr.msk.bf16.mxu0 %vm3446_vm15, %v3445_v38 }
0x1695   : > { %1629 = vrot.lane.b32.xlu0 %v3090_v37, %s3444_s13 }
0x170c   : > { %v1602_v40 = vpop.permute.xlu0 %1601 }
0x170d   : > { %v1604_v41 = vsub.f32 %v1597_v39, %v1602_v40 }
0x170f   : > { %v1605_v42 = vmul.f32 1.442695, %v1604_v41 }
0x1710   : > { %v1630_v43 = vpop.permute.xlu0 %1629 }
0x1711   : > { %3091 = vpow2.f32 %v1605_v42  ;;  %v1636_v44 = vsel %vm1634_vm3, %v1630_v43, 0 }
0x1712   : > { %2793 = vmatpush3.bf16.msra.mxu0 %v1636_v44 }
0x171e   : > { %v3092_v45 = vpop.eup %3091 }
0x171f   : > { %1608 = vst.msk [vmem:[#allocation4] sm:$0xff] %vm1607_vm5, %v3092_v45  ;;  %v1620_v46 = vpack.c.bf16 %v3092_v45, %v3092_v45 }
0x1721   : > { %1624 = vrot.lane.b32.xlu1 %v1620_v46, %s3447_s28 }
0x1725   : > { %1611 = vrot.lane.b32.xlu1 %v3092_v45, %s3447_s28 }
0x1793   : > { %v1625_v48 = vpop.permute.xlu1 %1624 }
0x1794   : > { %2795 = vmatmul.mubr.msk.bf16.vlgmr.msra.gmra.mxu0 %vm827_vm11, %v1625_v48 }
0x1797   : > { %v1612_v49 = vpop.permute.xlu1 %1611 }
0x1798   : > { %v1614_v50 = vsel %vm827_vm11, %v1612_v49, 0.0 }
0x1799   : > { %1615 = vadd.xlane.f32.xlu0 %v1614_v50 }
0x1822   : > { %v1616_v52 = vpop.xlane.xlu0 %1615 }
0x1823   : > { %v1617_v53 = vadd.f32 %v1616_v52, %v1609_v51 }
0x1825   : > { %1618 = vst.msk [vmem:[#allocation6] sm:$0xff] %vm695_vm0, %v1617_v53 }
0x1854   : > { %v1672_v55 = vpop.f32.mrf.mxu0 }
0x1855   : > { %v1678_v56 = vadd.f32 %v1672_v55, %v1619_v54 }
0x1856   : > { %v2796_v57 = vpop.f32.mrf.mxu0 }
0x1857   : > { %1679 = vst.msk [vmem:[#allocation7] sm:$0xff] %vm827_vm11, %v1678_v56 }
0x1858   : > { %v1675_v58 = vpop.f32.mrf.mxu0 }
0x185a   : > { %v2797_v59 = vpop.f32.mrf.mxu0 }
0x185b PF: > { %3093 = vset.pattern.permute.xlu0 %v3411_v47  ;;  %v1680_v60 = vld [vmem:[#allocation6] sm:$0xff]  ;;  %s3448_s12 = smov 16   ;;  %vm1699_vm7 = vcmask 191616  }
0x185c   : > { %3094 = vrcp.f32 %v1680_v60 }
0x185e   : > { %v1685_v2 = vld [vmem:[#allocation7] sm:$0xff] }
0x1869   : > { %v3095_v61 = vpop.eup %3094 }
0x186a   : > { %v1682_v62 = vmul.f32 %v3095_v61, %v1680_v60 }
0x186c   : > { %v1683_v63 = vsub.f32 2.0, %v1682_v62 }
0x186e   : > { %v1684_v1 = vmul.f32 %v3095_v61, %v1683_v63 }
0x1870   : > { %1688 = vperm.xlu0 %3093, %v1684_v1  }
0x18eb   : > { %v1689_v3 = vpop.permute.xlu0 %1688 }
0x18ec   : > { %v1691_v4 = vmul.f32 %v1689_v3, %v1685_v2 }
0x18ee   : > { %v2670_v5 = vpack.c.bf16 %v1691_v4, %v1691_v4 }
0x18f0   : > { %1696 = vrot.lane.b32.xlu0 %v2670_v5, %s3448_s12 }
0x195f   : > { %1703 = sbr.rel (%p2569_p1) target bundleno = 6506 (0x196a), region = 176 }
0x1962   : > { %v1697_v6 = vpop.permute.xlu0 %1696 }
0x1963   : > { %1700 = vst.msk [vmem:[#allocation8] sm:$0xf] %vm1699_vm7, %v1697_v6 }
0x1964   : > { %v1704_v7 = vld [vmem:[#allocation4] sm:$0xff] }
0x1965   : > { %v1705_v8 = vmul.f32 %v1704_v7, %v1689_v3 }
0x1967   : > { %v1706_v10 = vpack.c.bf16 %v1705_v8, %v1705_v8 }
0x1969   : > { %2616 = vst.msk [vmem:[%s3746_s23 + $0x8] sm:$0xf] %vm995_vm4, %v1706_v10 }
0x196a PF: > { %1711 = sbr.rel (%p2578_p7) target bundleno = 6513 (0x1971), region = 180 }
0x196f   : > { %v3449_v11 = vmov 0  }
0x1970   : > { %2618 = vst.msk [vmem:[%s3746_s23 + $0x8] sm:$0xf] %vm995_vm4, %v3449_v11 }
0x1971 PF: > { %1716 = sbr.rel (%p565_p0) target bundleno = 6524 (0x197c), region = 184 }
0x1976   : > { %v1717_v12 = vld [vmem:[#allocation4] sm:$0xff] }
0x1977   : > { %v1718_v13 = vmul.f32 %v1717_v12, %v1689_v3 }
0x1979   : > { %v1719_v14 = vpack.c.bf16 %v1718_v13, %v1718_v13 }
0x197b   : > { %2620 = vst.msk [vmem:[%s3746_s23 + $0x8] sm:$0xf] %vm1347_vm6, %v1719_v14 }
0x197c PF: > { %1724 = sbr.rel (%p2580_p3) target bundleno = 6531 (0x1983), region = 188 }
0x1981   : > { %v3450_v15 = vmov 0  }
0x1982   : > { %2622 = vst.msk [vmem:[%s3746_s23 + $0x8] sm:$0xf] %vm1347_vm6, %v3450_v15 }
0x1983 PF: > { %1727 = vst.msk [vmem:[#allocation5] sm:$0xff] %vm695_vm0, %v3394_v0  ;;  %1730 = sbr.rel (%p2569_p1) target bundleno = 6996 (0x1b54), region = 192  ;;  %s3452_s18 = smov (!%p2569_p1), 104  }
0x1988   : > { %v3096_v16 = vld [vmem:[#allocation2] ss:$0 sps:$4 sm:$0xff]   ;;  %v3451_v17 = vmov 0.0   ;;  %vm3453_vm8 = vmmov 0   ;;  %vm1785_vm9 = vcmp.le.s32.totalorder %v3729_v25, %v3727_v24 }
0x1989   : > { %2798 = vmatprep.subr.bf16.mxu0 %v3451_v17  ;;  %1737 = vrot.lane.b32.xlu0 %v3096_v16, %s3452_s18 }
0x198a   : > { %2800 = vmatprep.mubr.msk.bf16.mxu0 %vm3453_vm8, %v3451_v17  ;;  %v1788_v28 = vld [vmem:[#allocation5] sm:$0xff] }
0x198d   : > { %1732 = vrot.lane.b32.xlu0 %v3734_v30, %s3452_s18 }
0x19fb   : > { %v1738_v18 = vpop.permute.xlu0 %1737 }
0x19fc   : > { %v1743_v19 = vsel %vm827_vm11, %v1738_v18, 0 }
0x19fd   : > { %2799 = vmatpush3.bf16.xpose.msra.mxu0 %v1743_v19 }
0x19ff   : > { %v1733_v20 = vpop.permute.xlu0 %1732 }
0x1a04   : > { %2801 = vmatmul.mubr.msk.bf16.vlgmr.msra.gmra.mxu0 %vm827_vm11, %v1733_v20 }
0x1ac4   : > { %v1779_v0 = vpop.f32.mrf.mxu0 }
0x1ac5   : > { %v1786_v21 = vsel %vm1785_vm9, %v1779_v0, -1e+30 }
0x1ac6   : > { %1787 = vst.msk [vmem:[#allocation4] sm:$0xff] %vm827_vm11, %v1786_v21  ;;  %v2802_v22 = vpop.f32.mrf.mxu0  ;;  %v1789_v23 = vsel %vm827_vm11, %v1786_v21, -inf }
0x1ac7   : > { %1790 = vmax.xlane.f32.xlu1 %v1789_v23 }
0x1ac8   : > { %v1782_v26 = vpop.f32.mrf.mxu0 }
0x1aca   : > { %v2803_v27 = vpop.f32.mrf.mxu0 }
0x1b50   : > { %v1791_v29 = vpop.xlane.xlu1 %1790 }
0x1b51   : > { %v1792_v31 = vmax.f32 %v1788_v28, %v1791_v29 }
0x1b53   : > { %1793 = vst.msk [vmem:[#allocation5] sm:$0xff] %vm695_vm0, %v1792_v31 }
0x1b54 PF: > { %1796 = sbr.rel (%p565_p0) target bundleno = 7463 (0x1d27), region = 196  ;;  %s3455_s22 = smov (!%p565_p0), 104  }
0x1b55   : > { %s3457_s7 = smov (!%p565_p0), 8  }
0x1b59   : > { %v3097_v32 = vld [vmem:[#allocation2 + $0x4] ss:$0 sps:$4 sm:$0xff]   ;;  %v3454_v33 = vmov 0.0   ;;  %vm3456_vm10 = vmmov 0   ;;  %v1852_v37 = vadd.s32 8, %v3729_v25  ;;  %vm1859_vm13 = vcmask 130112  }
0x1b5a   : > { %2804 = vmatprep.subr.bf16.mxu0 %v3454_v33  ;;  %1804 = vrot.lane.b32.xlu0 %v3097_v32, %s3455_s22 }
0x1b5b   : > { %2806 = vmatprep.mubr.msk.bf16.mxu0 %vm3456_vm10, %v3454_v33  ;;  %vm1853_vm12 = vcmp.le.s32.totalorder %v1852_v37, %v3727_v24 }
0x1b5e   : > { %1799 = vrot.lane.b32.xlu0 %v3734_v30, %s3455_s22  ;;  %v1861_v30 = vld [vmem:[#allocation5] sm:$0xff] }
0x1bcc   : > { %v1805_v34 = vpop.permute.xlu0 %1804 }
0x1bcd   : > { %v1810_v35 = vsel %vm827_vm11, %v1805_v34, 0 }
0x1bce   : > { %2805 = vmatpush3.bf16.xpose.msra.mxu0 %v1810_v35 }
0x1bd0   : > { %v1800_v36 = vpop.permute.xlu0 %1799 }
0x1bd5   : > { %2807 = vmatmul.mubr.msk.bf16.vlgmr.msra.gmra.mxu0 %vm827_vm11, %v1800_v36 }
0x1c95   : > { %v1846_v38 = vpop.f32.mrf.mxu0 }
0x1c96   : > { %v1854_v39 = vsel %vm1853_vm12, %v1846_v38, -1e+30 }
0x1c97   : > { %v2808_v40 = vpop.f32.mrf.mxu0  ;;  %v1862_v41 = vsel %vm827_vm11, %v1854_v39, -inf }
0x1c98   : > { %1863 = vmax.xlane.f32.xlu1 %v1862_v41 }
0x1c99   : > { %v1849_v42 = vpop.f32.mrf.mxu0 }
0x1c9b   : > { %v2809_v43 = vpop.f32.mrf.mxu0 }
0x1ca9   : > { %1856 = vrot.lane.b32.xlu1 %v1854_v39, %s3457_s7 }
0x1d21   : > { %v1864_v44 = vpop.xlane.xlu1 %1863 }
0x1d22   : > { %v1865_v45 = vmax.f32 %v1861_v30, %v1864_v44 }
0x1d24   : > { %1866 = vst.msk [vmem:[#allocation5] sm:$0xff] %vm695_vm0, %v1865_v45 }
0x1d25   : > { %v1857_v46 = vpop.permute.xlu1 %1856 }
0x1d26   : > { %1860 = vst.msk [vmem:[#allocation4] sm:$0xff] %vm1859_vm13, %v1857_v46 }
0x1d27 PF: > { %1867 = vst.msk [vmem:[#allocation6] sm:$0xff] %vm695_vm0, %v3395_v9  ;;  %1871 = sbr.rel (%p2569_p1) target bundleno = 7813 (0x1e85), region = 200  ;;  %s3459_s20 = smov (!%p2569_p1), 104  }
0x1d28   : > { %1868 = vst.msk [vmem:[#allocation7] sm:$0xff] %vm827_vm11, %v3395_v9 }
0x1d2c   : > { %v1873_v24 = vld [vmem:[#allocation5] sm:$0xff]  ;;  %v3458_v25 = vmov 0   ;;  %v3099_v48 = vld [vmem:[#allocation3] ss:$0 sps:$4 sm:$0xff]   ;;  %v3460_v49 = vmov 0.0   ;;  %vm3461_vm14 = vmmov 0  }
0x1d2d   : > { %3098 = vset.pattern.permute.xlu0 %v3458_v25  ;;  %2810 = vmatprep.subr.bf16.mxu0 %v3460_v49  ;;  %v1872_v50 = vld [vmem:[#allocation4] sm:$0xff]  ;;  %vm1900_vm15 = vcmask 1043456  }
0x1d2e   : > { %1876 = vperm.xlu0 %3098, %v1873_v24   ;;  %2812 = vmatprep.mubr.msk.bf16.mxu0 %vm3461_vm14, %v3460_v49  ;;  %v1883_v59 = vld [vmem:[#allocation6] sm:$0xff] }
0x1d2f   : > { %v1889_v62 = vld [vmem:[#allocation7] sm:$0xff] }
0x1d32   : > { %1895 = vrot.lane.b32.xlu0 %v3099_v48, %s3459_s20 }
0x1da9   : > { %v1877_v51 = vpop.permute.xlu0 %1876 }
0x1daa   : > { %v1879_v52 = vsub.f32 %v1872_v50, %v1877_v51 }
0x1dac   : > { %v1880_v53 = vmul.f32 1.442695, %v1879_v52 }
0x1dad   : > { %v1896_v54 = vpop.permute.xlu0 %1895 }
0x1dae   : > { %3100 = vpow2.f32 %v1880_v53  ;;  %v1902_v55 = vsel %vm1900_vm15, %v1896_v54, 0 }
0x1daf   : > { %2811 = vmatpush3.bf16.msra.mxu0 %v1902_v55 }
0x1dbb   : > { %v3101_v56 = vpop.eup %3100 }
0x1dbc   : > { %1882 = vst.msk [vmem:[#allocation4] sm:$0xff] %vm827_vm11, %v3101_v56  ;;  %v1884_v57 = vsel %vm827_vm11, %v3101_v56, 0.0  ;;  %v1890_v58 = vpack.c.bf16 %v3101_v56, %v3101_v56 }
0x1dbd   : > { %1885 = vadd.xlane.f32.xlu1 %v1884_v57 }
0x1dbe   : > { %2813 = vmatmul.mubr.msk.bf16.vlgmr.msra.gmra.mxu0 %vm827_vm11, %v1890_v58 }
0x1e46   : > { %v1886_v60 = vpop.xlane.xlu1 %1885 }
0x1e47   : > { %v1887_v61 = vadd.f32 %v1886_v60, %v1883_v59 }
0x1e49   : > { %1888 = vst.msk [vmem:[#allocation6] sm:$0xff] %vm695_vm0, %v1887_v61 }
0x1e7e   : > { %v1938_v63 = vpop.f32.mrf.mxu0 }
0x1e7f   : > { %v1944_v1 = vadd.f32 %v1938_v63, %v1889_v62 }
0x1e80   : > { %v2814_v2 = vpop.f32.mrf.mxu0 }
0x1e81   : > { %1945 = vst.msk [vmem:[#allocation7] sm:$0xff] %vm827_vm11, %v1944_v1 }
0x1e82   : > { %v1941_v3 = vpop.f32.mrf.mxu0 }
0x1e84   : > { %v2815_v4 = vpop.f32.mrf.mxu0 }
0x1e85 PF: > { %1948 = sbr.rel (%p565_p0) target bundleno = 8278 (0x2056), region = 204  ;;  %s3463_s25 = smov (!%p565_p0), 104  }
0x1e86   : > { %s3466_s15 = smov (!%p565_p0), 120  }
0x1e8a   : > { %v1950_v5 = vld [vmem:[#allocation5] sm:$0xff]  ;;  %v3462_v6 = vmov 0   ;;  %v3103_v7 = vld [vmem:[#allocation3 + $0x4] ss:$0 sps:$4 sm:$0xff]   ;;  %v3464_v8 = vmov 0.0   ;;  %vm3465_vm3 = vmmov 0  }
0x1e8b   : > { %3102 = vset.pattern.permute.xlu0 %v3462_v6  ;;  %2816 = vmatprep.subr.bf16.mxu0 %v3464_v8  ;;  %v1949_v10 = vld [vmem:[#allocation4] sm:$0xff]  ;;  %vm1986_vm5 = vcmask 1043456   ;;  %vm1959_vm7 = vcmask 130112   ;;  %v1961_v0 = vld [vmem:[#allocation6] sm:$0xff]  ;;  %v1971_v23 = vld [vmem:[#allocation7] sm:$0xff] }
0x1e8c   : > { %1953 = vperm.xlu0 %3102, %v1950_v5   ;;  %2818 = vmatprep.mubr.msk.bf16.mxu0 %vm3465_vm3, %v3464_v8 }
0x1e90   : > { %1981 = vrot.lane.b32.xlu0 %v3103_v7, %s3463_s25 }
0x1f07   : > { %v1954_v11 = vpop.permute.xlu0 %1953 }
0x1f08   : > { %v1956_v12 = vsub.f32 %v1949_v10, %v1954_v11 }
0x1f0a   : > { %v1957_v13 = vmul.f32 1.442695, %v1956_v12 }
0x1f0b   : > { %v1982_v14 = vpop.permute.xlu0 %1981 }
0x1f0c   : > { %3104 = vpow2.f32 %v1957_v13  ;;  %v1988_v15 = vsel %vm1986_vm5, %v1982_v14, 0 }
0x1f0d   : > { %2817 = vmatpush3.bf16.msra.mxu0 %v1988_v15 }
0x1f19   : > { %v3105_v16 = vpop.eup %3104 }
0x1f1a   : > { %1960 = vst.msk [vmem:[#allocation4] sm:$0xff] %vm1959_vm7, %v3105_v16  ;;  %v1972_v17 = vpack.c.bf16 %v3105_v16, %v3105_v16 }
0x1f1c   : > { %1976 = vrot.lane.b32.xlu1 %v1972_v17, %s3466_s15 }
0x1f20   : > { %1963 = vrot.lane.b32.xlu1 %v3105_v16, %s3466_s15 }
0x1f8e   : > { %v1977_v18 = vpop.permute.xlu1 %1976 }
0x1f8f   : > { %2819 = vmatmul.mubr.msk.bf16.vlgmr.msra.gmra.mxu0 %vm827_vm11, %v1977_v18 }
0x1f92   : > { %v1964_v19 = vpop.permute.xlu1 %1963 }
0x1f93   : > { %v1966_v20 = vsel %vm827_vm11, %v1964_v19, 0.0 }
0x1f94   : > { %1967 = vadd.xlane.f32.xlu0 %v1966_v20 }
0x201d   : > { %v1968_v21 = vpop.xlane.xlu0 %1967 }
0x201e   : > { %v1969_v22 = vadd.f32 %v1968_v21, %v1961_v0 }
0x2020   : > { %1970 = vst.msk [vmem:[#allocation6] sm:$0xff] %vm695_vm0, %v1969_v22 }
0x204f   : > { %v2024_v26 = vpop.f32.mrf.mxu0 }
0x2050   : > { %v2030_v27 = vadd.f32 %v2024_v26, %v1971_v23 }
0x2051   : > { %v2820_v28 = vpop.f32.mrf.mxu0 }
0x2052   : > { %2031 = vst.msk [vmem:[#allocation7] sm:$0xff] %vm827_vm11, %v2030_v27 }
0x2053   : > { %v2027_v29 = vpop.f32.mrf.mxu0 }
0x2055   : > { %v2821_v31 = vpop.f32.mrf.mxu0 }
0x2056 PF: > { %3106 = vset.pattern.permute.xlu0 %v3411_v47  ;;  %v2032_v32 = vld [vmem:[#allocation6] sm:$0xff]  ;;  %s3467_s24 = smov 24   ;;  %vm2051_vm0 = vcmask 257216  }
0x2057   : > { %3107 = vrcp.f32 %v2032_v32 }
0x2059   : > { %v2037_v37 = vld [vmem:[#allocation7] sm:$0xff] }
0x2064   : > { %v3108_v33 = vpop.eup %3107 }
0x2065   : > { %v2034_v34 = vmul.f32 %v3108_v33, %v2032_v32 }
0x2067   : > { %v2035_v35 = vsub.f32 2.0, %v2034_v34 }
0x2069   : > { %v2036_v36 = vmul.f32 %v3108_v33, %v2035_v35 }
0x206b   : > { %2040 = vperm.xlu0 %3106, %v2036_v36  }
0x20e6   : > { %v2041_v38 = vpop.permute.xlu0 %2040 }
0x20e7   : > { %v2043_v39 = vmul.f32 %v2041_v38, %v2037_v37 }
0x20e9   : > { %v2671_v40 = vpack.c.bf16 %v2043_v39, %v2043_v39 }
0x20eb   : > { %2048 = vrot.lane.b32.xlu0 %v2671_v40, %s3467_s24 }
0x215a   : > { %2055 = sbr.rel (%p2569_p1) target bundleno = 8549 (0x2165), region = 208 }
0x215d   : > { %v2049_v41 = vpop.permute.xlu0 %2048 }
0x215e   : > { %2052 = vst.msk [vmem:[#allocation8] sm:$0xf] %vm2051_vm0, %v2049_v41 }
0x215f   : > { %v2056_v47 = vld [vmem:[#allocation4] sm:$0xff] }
0x2160   : > { %v2057_v42 = vmul.f32 %v2056_v47, %v2041_v38 }
0x2162   : > { %v2058_v43 = vpack.c.bf16 %v2057_v42, %v2057_v42 }
0x2164   : > { %2637 = vst.msk [vmem:[%s3746_s23 + $0xc] sm:$0xf] %vm995_vm4, %v2058_v43 }
0x2165 PF: > { %2063 = sbr.rel (%p2578_p7) target bundleno = 8556 (0x216c), region = 212 }
0x216a   : > { %v3468_v30 = vmov 0  }
0x216b   : > { %2639 = vst.msk [vmem:[%s3746_s23 + $0xc] sm:$0xf] %vm995_vm4, %v3468_v30 }
0x216c PF: > { %2068 = sbr.rel (%p565_p0) target bundleno = 8567 (0x2177), region = 216 }
0x2171   : > { %v2069_v44 = vld [vmem:[#allocation4] sm:$0xff] }
0x2172   : > { %v2070_v45 = vmul.f32 %v2069_v44, %v2041_v38 }
0x2174   : > { %v2071_v46 = vpack.c.bf16 %v2070_v45, %v2070_v45 }
0x2176   : > { %2641 = vst.msk [vmem:[%s3746_s23 + $0xc] sm:$0xf] %vm1347_vm6, %v2071_v46 }
0x2177 PF: > { %2076 = sbr.rel (%p2580_p3) target bundleno = 8574 (0x217e), region = 220 }
0x217c   : > { %v3469_v24 = vmov 0  }
0x217d   : > { %2643 = vst.msk [vmem:[%s3746_s23 + $0xc] sm:$0xf] %vm1347_vm6, %v3469_v24 }
0x217e PF: > { %2822 = vmatprep.subr.bf16.mxu1 %v3395_v9  ;;  %v3109_v25 = vld [vmem:[#allocation9 + $0x8] sm:$0xff]   ;;  %2826 = vmatprep.mubr.msk.bf16.mxu1 %vm3396_vm2, %v3395_v9  ;;  %v3110_v48 = vld [vmem:[#allocation9] sm:$0xff]   ;;  %v2079_v49 = vld [vmem:[#allocation8] sm:$0xf]  ;;  %s2664_s24 = sshll.u32 %s3373_s17, 3  ;;  %s2371_s28 = sshll.u32 %s3746_s23, 4  ;;  %s4003_s28 = int_to_ptr.vmem [resolvable:$true] %s2371_s28 }
0x217f   : > { %2838 = vmatprep.subr.bf16.mxu0 %v3395_v9  ;;  %2846 = vmatprep.mubr.msk.bf16.mxu0 %vm3396_vm2, %v3395_v9  ;;  %v2644_v50 = vld [vmem:[%s4097_s4] ss:$0 sm:$0xff]  ;;  %v3111_v62 = vld [vmem:[#allocation15 + $0x8] sm:$0xff]   ;;  %v3112_v63 = vld [vmem:[#allocation15] sm:$0xff]   ;;  %s2368_s19 = sadd.s32 %s3369_s16, %s2664_s24  ;;  %s2342_s7 = scalar_lea.sflag [#allocation20], %s3705_s26 }
0x2180   : > { %2823 = vmatpush3.bf16.msra.mxu1 %v3109_v25  ;;  %v2648_v5 = vld [vmem:[#allocation12] ss:$0 sm:$0xff]  ;;  %v2649_v7 = vld [vmem:[#allocation14] ss:$0 sm:$0xff]  ;;  %v3113_v12 = vld [vmem:[%s4104_s11 + $0x18] sm:$0xff]   ;;  %s2665_s13 = sshll.u32 %s2368_s19, 6 }
0x2181   : > { %2824 = vmatprep.subr.bf16.mxu1 %v3395_v9  ;;  %2839 = vmatpush3.bf16.msra.mxu0 %v3113_v12  ;;  %v3114_v13 = vld [vmem:[%s4104_s11 + $0x10] sm:$0xff]   ;;  %v3115_v14 = vld [vmem:[%s4104_s11 + $0x8] sm:$0xff]   ;;  %v3116_v15 = vld [vmem:[%s4104_s11] sm:$0xff]   ;;  %s4001_s22 = scalar_lea.hbm %s4107_s14, %s2665_s13  ;;  %s3251_s20 = scalar_lea.vmem %s4003_s28, 256 }
0x2182   : > { %2840 = vmatprep.subr.bf16.mxu0 %v3395_v9  ;;  %v2650_v16 = vld [vmem:[#allocation17] ss:$0 sm:$0xff]  ;;  %p3252_p9 = scmp.ne.s32.totalorder %s4003_s28, %s3251_s20  ;;  %p4149_p8 = scmp.ne.s32.totalorder %s4134_s27, 0 }
0x2183   : > { %s3470_s25 = smov [#allocation19]  }
0x2184   : > { %2825 = vmatpush3.bf16.msra.mxu1 %v3110_v48  ;;  %p3253_p11 = pnand %p3252_p9, %p4149_p8  ;;  %s3255_s15 = sshll.u32 %s3470_s25, 4  ;;  %s3256_s15 = int_to_ptr.vmem [resolvable:$false] %s3255_s15 }
0x2185   : > { %2830 = vmatprep.subr.bf16.mxu1 %v3395_v9  ;;  %2841 = vmatpush3.bf16.msra.mxu0 %v3114_v13  ;;  %s3257_s23 = scalar_lea.vmem %s3256_s15, 512  ;;  %p3258_p2 = scmp.lt.s32.totalorder %s4003_s28, %s3256_s15 }
0x2186   : > { %2842 = vmatprep.subr.bf16.mxu0 %v3395_v9  ;;  %p3254_p13 = pneg %p3253_p11  ;;  %p3259_p4 = scmp.lt.s32.totalorder %s3257_s23, %s3251_s20 }
0x2187   : > { %2827 = vmatmul.mubr.msk.bf16.vlgmr.msra.gmra.mxu1 %vm575_vm1, %v2079_v49 }
0x2188   : > { %2834 = vmatprep.mubr.msk.bf16.mxu1 %vm3396_vm2, %v3395_v9  ;;  %2831 = vmatpush3.bf16.msra.mxu1 %v3111_v62  ;;  %vm2291_vm2 = vcmask 523264   ;;  %p3260_p12 = por %p3259_p4, %p3258_p2 }
0x2189   : > { %2832 = vmatprep.subr.bf16.mxu1 %v3395_v9  ;;  %2843 = vmatpush3.bf16.msra.mxu0 %v3115_v14 }
0x218a   : > { %2844 = vmatprep.subr.bf16.mxu0 %v3395_v9  ;;  %p3261_p6 = pnand %p3260_p12, %p3254_p13 }
0x218c   : > { %2833 = vmatpush3.bf16.msra.mxu1 %v3112_v63 }
0x218d   : > { %2845 = vmatpush3.bf16.msra.mxu0 %v3116_v15 }
0x2247   : > { %v2140_v51 = vpop.f32.mrf.mxu1 }
0x2248   : > { %v2141_v52 = vadd.f32 %v2644_v50, %v2140_v51 }
0x2249   : > { %v2828_v53 = vpop.f32.mrf.mxu1 }
0x224a   : > { %v2148_v54 = vsel %vm575_vm1, %v2141_v52, 0.0 }
0x224b   : > { %2149 = vadd.xlane.f32.xlu0 %v2148_v54  ;;  %v2143_v55 = vpop.f32.mrf.mxu1 }
0x224d   : > { %v2829_v56 = vpop.f32.mrf.mxu1 }
0x22d4   : > { %v2150_v57 = vpop.xlane.xlu0 %2149 }
0x22d5   : > { %v2151_v58 = vmul.f32 0.03125, %v2150_v57 }
0x22d7   : > { %v2152_v59 = vsub.f32 %v2141_v52, %v2151_v58 }
0x22d9   : > { %v2153_v60 = vmul.f32 %v2152_v59, %v2152_v59 }
0x22db   : > { %v2154_v61 = vsel %vm575_vm1, %v2153_v60, 0.0 }
0x22dc   : > { %2155 = vadd.xlane.f32.xlu0 %v2154_v61 }
0x2365   : > { %v2156_v1 = vpop.xlane.xlu0 %2155 }
0x2366   : > { %v2157_v2 = vmul.f32 0.03125, %v2156_v1 }
0x2368   : > { %v2158_v3 = vadd.f32 1e-05, %v2157_v2 }
0x236a   : > { %3117 = vrsqrt.f32 %v2158_v3 }
0x2377   : > { %v3118_v4 = vpop.eup %3117 }
0x2378   : > { %v2160_v6 = vmul.f32 %v3118_v4, %v2152_v59 }
0x237a   : > { %v2167_v8 = vmul.f32 %v2648_v5, %v2160_v6 }
0x237c   : > { %v2174_v10 = vadd.f32 %v2649_v7, %v2167_v8 }
0x237e   : > { %v2175_v11 = vpack.c.bf16 %v2174_v10, %v2174_v10 }
0x2380   : > { %2835 = vmatmul.mubr.msk.bf16.vlgmr.msra.gmra.mxu1 %vm575_vm1, %v2175_v11 }
0x2440   : > { %v2236_v17 = vpop.f32.mrf.mxu1 }
0x2441   : > { %v2237_v18 = vadd.f32 %v2650_v16, %v2236_v17 }
0x2442   : > { %v2836_v19 = vpop.f32.mrf.mxu1 }
0x2443   : > { %v2242_v20 = vmul.f32 %v2237_v18, %v2237_v18 }
0x2444   : > { %v2239_v0 = vpop.f32.mrf.mxu1 }
0x2445   : > { %v2243_v21 = vmul.f32 %v2242_v20, %v2237_v18 }
0x2446   : > { %v2837_v22 = vpop.f32.mrf.mxu1 }
0x2447   : > { %v2244_v23 = vmul.f32 0.044715, %v2243_v21 }
0x2449   : > { %v2245_v26 = vadd.f32 %v2244_v23, %v2237_v18 }
0x244b   : > { %v2246_v27 = vmul.f32 0.7978846, %v2245_v26 }
0x244d   : > { %3119 = vtanh.f32 %v2246_v27 }
0x245a   : > { %v3120_v28 = vpop.eup %3119 }
0x245b   : > { %v2248_v9 = vadd.f32 1.0, %v3120_v28 }
0x245d   : > { %v2249_v29 = vmul.f32 0.5, %v2248_v9 }
0x245f   : > { %v2250_v31 = vmul.f32 %v2249_v29, %v2237_v18 }
0x2461   : > { %v2251_v32 = vpack.c.bf16 %v2250_v31, %v2250_v31 }
0x2463   : > { %2847 = vmatmul.mubr.msk.bf16.vlgmr.msra.gmra.mxu0 %vm2291_vm2, %v2251_v32 }
0x2464   : > { %3264 = shalt.err (!%p3261_p6)
}
0x2465   : > { %s3265_s24 = scalar_lea.hbm %s4001_s22, 256  ;;  %s3269_s12 = scalar_lea.hbm %s4107_s14, 1024 }
0x2466   : > { %p3266_p5 = scmp.ne.s32.totalorder %s4001_s22, %s3265_s24  ;;  %p3270_p1 = scmp.lt.s32.totalorder %s4001_s22, %s4107_s14 }
0x2467   : > { %p3271_p7 = scmp.lt.s32.totalorder %s3269_s12, %s3265_s24 }
0x2468   : > { %p3267_p10 = pnand %p3266_p5, %p4149_p8 }
0x2469   : > { %p3272_p3 = por %p3271_p7, %p3270_p1 }
0x246a   : > { %p3268_p0 = pneg %p3267_p10 }
0x246c   : > { %p3273_p9 = pnand %p3272_p3, %p3268_p0 }
0x246e   : > { %3276 = shalt.err (!%p3273_p9)
}
0x246f   : > { %s3471_s20 = smov 128   ;;  %s3472_s15 = smov 4  }
0x2470   : > { %2871 = dma.vmem_to_hbm [thread:$0]  (%p4149_p8), %s4003_s28, 256, %s4001_s22, %s2342_s7, %s3398_s21, %s3471_s20, %s3472_s15  }
0x2471   : > { %s2662_s23 = sshll.u32 %s3373_s17, 1  ;;  %s4150_s12 = sld [smem:[#allocation40_spill]] }
0x2472   : > { %s2353_s24 = sadd.s32 %s3369_s16, %s2662_s23  ;;  %s2357_s25 = sshll.u32 %s3742_s29, 4  ;;  %s4040_s25 = int_to_ptr.vmem [resolvable:$true] %s2357_s25 }
0x2473   : > { %s2663_s18 = sshll.u32 %s2353_s24, 7  ;;  %s4151_s2 = sld [smem:[#allocation41_spill]] }
0x2474   : > { %s2337_s16 = scalar_lea.sflag [#allocation11], %s3705_s26  ;;  %s3277_s17 = scalar_lea.vmem %s4040_s25, 128 }
0x2475   : > { %p3278_p11 = scmp.ne.s32.totalorder %s4040_s25, %s3277_s17  ;;  %s3473_s21 = smov [#allocation18]  }
0x2476   : > { %s3281_s28 = sshll.u32 %s3473_s21, 4  ;;  %s3282_s28 = int_to_ptr.vmem [resolvable:$false] %s3281_s28 }
0x2477   : > { %v2654_v33 = vld [vmem:[%s4150_s12] ss:$0 sm:$0xff]  ;;  %p3279_p13 = pnand %p3278_p11, %p4149_p8  ;;  %s3283_s0 = scalar_lea.vmem %s3282_s28, 256 }
0x2478   : > { %p3284_p4 = scmp.lt.s32.totalorder %s4040_s25, %s3282_s28  ;;  %p3285_p12 = scmp.lt.s32.totalorder %s3283_s0, %s3277_s17 }
0x2479   : > { %s4038_s3 = scalar_lea.hbm %s4151_s2, %s2663_s18  ;;  %p3280_p2 = pneg %p3279_p13 }
0x247a   : > { %p3286_p6 = por %p3285_p12, %p3284_p4 }
0x247c   : > { %p3287_p5 = pnand %p3286_p6, %p3280_p2 }
0x2523   : > { %v2329_v34 = vpop.f32.mrf.mxu0 }
0x2524   : > { %v2330_v35 = vadd.f32 %v2654_v33, %v2329_v34 }
0x2525   : > { %v2848_v36 = vpop.f32.mrf.mxu0 }
0x2526   : > { %2335 = vst.msk [vmem:[%s3742_s29] sm:$0xff] %vm575_vm1, %v2330_v35 }
0x2527   : > { %v2332_v37 = vpop.f32.mrf.mxu0 }
0x2528   : > { %3290 = shalt.err (!%p3287_p5)
}
0x2529   : > { %s3291_s1 = scalar_lea.hbm %s4038_s3, 128  ;;  %s3295_s22 = scalar_lea.hbm %s4151_s2, 512 }
0x252a   : > { %p3292_p10 = scmp.ne.s32.totalorder %s4038_s3, %s3291_s1  ;;  %p3296_p7 = scmp.lt.s32.totalorder %s4038_s3, %s4151_s2 }
0x252b   : > { %p3297_p3 = scmp.lt.s32.totalorder %s3295_s22, %s3291_s1 }
0x252c   : > { %p3293_p0 = pnand %p3292_p10, %p4149_p8 }
0x252d   : > { %p3298_p9 = por %p3297_p3, %p3296_p7 }
0x252e   : > { %p3294_p1 = pneg %p3293_p0 }
0x2530   : > { %p3299_p11 = pnand %p3298_p9, %p3294_p1 }
0x2532   : > { %3302 = shalt.err (!%p3299_p11)
}
0x2533   : > { %2870 = dma.vmem_to_hbm [thread:$0]  (%p4149_p8), %s4040_s25, 128, %s4038_s3, %s2337_s16   ;;  %v2849_v38 = vpop.f32.mrf.mxu0 }
0x2534 PF: > { %s4152_s15 = sld [smem:[#allocation30_spill]] }
0x2535   : > { %s4153_s23 = sld [smem:[#allocation26_spill]] }
0x2536   : > { %s4154_s24 = sld [smem:[#allocation33_spill]] }
0x253a   : > { %p2907_p13 = scmp.ge.s32.totalorder %s4152_s15, 2 }
0x253b   : > { %s2386_s19 = sand.u32 1, %s4153_s23  }
0x253c   : > { %p4155_p2 = scmp.ne.s32.totalorder %s4154_s24, 0  ;;  %s2387_s13 = scalar_lea.sflag [#allocation11], %s2386_s19 }
0x253e   : > { %p2891_p4 = pnand %p2907_p13, %p4155_p2 }
0x2540   : > { %p2892_p12 = pneg %p2891_p4 }
0x2542   : > { %3348 = dma.done.wait (%p2892_p12), %s2387_s13, 128  }
0x2543   : > { %3350 = vsyncadd (%p2892_p12), %s2387_s13, 4294967168  ;;  %s2396_s12 = scalar_lea.sflag [#allocation20], %s2386_s19 }
0x2544   : > { %3352 = dma.done.wait (%p2892_p12), %s2396_s12, 256  }
0x2545   : > { %3354 = vsyncadd (%p2892_p12), %s2396_s12, 4294967040  ;;  %s34_s20 = sadd.s32 1, %s4152_s15   ;;  %s4156_s3 = sld [smem:[#allocation27_spill]] }
0x2546   : > { %p31_p6 = scmp.ge.s32.totalorder %s34_s20, 6   ;;  %s4157_s15 = sld [smem:[#allocation34_spill]] }
0x2547   : > { %s4158_s16 = sld [smem:[#allocation28_spill]]  ;;  %s4162_s29 = smov %s3361_s30 }
0x2548   : > { %s4159_s17 = sld [smem:[#allocation29_spill]]  ;;  %33 = sbr.rel (!%p31_p6) target bundleno = 18 (0x12), region = 295 }
0x2549   : > { %s4160_s18 = sld [smem:[#allocation31_spill]] }
0x254a   : > { %s4161_s19 = sld [smem:[#allocation32_spill]] }
0x254b   : > { %s4163_s30 = smov %s4156_s3 }
0x254d   :  { %2401 = vsyncpa [#allocation10], 1 }
0x254e   :  { %2403 = vsyncpa [#allocation10 + $0x1], 1 }
0x254f   :  { %2404 = vsyncpa [#allocation13], 1 }
0x2550   :  { %2405 = vsyncpa [#allocation16], 1 }
0x2551   :  { %2406 = vsyncpa [#allocation11], 1 }
0x2552   :  { %2408 = vsyncpa [#allocation11 + $0x1], 1 }
0x2553   :  { %2409 = vsyncpa [#allocation20], 1 }
0x2554   :  { %2411 = vsyncpa [#allocation20 + $0x1], 1 }

</bundles_post_ra>
